<compile_context>
chip_gen: v7x
topology: tpu7x:2x2x1
jax: 0.10.0
libtpu: 0.0.40
codegen_flags: <defaults>
</compile_context>

<pallas_src>
import jax
import jax.numpy as jnp
from jax.experimental import pallas as pl
from jax.experimental.pallas import tpu as pltpu


_MXU_DTYPE = jnp.bfloat16        # MXU feed dtype (f32 accumulation)
_ACT_DTYPE = jnp.bfloat16        # HBM dtype for intermediate activations
_VMEM_LIMIT = 32 * 1024 * 1024   # safe on v5e/v6e/v7x (v7x physical = 64 MiB)
_MATMUL_ROWS_TARGET = 2048       # rows target for the conv-transpose tile
_CONV_VMEM_BUDGET = 6 << 20      # budget for conv in-kernel temporaries
_EW_BLOCK_BYTES = 4 << 20        # per-block target for the elementwise kernel


def _pick_tile(total, target, mult=1, min_steps=1):
    """Largest divisor of `total` that is a multiple of `mult`, <= `target`
    and leaves at least `min_steps` grid steps.  Falls back to `total`."""
    total, target = int(total), int(target)
    if total >= mult * min_steps:
        cap = min(target, total // max(min_steps, 1))
    else:
        cap = total
    cap = max(cap, mult)
    best = 0
    d = mult
    while d <= cap:
        if total % d == 0:
            best = d
        d += mult
    return best if best > 0 else total


# ----------------------------------------------------------------------------
# Kernel 1: ConvTranspose2d(kernel_size=2, stride=2)
# ----------------------------------------------------------------------------
def conv_transpose_2x2_s2(x_nhwc, w_pt, bias):
    """x_nhwc: (N, H, W, Cin) f32; w_pt: PyTorch (Cin, Cout, 2, 2); bias (Cout,).
    Returns (N, 2H, 2W, Cout) bf16."""
    N, H, W, Cin = map(int, x_nhwc.shape)
    Cout = int(w_pt.shape[1])
    rows = N * H
    tr = _pick_tile(rows, max(1, _MATMUL_ROWS_TARGET // max(W, 1)),
                    mult=1, min_steps=2)

    x3 = x_nhwc.reshape(rows, W, Cin)
    # (Cin, Cout, di, dj) -> (di, Cin, dj*Cout + co); pre-cast to bf16 once.
    w_k = jnp.transpose(w_pt, (2, 0, 3, 1)).reshape(2, Cin, 2 * Cout)
    w_k = w_k.astype(_MXU_DTYPE)
    b_row = jnp.tile(bias.astype(jnp.float32), 2).reshape(1, 2 * Cout)

    def kernel(x_ref, w_ref, b_ref, o_ref):
        x = x_ref[...].reshape(tr * W, Cin).astype(_MXU_DTYPE)
        b = b_ref[...]
        for di in range(2):
            r = jnp.dot(x, w_ref[di], preferred_element_type=jnp.float32) + b
            # r[t*W + j, dj*Cout + co] -> output pixel (2*row+di, 2j+dj, co)
            o_ref[:, di, :, :] = r.reshape(tr, W, 2 * Cout).astype(o_ref.dtype)

    out = pl.pallas_call(
        kernel,
        grid=(rows // tr,),
        in_specs=[
            pl.BlockSpec((tr, W, Cin), lambda i: (i, 0, 0)),
            pl.BlockSpec((2, Cin, 2 * Cout), lambda i: (0, 0, 0)),  # resident
            pl.BlockSpec((1, 2 * Cout), lambda i: (0, 0)),          # resident
        ],
        out_specs=pl.BlockSpec((tr, 2, W, 2 * Cout), lambda i: (i, 0, 0, 0)),
        out_shape=jax.ShapeDtypeStruct((rows, 2, W, 2 * Cout), _ACT_DTYPE),
        compiler_params=pltpu.CompilerParams(
            dimension_semantics=("parallel",),
            vmem_limit_bytes=_VMEM_LIMIT),
    )(x3, w_k, b_row)

    # (N*H, 2, W, 2, Cout) row-major == (N, 2H, 2W, Cout) row-major: free.
    return out.reshape(N, 2 * H, 2 * W, Cout)


# ----------------------------------------------------------------------------
# Kernel 2: fused (channel-concat) 3x3 conv + optional fused input BN/LeakyReLU
#           + per-tile partial BatchNorm statistics
# ----------------------------------------------------------------------------
def conv3x3_stats(srcs, w_pt, affines=None):
    """3x3 conv (stride 1, pad 1) over the channel concatenation of `srcs`
    (torch.cat fused into the kernel).  The conv bias is intentionally
    omitted: its output feeds training-mode BatchNorm with batch statistics,
    which exactly cancels any per-channel constant.

    affines[si] is None or (scale, shift) f32 per-channel vectors; for such a
    source the kernel applies LeakyReLU_0.01(scale*x + shift) and re-zeroes
    the spatial zero-padding border, fusing the previous stage's
    BatchNorm+LeakyReLU into this kernel's input path.

    Returns (y_pre (N,Ho,Wo,Cout) bf16, stats (2,Cout) f32 = [sum, sumsq])."""
    N, Ho, Wo, _ = map(int, srcs[0].shape)
    Cout, Cin_total = int(w_pt.shape[0]), int(w_pt.shape[1])
    c_sizes = [int(s.shape[-1]) for s in srcs]
    assert sum(c_sizes) == Cin_total
    # TODO(synk): odd output heights would need a different halo addressing.
    assert Ho % 2 == 0, "row-halo tiling assumes an even number of output rows"
    n_src = len(srcs)
    if affines is None:
        affines = [None] * n_src

    Wp = Wo + 2
    # channel-aware row-tile target (f32 per-ky slab + tiles + outputs).
    per_row = Wo * (24 * Cin_total + 8 * Cout) + 1
    th = _pick_tile(Ho, max(2, _CONV_VMEM_BUDGET // per_row), mult=2,
                    min_steps=1 if N >= 2 else 2)
    nH = Ho // th

    # zero pad 1 px on every side; the single bottom pad row doubles as the
    # last tile's 2-row halo (no (th-1)-row over-pad).
    padded = [jnp.pad(s, ((0, 0), (1, 1), (1, 1), (0, 0))) for s in srcs]

    # PyTorch OIHW -> per-ky im2col weights (3, 3*Cin_total, Cout); rows of
    # each ky slice ordered (source, kx, ci) to match the in-kernel columns.
    w_k = jnp.transpose(w_pt, (2, 3, 1, 0)).astype(jnp.float32)  # (ky,kx,ci,co)
    ky_blocks = []
    for ky in range(3):
        parts, off = [], 0
        for c in c_sizes:
            parts.append(w_k[ky, :, off:off + c, :].reshape(3 * c, Cout))
            off += c
        ky_blocks.append(jnp.concatenate(parts, axis=0))
    w_cat = jnp.stack(ky_blocks, axis=0).astype(_MXU_DTYPE)      # pre-cast once

    def kernel(*refs):
        idx = 0
        mains, halos = [], []
        for _ in range(n_src):
            mains.append(refs[idx]); halos.append(refs[idx + 1]); idx += 2
        aff_refs = []
        for si in range(n_src):
            if affines[si] is not None:
                aff_refs.append((refs[idx], refs[idx + 1])); idx += 2
            else:
                aff_refs.append(None)
        w_ref = refs[idx]
        y_ref, s_ref = refs[idx + 1], refs[idx + 2]

        i = pl.program_id(1)
        fulls = []
        for si in range(n_src):
            main = mains[si][0].astype(jnp.float32)   # padded rows [i*th, +th)
            halo = halos[si][0].astype(jnp.float32)   # padded rows [i*th+th, +2)
            full = jnp.concatenate([main, halo], axis=0)     # (th+2, Wp, C) f32
            if aff_refs[si] is not None:
                # fused previous-stage BatchNorm (batch stats) + LeakyReLU,
                # then re-zero this conv's spatial zero-padding border.
                sc_ref, sh_ref = aff_refs[si]
                v = full * sc_ref[...] + sh_ref[...]
                v = jnp.where(v > 0, v, 0.01 * v)
                grow = jax.lax.broadcasted_iota(jnp.int32, v.shape, 0) + i * th
                gcol = jax.lax.broadcasted_iota(jnp.int32, v.shape, 1)
                keep = ((grow != 0) & (grow != Ho + 1) &
                        (gcol != 0) & (gcol != Wp - 1))
                full = jnp.where(keep, v, 0.0)
            fulls.append(full)

        # 3 accumulating MXU calls (one per ky): K = 3*Cin slabs instead of
        # one 9*Cin im2col slab -> 3x smaller in-kernel temporaries.
        acc = None
        for ky in range(3):
            cols = []
            for si in range(n_src):
                f = fulls[si]
                for kx in range(3):
                    cols.append(f[ky:ky + th, kx:kx + Wo, :]
                                .reshape(th * Wo, c_sizes[si]))
            xk = jnp.concatenate(cols, axis=-1).astype(_MXU_DTYPE)
            part = jnp.dot(xk, w_ref[ky], preferred_element_type=jnp.float32)
            acc = part if acc is None else acc + part

        # per-tile partial BN statistics (f32, pre-downcast); host reduces.
        ssum = jnp.sum(acc, axis=0, keepdims=True)
        ssq = jnp.sum(acc * acc, axis=0, keepdims=True)
        s_ref[0, 0, :, :] = jnp.concatenate([ssum, ssq], axis=0)

        y_ref[0, :, :, :] = acc.reshape(th, Wo, Cout).astype(y_ref.dtype)

    in_specs, args = [], []
    for p, c in zip(padded, c_sizes):
        in_specs.append(pl.BlockSpec((1, th, Wp, c), lambda n, i: (n, i, 0, 0)))
        # 2-row halo block at element rows [i*th+th, i*th+th+2) (th is even).
        in_specs.append(pl.BlockSpec(
            (1, 2, Wp, c), lambda n, i: (n, (i + 1) * (th // 2), 0, 0)))
        args.extend([p, p])
    for si in range(n_src):
        if affines[si] is not None:
            sc, sh = affines[si]
            c = c_sizes[si]
            in_specs.append(pl.BlockSpec((1, c), lambda n, i: (0, 0)))
            in_specs.append(pl.BlockSpec((1, c), lambda n, i: (0, 0)))
            args.extend([sc.reshape(1, c).astype(jnp.float32),
                         sh.reshape(1, c).astype(jnp.float32)])
    in_specs.append(pl.BlockSpec((3, 3 * Cin_total, Cout),
                                 lambda n, i: (0, 0, 0)))       # resident
    args.append(w_cat)

    y_pre, stats = pl.pallas_call(
        kernel,
        grid=(N, nH),
        in_specs=in_specs,
        out_specs=(
            pl.BlockSpec((1, th, Wo, Cout), lambda n, i: (n, i, 0, 0)),
            pl.BlockSpec((1, 1, 2, Cout), lambda n, i: (n, i, 0, 0)),
        ),
        out_shape=(
            jax.ShapeDtypeStruct((N, Ho, Wo, Cout), _ACT_DTYPE),
            jax.ShapeDtypeStruct((N, nH, 2, Cout), jnp.float32),
        ),
        compiler_params=pltpu.CompilerParams(
            dimension_semantics=("parallel", "parallel"),
            vmem_limit_bytes=_VMEM_LIMIT),
    )(*args)

    return y_pre, jnp.sum(stats, axis=(0, 1))


# ----------------------------------------------------------------------------
# BatchNorm affine from global (sum, sumsq) statistics
# ----------------------------------------------------------------------------
def _bn_affine(stats, count, gamma, beta, eps=1e-5):
    mean = stats[0] / count
    var = jnp.maximum(stats[1] / count - mean * mean, 0.0)
    scale = gamma.astype(jnp.float32) * jax.lax.rsqrt(var + eps)
    shift = beta.astype(jnp.float32) - mean * scale
    return scale, shift


# ----------------------------------------------------------------------------
# Kernel 3: lane-dense BatchNorm apply + LeakyReLU (final stage only)
# ----------------------------------------------------------------------------
def bn_lrelu_apply(y_pre, scale, shift, slope=0.01):
    """y_pre: (N, Ho, Wo, C) bf16; scale/shift: (C,) f32.  Returns f32."""
    N, Ho, Wo, C = map(int, y_pre.shape)
    lane = Wo * C                                # fold W into the lane axis
    rows = N * Ho
    scale_row = jnp.tile(scale.astype(jnp.float32), Wo).reshape(1, lane)
    shift_row = jnp.tile(shift.astype(jnp.float32), Wo).reshape(1, lane)

    tm = _pick_tile(rows, max(8, _EW_BLOCK_BYTES // max(lane * 4, 1)),
                    mult=8, min_steps=2)
    x2d = y_pre.reshape(rows, lane)              # free, contiguous HBM view

    def kernel(x_ref, sc_ref, sh_ref, o_ref):
        y = x_ref[...].astype(jnp.float32) * sc_ref[...] + sh_ref[...]
        o_ref[...] = jnp.where(y > 0, y, slope * y)

    out = pl.pallas_call(
        kernel,
        grid=(rows // tm,),
        in_specs=[
            pl.BlockSpec((tm, lane), lambda i: (i, 0)),
            pl.BlockSpec((1, lane), lambda i: (0, 0)),   # resident
            pl.BlockSpec((1, lane), lambda i: (0, 0)),   # resident
        ],
        out_specs=pl.BlockSpec((tm, lane), lambda i: (i, 0)),
        out_shape=jax.ShapeDtypeStruct((rows, lane), jnp.float32),
        compiler_params=pltpu.CompilerParams(
            dimension_semantics=("parallel",),
            vmem_limit_bytes=_VMEM_LIMIT),
    )(x2d, scale_row, shift_row)
    return out.reshape(N, Ho, Wo, C)


# ----------------------------------------------------------------------------
# DecodeBlock forward
# ----------------------------------------------------------------------------
def decode_block_forward(params, x_decode_nchw, x_encode_nchw):
    # NCHW (PyTorch) -> NHWC (kernel layout); module inputs stay f32.
    x_dec = jnp.transpose(x_decode_nchw, (0, 2, 3, 1)).astype(jnp.float32)
    x_enc = jnp.transpose(x_encode_nchw, (0, 2, 3, 1)).astype(jnp.float32)

    # 1) ConvTranspose2d(in_ch, out_ch, kernel_size=2, stride=2) -> bf16
    x_up = conv_transpose_2x2_s2(x_dec, params["up_w"], params["up_b"])

    # 2) F.pad to the encoder spatial size (no-op for even U-Net shapes)
    dy = x_enc.shape[1] - x_up.shape[1]
    dx = x_enc.shape[2] - x_up.shape[2]
    x_up = jnp.pad(x_up, ((0, 0), (dy // 2, dy - dy // 2),
                          (dx // 2, dx - dx // 2), (0, 0)))

    cnt = int(x_enc.shape[0] * x_enc.shape[1] * x_enc.shape[2])

    # 3) conv1 over the fused concat([x_up, x_enc]); bias cancelled by BN1.
    y1_pre, s1 = conv3x3_stats([x_up, x_enc], params["c1_w"])
    scale1, shift1 = _bn_affine(s1, cnt, params["bn1_g"], params["bn1_b"])

    # 4) conv2 with BN1 + LeakyReLU fused into its input path.
    y2_pre, s2 = conv3x3_stats([y1_pre], params["c2_w"],
                               affines=[(scale1, shift1)])
    scale2, shift2 = _bn_affine(s2, cnt, params["bn2_g"], params["bn2_b"])

    # 5) final BN2 + LeakyReLU, lane-dense elementwise kernel.
    y2 = bn_lrelu_apply(y2_pre, scale2, shift2)

    # back to NCHW to match the PyTorch module's output convention
    return jnp.transpose(y2, (0, 3, 1, 2))


def init_params(key, in_channels, out_channels):
    ks = jax.random.split(key, 3)
    return {
        # ConvTranspose2d: PyTorch layout (Cin, Cout, 2, 2)
        "up_w": 0.1 * jax.random.normal(
            ks[0], (in_channels, out_channels, 2, 2), jnp.float32),
        "up_b": jnp.linspace(-0.1, 0.1, out_channels, dtype=jnp.float32),
        # ConvBlock conv1: PyTorch layout (Cout, Cin, 3, 3)
        "c1_w": 0.1 * jax.random.normal(
            ks[1], (out_channels, in_channels, 3, 3), jnp.float32),
        "c1_b": jnp.linspace(-0.05, 0.05, out_channels, dtype=jnp.float32),
        "bn1_g": jnp.ones((out_channels,), jnp.float32),
        "bn1_b": jnp.zeros((out_channels,), jnp.float32),
        "c2_w": 0.1 * jax.random.normal(
            ks[2], (out_channels, out_channels, 3, 3), jnp.float32),
        "c2_b": jnp.linspace(-0.05, 0.05, out_channels, dtype=jnp.float32),
        "bn2_g": jnp.ones((out_channels,), jnp.float32),
        "bn2_b": jnp.zeros((out_channels,), jnp.float32),
    }


# ----------------------------------------------------------------------------
# Pure-XLA reference (no Pallas) mirroring the PyTorch module
# ----------------------------------------------------------------------------
def _reference_forward(params, x_decode_nchw, x_encode_nchw):
    xd = jnp.transpose(x_decode_nchw, (0, 2, 3, 1)).astype(jnp.float32)
    xe = jnp.transpose(x_encode_nchw, (0, 2, 3, 1)).astype(jnp.float32)
    N, H, W, _ = xd.shape
    Cout = params["up_w"].shape[1]

    t = jnp.einsum("nhwc,cokl->nhwklo", xd, params["up_w"]) + params["up_b"]
    y_up = t.transpose(0, 1, 3, 2, 4, 5).reshape(N, 2 * H, 2 * W, Cout)

    dy = xe.shape[1] - y_up.shape[1]
    dx = xe.shape[2] - y_up.shape[2]
    y_up = jnp.pad(y_up, ((0, 0), (dy // 2, dy - dy // 2),
                          (dx // 2, dx - dx // 2), (0, 0)))
    x = jnp.concatenate([y_up, xe], axis=-1)

    def conv_bn_lrelu(x, w_pt, b, g, bt):
        w = jnp.transpose(w_pt, (2, 3, 1, 0))   # OIHW -> HWIO
        y = jax.lax.conv_general_dilated(
            x, w, window_strides=(1, 1), padding=((1, 1), (1, 1)),
            dimension_numbers=("NHWC", "HWIO", "NHWC")) + b
        mean = y.mean(axis=(0, 1, 2))
        var = y.var(axis=(0, 1, 2))
        y = (y - mean) * jax.lax.rsqrt(var + 1e-5) * g + bt
        return jnp.where(y > 0, y, 0.01 * y)

    y = conv_bn_lrelu(x, params["c1_w"], params["c1_b"],
                      params["bn1_g"], params["bn1_b"])
    y = conv_bn_lrelu(y, params["c2_w"], params["c2_b"],
                      params["bn2_g"], params["bn2_b"])
    return jnp.transpose(y, (0, 3, 1, 2))


if __name__ == "__main__":
    key = jax.random.PRNGKey(0)
    k_dec, k_enc, k_param = jax.random.split(key, 3)

    in_channels, out_channels = 8, 4
    N, H, W = 2, 8, 8                      # decoder map; encoder is 2H x 2W

    x_decode = jax.random.normal(k_dec, (N, in_channels, H, W), jnp.float32)
    x_encode = jax.random.normal(k_enc, (N, out_channels, 2 * H, 2 * W),
                                 jnp.float32)
    params = init_params(k_param, in_channels, out_channels)

    out = jax.jit(decode_block_forward)(params, x_decode, x_encode)
    out = jax.block_until_ready(out)

    assert out.shape == (N, out_channels, 2 * H, 2 * W), out.shape
    assert bool(jnp.isfinite(out).all())

    # correctness vs pure-XLA reference (loose tolerance: bf16 MXU feeds and
    # bf16 HBM intermediates; BN renormalization bounds the drift)
    ref = _reference_forward(params, x_decode, x_encode)
    max_err = float(jnp.max(jnp.abs(out - ref)))
    assert max_err < 1e-1, f"max |err| vs reference = {max_err}"

    print("KERNEL_OK")
</pallas_src>

<mosaic_0001>
module attributes {stable_mosaic.version = 11 : i64} {
  func.func @kernel(%arg0: i32, %arg1: memref<8x8x8xf32, #tpu.memory_space<vmem>>, %arg2: memref<2x8x8xbf16, #tpu.memory_space<vmem>>, %arg3: memref<1x8xf32, #tpu.memory_space<vmem>>, %arg4: memref<8x2x8x8xbf16, #tpu.memory_space<vmem>>) attributes {dimension_semantics = [#tpu.dimension_semantics<parallel>], iteration_bounds = array<i64: 2>, scalar_prefetch = 0 : i64, scratch_operands = 0 : i64, tpu.core_type = #tpu.core_type<tc>, window_params = [{transform_indices = @transform_0, window_bounds = array<i64: 8, 8, 8>}, {pipeline_mode = #tpu.pipeline_mode<synchronous>, transform_indices = @transform_1, window_bounds = array<i64: 2, 8, 8>}, {pipeline_mode = #tpu.pipeline_mode<synchronous>, transform_indices = @transform_2, window_bounds = array<i64: 1, 8>}, {transform_indices = @transform_3, window_bounds = array<i64: 8, 2, 8, 8>}]} {
    %c0 = arith.constant 0 : index
    %c0_0 = arith.constant 0 : index
    %c0_1 = arith.constant 0 : index
    %0 = vector.load %arg1[%c0, %c0_0, %c0_1] : memref<8x8x8xf32, #tpu.memory_space<vmem>>, vector<8x8x8xf32>
    %1 = vector.shape_cast %0 : vector<8x8x8xf32> to vector<64x8xf32>
    %2 = arith.truncf %1 : vector<64x8xf32> to vector<64x8xbf16>
    %c0_2 = arith.constant 0 : index
    %c0_3 = arith.constant 0 : index
    %3 = vector.load %arg3[%c0_2, %c0_3] : memref<1x8xf32, #tpu.memory_space<vmem>>, vector<1x8xf32>
    %c0_4 = arith.constant 0 : index
    %c0_5 = arith.constant 0 : index
    %c0_6 = arith.constant 0 : index
    %4 = vector.load %arg2[%c0_4, %c0_5, %c0_6] : memref<2x8x8xbf16, #tpu.memory_space<vmem>>, vector<1x8x8xbf16>
    %5 = vector.shape_cast %4 : vector<1x8x8xbf16> to vector<8x8xbf16>
    %cst = arith.constant dense<0.000000e+00> : vector<64x8xf32>
    %6 = tpu.matmul %2, %5, %cst {dimension_numbers = #tpu.dot_dimension_numbers<[1], [0], [0], [1], [0, 0, 1, 1], [], []>} : vector<64x8xbf16>, vector<8x8xbf16>, vector<64x8xf32> -> vector<64x8xf32>
    %7 = vector.broadcast %3 : vector<1x8xf32> to vector<64x8xf32>
    %8 = arith.addf %6, %7 : vector<64x8xf32>
    %9 = vector.shape_cast %8 : vector<64x8xf32> to vector<8x8x8xf32>
    %10 = arith.truncf %9 : vector<8x8x8xf32> to vector<8x8x8xbf16>
    %c0_7 = arith.constant 0 : index
    %c0_8 = arith.constant 0 : index
    %c0_9 = arith.constant 0 : index
    %c0_10 = arith.constant 0 : index
    %11 = vector.load %arg4[%c0_7, %c0_8, %c0_9, %c0_10] : memref<8x2x8x8xbf16, #tpu.memory_space<vmem>>, vector<8x1x8x8xbf16>
    %12 = vector.shape_cast %11 : vector<8x1x8x8xbf16> to vector<8x8x8xbf16>
    %13 = vector.shape_cast %10 : vector<8x8x8xbf16> to vector<8x1x8x8xbf16>
    tpu.vector_store %arg4[%c0_7, %c0_8, %c0_9, %c0_10], %13 {strides = array<i32>} : memref<8x2x8x8xbf16, #tpu.memory_space<vmem>>, vector<8x1x8x8xbf16>,
    %c1 = arith.constant 1 : index
    %c0_11 = arith.constant 0 : index
    %c0_12 = arith.constant 0 : index
    %14 = vector.load %arg2[%c1, %c0_11, %c0_12] : memref<2x8x8xbf16, #tpu.memory_space<vmem>>, vector<1x8x8xbf16>
    %15 = vector.shape_cast %14 : vector<1x8x8xbf16> to vector<8x8xbf16>
    %cst_13 = arith.constant dense<0.000000e+00> : vector<64x8xf32>
    %16 = tpu.matmul %2, %15, %cst_13 {dimension_numbers = #tpu.dot_dimension_numbers<[1], [0], [0], [1], [0, 0, 1, 1], [], []>} : vector<64x8xbf16>, vector<8x8xbf16>, vector<64x8xf32> -> vector<64x8xf32>
    %17 = vector.broadcast %3 : vector<1x8xf32> to vector<64x8xf32>
    %18 = arith.addf %16, %17 : vector<64x8xf32>
    %19 = vector.shape_cast %18 : vector<64x8xf32> to vector<8x8x8xf32>
    %20 = arith.truncf %19 : vector<8x8x8xf32> to vector<8x8x8xbf16>
    %c0_14 = arith.constant 0 : index
    %c1_15 = arith.constant 1 : index
    %c0_16 = arith.constant 0 : index
    %c0_17 = arith.constant 0 : index
    %21 = vector.load %arg4[%c0_14, %c1_15, %c0_16, %c0_17] : memref<8x2x8x8xbf16, #tpu.memory_space<vmem>>, vector<8x1x8x8xbf16>
    %22 = vector.shape_cast %21 : vector<8x1x8x8xbf16> to vector<8x8x8xbf16>
    %23 = vector.shape_cast %20 : vector<8x8x8xbf16> to vector<8x1x8x8xbf16>
    tpu.vector_store %arg4[%c0_14, %c1_15, %c0_16, %c0_17], %23 {strides = array<i32>} : memref<8x2x8x8xbf16, #tpu.memory_space<vmem>>, vector<8x1x8x8xbf16>,
    return
  }
  func.func @transform_0(%arg0: i32) -> (i32, i32, i32) {
    %c0_i32 = arith.constant 0 : i32
    %c0_i32_0 = arith.constant 0 : i32
    %c0_i32_1 = arith.constant 0 : i32
    return %arg0, %c0_i32, %c0_i32_0 : i32, i32, i32
  }
  func.func @transform_1(%arg0: i32) -> (i32, i32, i32) {
    %c0_i32 = arith.constant 0 : i32
    %c0_i32_0 = arith.constant 0 : i32
    %c0_i32_1 = arith.constant 0 : i32
    %c0_i32_2 = arith.constant 0 : i32
    return %c0_i32, %c0_i32_0, %c0_i32_1 : i32, i32, i32
  }
  func.func @transform_2(%arg0: i32) -> (i32, i32) {
    %c0_i32 = arith.constant 0 : i32
    %c0_i32_0 = arith.constant 0 : i32
    %c0_i32_1 = arith.constant 0 : i32
    return %c0_i32, %c0_i32_0 : i32, i32
  }
  func.func @transform_3(%arg0: i32) -> (i32, i32, i32, i32) {
    %c0_i32 = arith.constant 0 : i32
    %c0_i32_0 = arith.constant 0 : i32
    %c0_i32_1 = arith.constant 0 : i32
    %c0_i32_2 = arith.constant 0 : i32
    return %arg0, %c0_i32, %c0_i32_0, %c0_i32_1 : i32, i32, i32, i32
  }
}

module attributes {stable_mosaic.version = 11 : i64} {
  func.func @kernel(%arg0: i32, %arg1: i32, %arg2: memref<1x16x18x4xbf16, #tpu.memory_space<vmem>>, %arg3: memref<1x2x18x4xbf16, #tpu.memory_space<vmem>>, %arg4: memref<1x16x18x4xf32, #tpu.memory_space<vmem>>, %arg5: memref<1x2x18x4xf32, #tpu.memory_space<vmem>>, %arg6: memref<3x24x4xbf16, #tpu.memory_space<vmem>>, %arg7: memref<1x16x16x4xbf16, #tpu.memory_space<vmem>>, %arg8: memref<1x1x2x4xf32, #tpu.memory_space<vmem>>) attributes {dimension_semantics = [#tpu.dimension_semantics<parallel>, #tpu.dimension_semantics<parallel>], iteration_bounds = array<i64: 2, 1>, scalar_prefetch = 0 : i64, scratch_operands = 0 : i64, tpu.core_type = #tpu.core_type<tc>, window_params = [{transform_indices = @transform_0, window_bounds = array<i64: 1, 16, 18, 4>}, {transform_indices = @transform_1, window_bounds = array<i64: 1, 2, 18, 4>}, {transform_indices = @transform_2, window_bounds = array<i64: 1, 16, 18, 4>}, {transform_indices = @transform_3, window_bounds = array<i64: 1, 2, 18, 4>}, {pipeline_mode = #tpu.pipeline_mode<synchronous>, transform_indices = @transform_4, window_bounds = array<i64: 3, 24, 4>}, {transform_indices = @transform_5, window_bounds = array<i64: 1, 16, 16, 4>}, {transform_indices = @transform_6, window_bounds = array<i64: 1, 1, 2, 4>}]} {
    %c0 = arith.constant 0 : index
    %c0_0 = arith.constant 0 : index
    %c0_1 = arith.constant 0 : index
    %c0_2 = arith.constant 0 : index
    %0 = vector.load %arg2[%c0, %c0_0, %c0_1, %c0_2] : memref<1x16x18x4xbf16, #tpu.memory_space<vmem>>, vector<1x16x18x4xbf16>
    %1 = vector.shape_cast %0 : vector<1x16x18x4xbf16> to vector<16x18x4xbf16>
    %2 = arith.extf %1 : vector<16x18x4xbf16> to vector<16x18x4xf32>
    %c0_3 = arith.constant 0 : index
    %c0_4 = arith.constant 0 : index
    %c0_5 = arith.constant 0 : index
    %c0_6 = arith.constant 0 : index
    %3 = vector.load %arg3[%c0_3, %c0_4, %c0_5, %c0_6] : memref<1x2x18x4xbf16, #tpu.memory_space<vmem>>, vector<1x2x18x4xbf16>
    %4 = vector.shape_cast %3 : vector<1x2x18x4xbf16> to vector<2x18x4xbf16>
    %5 = arith.extf %4 : vector<2x18x4xbf16> to vector<2x18x4xf32>
    %6 = tpu.concatenate %2, %5 in 0 : vector<16x18x4xf32>, vector<2x18x4xf32> -> vector<18x18x4xf32>
    %c0_7 = arith.constant 0 : index
    %c0_8 = arith.constant 0 : index
    %c0_9 = arith.constant 0 : index
    %c0_10 = arith.constant 0 : index
    %7 = vector.load %arg4[%c0_7, %c0_8, %c0_9, %c0_10] : memref<1x16x18x4xf32, #tpu.memory_space<vmem>>, vector<1x16x18x4xf32>
    %8 = vector.shape_cast %7 : vector<1x16x18x4xf32> to vector<16x18x4xf32>
    %c0_11 = arith.constant 0 : index
    %c0_12 = arith.constant 0 : index
    %c0_13 = arith.constant 0 : index
    %c0_14 = arith.constant 0 : index
    %9 = vector.load %arg5[%c0_11, %c0_12, %c0_13, %c0_14] : memref<1x2x18x4xf32, #tpu.memory_space<vmem>>, vector<1x2x18x4xf32>
    %10 = vector.shape_cast %9 : vector<1x2x18x4xf32> to vector<2x18x4xf32>
    %11 = tpu.concatenate %8, %10 in 0 : vector<16x18x4xf32>, vector<2x18x4xf32> -> vector<18x18x4xf32>
    %12 = vector.extract_strided_slice %6 {offsets = [0, 0, 0], sizes = [16, 16, 4], strides = [1, 1, 1]} : vector<18x18x4xf32> to vector<16x16x4xf32>
    %13 = vector.shape_cast %12 : vector<16x16x4xf32> to vector<256x4xf32>
    %14 = vector.extract_strided_slice %6 {offsets = [0, 1, 0], sizes = [16, 16, 4], strides = [1, 1, 1]} : vector<18x18x4xf32> to vector<16x16x4xf32>
    %15 = vector.shape_cast %14 : vector<16x16x4xf32> to vector<256x4xf32>
    %16 = vector.extract_strided_slice %6 {offsets = [0, 2, 0], sizes = [16, 16, 4], strides = [1, 1, 1]} : vector<18x18x4xf32> to vector<16x16x4xf32>
    %17 = vector.shape_cast %16 : vector<16x16x4xf32> to vector<256x4xf32>
    %18 = vector.extract_strided_slice %11 {offsets = [0, 0, 0], sizes = [16, 16, 4], strides = [1, 1, 1]} : vector<18x18x4xf32> to vector<16x16x4xf32>
    %19 = vector.shape_cast %18 : vector<16x16x4xf32> to vector<256x4xf32>
    %20 = vector.extract_strided_slice %11 {offsets = [0, 1, 0], sizes = [16, 16, 4], strides = [1, 1, 1]} : vector<18x18x4xf32> to vector<16x16x4xf32>
    %21 = vector.shape_cast %20 : vector<16x16x4xf32> to vector<256x4xf32>
    %22 = vector.extract_strided_slice %11 {offsets = [0, 2, 0], sizes = [16, 16, 4], strides = [1, 1, 1]} : vector<18x18x4xf32> to vector<16x16x4xf32>
    %23 = vector.shape_cast %22 : vector<16x16x4xf32> to vector<256x4xf32>
    %24 = tpu.concatenate %13, %15, %17, %19, %21, %23 in 1 : vector<256x4xf32>, vector<256x4xf32>, vector<256x4xf32>, vector<256x4xf32>, vector<256x4xf32>, vector<256x4xf32> -> vector<256x24xf32>
    %25 = arith.truncf %24 : vector<256x24xf32> to vector<256x24xbf16>
    %c0_15 = arith.constant 0 : index
    %c0_16 = arith.constant 0 : index
    %c0_17 = arith.constant 0 : index
    %26 = vector.load %arg6[%c0_15, %c0_16, %c0_17] : memref<3x24x4xbf16, #tpu.memory_space<vmem>>, vector<1x24x4xbf16>
    %27 = vector.shape_cast %26 : vector<1x24x4xbf16> to vector<24x4xbf16>
    %cst = arith.constant dense<0.000000e+00> : vector<256x4xf32>
    %28 = tpu.matmul %25, %27, %cst {dimension_numbers = #tpu.dot_dimension_numbers<[1], [0], [0], [1], [0, 0, 1, 1], [], []>} : vector<256x24xbf16>, vector<24x4xbf16>, vector<256x4xf32> -> vector<256x4xf32>
    %29 = vector.extract_strided_slice %6 {offsets = [1, 0, 0], sizes = [16, 16, 4], strides = [1, 1, 1]} : vector<18x18x4xf32> to vector<16x16x4xf32>
    %30 = vector.shape_cast %29 : vector<16x16x4xf32> to vector<256x4xf32>
    %31 = vector.extract_strided_slice %6 {offsets = [1, 1, 0], sizes = [16, 16, 4], strides = [1, 1, 1]} : vector<18x18x4xf32> to vector<16x16x4xf32>
    %32 = vector.shape_cast %31 : vector<16x16x4xf32> to vector<256x4xf32>
    %33 = vector.extract_strided_slice %6 {offsets = [1, 2, 0], sizes = [16, 16, 4], strides = [1, 1, 1]} : vector<18x18x4xf32> to vector<16x16x4xf32>
    %34 = vector.shape_cast %33 : vector<16x16x4xf32> to vector<256x4xf32>
    %35 = vector.extract_strided_slice %11 {offsets = [1, 0, 0], sizes = [16, 16, 4], strides = [1, 1, 1]} : vector<18x18x4xf32> to vector<16x16x4xf32>
    %36 = vector.shape_cast %35 : vector<16x16x4xf32> to vector<256x4xf32>
    %37 = vector.extract_strided_slice %11 {offsets = [1, 1, 0], sizes = [16, 16, 4], strides = [1, 1, 1]} : vector<18x18x4xf32> to vector<16x16x4xf32>
    %38 = vector.shape_cast %37 : vector<16x16x4xf32> to vector<256x4xf32>
    %39 = vector.extract_strided_slice %11 {offsets = [1, 2, 0], sizes = [16, 16, 4], strides = [1, 1, 1]} : vector<18x18x4xf32> to vector<16x16x4xf32>
    %40 = vector.shape_cast %39 : vector<16x16x4xf32> to vector<256x4xf32>
    %41 = tpu.concatenate %30, %32, %34, %36, %38, %40 in 1 : vector<256x4xf32>, vector<256x4xf32>, vector<256x4xf32>, vector<256x4xf32>, vector<256x4xf32>, vector<256x4xf32> -> vector<256x24xf32>
    %42 = arith.truncf %41 : vector<256x24xf32> to vector<256x24xbf16>
    %c1 = arith.constant 1 : index
    %c0_18 = arith.constant 0 : index
    %c0_19 = arith.constant 0 : index
    %43 = vector.load %arg6[%c1, %c0_18, %c0_19] : memref<3x24x4xbf16, #tpu.memory_space<vmem>>, vector<1x24x4xbf16>
    %44 = vector.shape_cast %43 : vector<1x24x4xbf16> to vector<24x4xbf16>
    %cst_20 = arith.constant dense<0.000000e+00> : vector<256x4xf32>
    %45 = tpu.matmul %42, %44, %cst_20 {dimension_numbers = #tpu.dot_dimension_numbers<[1], [0], [0], [1], [0, 0, 1, 1], [], []>} : vector<256x24xbf16>, vector<24x4xbf16>, vector<256x4xf32> -> vector<256x4xf32>
    %46 = arith.addf %28, %45 : vector<256x4xf32>
    %47 = vector.extract_strided_slice %6 {offsets = [2, 0, 0], sizes = [16, 16, 4], strides = [1, 1, 1]} : vector<18x18x4xf32> to vector<16x16x4xf32>
    %48 = vector.shape_cast %47 : vector<16x16x4xf32> to vector<256x4xf32>
    %49 = vector.extract_strided_slice %6 {offsets = [2, 1, 0], sizes = [16, 16, 4], strides = [1, 1, 1]} : vector<18x18x4xf32> to vector<16x16x4xf32>
    %50 = vector.shape_cast %49 : vector<16x16x4xf32> to vector<256x4xf32>
    %51 = vector.extract_strided_slice %6 {offsets = [2, 2, 0], sizes = [16, 16, 4], strides = [1, 1, 1]} : vector<18x18x4xf32> to vector<16x16x4xf32>
    %52 = vector.shape_cast %51 : vector<16x16x4xf32> to vector<256x4xf32>
    %53 = vector.extract_strided_slice %11 {offsets = [2, 0, 0], sizes = [16, 16, 4], strides = [1, 1, 1]} : vector<18x18x4xf32> to vector<16x16x4xf32>
    %54 = vector.shape_cast %53 : vector<16x16x4xf32> to vector<256x4xf32>
    %55 = vector.extract_strided_slice %11 {offsets = [2, 1, 0], sizes = [16, 16, 4], strides = [1, 1, 1]} : vector<18x18x4xf32> to vector<16x16x4xf32>
    %56 = vector.shape_cast %55 : vector<16x16x4xf32> to vector<256x4xf32>
    %57 = vector.extract_strided_slice %11 {offsets = [2, 2, 0], sizes = [16, 16, 4], strides = [1, 1, 1]} : vector<18x18x4xf32> to vector<16x16x4xf32>
    %58 = vector.shape_cast %57 : vector<16x16x4xf32> to vector<256x4xf32>
    %59 = tpu.concatenate %48, %50, %52, %54, %56, %58 in 1 : vector<256x4xf32>, vector<256x4xf32>, vector<256x4xf32>, vector<256x4xf32>, vector<256x4xf32>, vector<256x4xf32> -> vector<256x24xf32>
    %60 = arith.truncf %59 : vector<256x24xf32> to vector<256x24xbf16>
    %c2 = arith.constant 2 : index
    %c0_21 = arith.constant 0 : index
    %c0_22 = arith.constant 0 : index
    %61 = vector.load %arg6[%c2, %c0_21, %c0_22] : memref<3x24x4xbf16, #tpu.memory_space<vmem>>, vector<1x24x4xbf16>
    %62 = vector.shape_cast %61 : vector<1x24x4xbf16> to vector<24x4xbf16>
    %cst_23 = arith.constant dense<0.000000e+00> : vector<256x4xf32>
    %63 = tpu.matmul %60, %62, %cst_23 {dimension_numbers = #tpu.dot_dimension_numbers<[1], [0], [0], [1], [0, 0, 1, 1], [], []>} : vector<256x24xbf16>, vector<24x4xbf16>, vector<256x4xf32> -> vector<256x4xf32>
    %64 = arith.addf %46, %63 : vector<256x4xf32>
    %cst_24 = arith.constant dense<0.000000e+00> : vector<4xf32>
    %65 = vector.multi_reduction <add>, %64, %cst_24 [0] : vector<256x4xf32> to vector<4xf32>
    %66 = vector.shape_cast %65 : vector<4xf32> to vector<1x4xf32>
    %67 = arith.mulf %64, %64 : vector<256x4xf32>
    %cst_25 = arith.constant dense<0.000000e+00> : vector<4xf32>
    %68 = vector.multi_reduction <add>, %67, %cst_25 [0] : vector<256x4xf32> to vector<4xf32>
    %69 = vector.shape_cast %68 : vector<4xf32> to vector<1x4xf32>
    %70 = tpu.concatenate %66, %69 in 0 : vector<1x4xf32>, vector<1x4xf32> -> vector<2x4xf32>
    %c0_26 = arith.constant 0 : index
    %c0_27 = arith.constant 0 : index
    %c0_28 = arith.constant 0 : index
    %c0_29 = arith.constant 0 : index
    %71 = vector.load %arg8[%c0_26, %c0_27, %c0_28, %c0_29] : memref<1x1x2x4xf32, #tpu.memory_space<vmem>>, vector<1x1x2x4xf32>
    %72 = vector.shape_cast %71 : vector<1x1x2x4xf32> to vector<2x4xf32>
    %73 = vector.shape_cast %70 : vector<2x4xf32> to vector<1x1x2x4xf32>
    tpu.vector_store %arg8[%c0_26, %c0_27, %c0_28, %c0_29], %73 {strides = array<i32>} : memref<1x1x2x4xf32, #tpu.memory_space<vmem>>, vector<1x1x2x4xf32>,
    %74 = vector.shape_cast %64 : vector<256x4xf32> to vector<16x16x4xf32>
    %75 = arith.truncf %74 : vector<16x16x4xf32> to vector<16x16x4xbf16>
    %c0_30 = arith.constant 0 : index
    %c0_31 = arith.constant 0 : index
    %c0_32 = arith.constant 0 : index
    %c0_33 = arith.constant 0 : index
    %76 = vector.load %arg7[%c0_30, %c0_31, %c0_32, %c0_33] : memref<1x16x16x4xbf16, #tpu.memory_space<vmem>>, vector<1x16x16x4xbf16>
    %77 = vector.shape_cast %76 : vector<1x16x16x4xbf16> to vector<16x16x4xbf16>
    %78 = vector.shape_cast %75 : vector<16x16x4xbf16> to vector<1x16x16x4xbf16>
    tpu.vector_store %arg7[%c0_30, %c0_31, %c0_32, %c0_33], %78 {strides = array<i32>} : memref<1x16x16x4xbf16, #tpu.memory_space<vmem>>, vector<1x16x16x4xbf16>,
    return
  }
  func.func @transform_0(%arg0: i32, %arg1: i32) -> (i32, i32, i32, i32) {
    %c0_i32 = arith.constant 0 : i32
    %c0_i32_0 = arith.constant 0 : i32
    %c0_i32_1 = arith.constant 0 : i32
    return %arg0, %arg1, %c0_i32, %c0_i32_0 : i32, i32, i32, i32
  }
  func.func @transform_1(%arg0: i32, %arg1: i32) -> (i32, i32, i32, i32) {
    %c1_i32 = arith.constant 1 : i32
    %0 = arith.addi %arg1, %c1_i32 : i32
    %c8_i32 = arith.constant 8 : i32
    %1 = arith.muli %0, %c8_i32 : i32
    %c0_i32 = arith.constant 0 : i32
    %c0_i32_0 = arith.constant 0 : i32
    %c0_i32_1 = arith.constant 0 : i32
    return %arg0, %1, %c0_i32, %c0_i32_0 : i32, i32, i32, i32
  }
  func.func @transform_2(%arg0: i32, %arg1: i32) -> (i32, i32, i32, i32) {
    %c0_i32 = arith.constant 0 : i32
    %c0_i32_0 = arith.constant 0 : i32
    %c0_i32_1 = arith.constant 0 : i32
    return %arg0, %arg1, %c0_i32, %c0_i32_0 : i32, i32, i32, i32
  }
  func.func @transform_3(%arg0: i32, %arg1: i32) -> (i32, i32, i32, i32) {
    %c1_i32 = arith.constant 1 : i32
    %0 = arith.addi %arg1, %c1_i32 : i32
    %c8_i32 = arith.constant 8 : i32
    %1 = arith.muli %0, %c8_i32 : i32
    %c0_i32 = arith.constant 0 : i32
    %c0_i32_0 = arith.constant 0 : i32
    %c0_i32_1 = arith.constant 0 : i32
    return %arg0, %1, %c0_i32, %c0_i32_0 : i32, i32, i32, i32
  }
  func.func @transform_4(%arg0: i32, %arg1: i32) -> (i32, i32, i32) {
    %c0_i32 = arith.constant 0 : i32
    %c0_i32_0 = arith.constant 0 : i32
    %c0_i32_1 = arith.constant 0 : i32
    %c0_i32_2 = arith.constant 0 : i32
    return %c0_i32, %c0_i32_0, %c0_i32_1 : i32, i32, i32
  }
  func.func @transform_5(%arg0: i32, %arg1: i32) -> (i32, i32, i32, i32) {
    %c0_i32 = arith.constant 0 : i32
    %c0_i32_0 = arith.constant 0 : i32
    %c0_i32_1 = arith.constant 0 : i32
    return %arg0, %arg1, %c0_i32, %c0_i32_0 : i32, i32, i32, i32
  }
  func.func @transform_6(%arg0: i32, %arg1: i32) -> (i32, i32, i32, i32) {
    %c0_i32 = arith.constant 0 : i32
    %c0_i32_0 = arith.constant 0 : i32
    %c0_i32_1 = arith.constant 0 : i32
    return %arg0, %arg1, %c0_i32, %c0_i32_0 : i32, i32, i32, i32
  }
}

module attributes {stable_mosaic.version = 11 : i64} {
  func.func @kernel(%arg0: i32, %arg1: i32, %arg2: memref<1x16x18x4xbf16, #tpu.memory_space<vmem>>, %arg3: memref<1x2x18x4xbf16, #tpu.memory_space<vmem>>, %arg4: memref<1x4xf32, #tpu.memory_space<vmem>>, %arg5: memref<1x4xf32, #tpu.memory_space<vmem>>, %arg6: memref<3x12x4xbf16, #tpu.memory_space<vmem>>, %arg7: memref<1x16x16x4xbf16, #tpu.memory_space<vmem>>, %arg8: memref<1x1x2x4xf32, #tpu.memory_space<vmem>>) attributes {dimension_semantics = [#tpu.dimension_semantics<parallel>, #tpu.dimension_semantics<parallel>], iteration_bounds = array<i64: 2, 1>, scalar_prefetch = 0 : i64, scratch_operands = 0 : i64, tpu.core_type = #tpu.core_type<tc>, window_params = [{transform_indices = @transform_0, window_bounds = array<i64: 1, 16, 18, 4>}, {transform_indices = @transform_1, window_bounds = array<i64: 1, 2, 18, 4>}, {pipeline_mode = #tpu.pipeline_mode<synchronous>, transform_indices = @transform_2, window_bounds = array<i64: 1, 4>}, {pipeline_mode = #tpu.pipeline_mode<synchronous>, transform_indices = @transform_3, window_bounds = array<i64: 1, 4>}, {pipeline_mode = #tpu.pipeline_mode<synchronous>, transform_indices = @transform_4, window_bounds = array<i64: 3, 12, 4>}, {transform_indices = @transform_5, window_bounds = array<i64: 1, 16, 16, 4>}, {transform_indices = @transform_6, window_bounds = array<i64: 1, 1, 2, 4>}]} {
    %c0 = arith.constant 0 : index
    %c0_0 = arith.constant 0 : index
    %c0_1 = arith.constant 0 : index
    %c0_2 = arith.constant 0 : index
    %0 = vector.load %arg2[%c0, %c0_0, %c0_1, %c0_2] : memref<1x16x18x4xbf16, #tpu.memory_space<vmem>>, vector<1x16x18x4xbf16>
    %1 = vector.shape_cast %0 : vector<1x16x18x4xbf16> to vector<16x18x4xbf16>
    %2 = arith.extf %1 : vector<16x18x4xbf16> to vector<16x18x4xf32>
    %c0_3 = arith.constant 0 : index
    %c0_4 = arith.constant 0 : index
    %c0_5 = arith.constant 0 : index
    %c0_6 = arith.constant 0 : index
    %3 = vector.load %arg3[%c0_3, %c0_4, %c0_5, %c0_6] : memref<1x2x18x4xbf16, #tpu.memory_space<vmem>>, vector<1x2x18x4xbf16>
    %4 = vector.shape_cast %3 : vector<1x2x18x4xbf16> to vector<2x18x4xbf16>
    %5 = arith.extf %4 : vector<2x18x4xbf16> to vector<2x18x4xf32>
    %6 = tpu.concatenate %2, %5 in 0 : vector<16x18x4xf32>, vector<2x18x4xf32> -> vector<18x18x4xf32>
    %c0_7 = arith.constant 0 : index
    %c0_8 = arith.constant 0 : index
    %7 = vector.load %arg4[%c0_7, %c0_8] : memref<1x4xf32, #tpu.memory_space<vmem>>, vector<1x4xf32>
    %8 = vector.shape_cast %7 : vector<1x4xf32> to vector<1x1x4xf32>
    %9 = vector.broadcast %8 : vector<1x1x4xf32> to vector<18x18x4xf32>
    %10 = arith.mulf %6, %9 : vector<18x18x4xf32>
    %c0_9 = arith.constant 0 : index
    %c0_10 = arith.constant 0 : index
    %11 = vector.load %arg5[%c0_9, %c0_10] : memref<1x4xf32, #tpu.memory_space<vmem>>, vector<1x4xf32>
    %12 = vector.shape_cast %11 : vector<1x4xf32> to vector<1x1x4xf32>
    %13 = vector.broadcast %12 : vector<1x1x4xf32> to vector<18x18x4xf32>
    %14 = arith.addf %10, %13 : vector<18x18x4xf32>
    %cst = arith.constant 0.000000e+00 : f32
    %15 = vector.broadcast %cst : f32 to vector<18x18x4xf32>
    %16 = arith.cmpf ogt, %14, %15 : vector<18x18x4xf32>
    %cst_11 = arith.constant 0.00999999977 : f32
    %17 = vector.broadcast %cst_11 : f32 to vector<18x18x4xf32>
    %18 = arith.mulf %17, %14 : vector<18x18x4xf32>
    %19 = arith.select %16, %14, %18 : vector<18x18x4xi1>, vector<18x18x4xf32>
    %20 = tpu.iota {dimensions = array<i32: 0>} : vector<18x18x4xi32>
    %c16_i32 = arith.constant 16 : i32
    %21 = arith.muli %arg1, %c16_i32 : i32
    %22 = vector.broadcast %21 : i32 to vector<18x18x4xi32>
    %23 = arith.addi %20, %22 : vector<18x18x4xi32>
    %24 = tpu.iota {dimensions = array<i32: 1>} : vector<18x18x4xi32>
    %c0_i32 = arith.constant 0 : i32
    %25 = vector.broadcast %c0_i32 : i32 to vector<18x18x4xi32>
    %26 = arith.cmpi ne, %23, %25 : vector<18x18x4xi32>
    %c17_i32 = arith.constant 17 : i32
    %27 = vector.broadcast %c17_i32 : i32 to vector<18x18x4xi32>
    %28 = arith.cmpi ne, %23, %27 : vector<18x18x4xi32>
    %29 = arith.andi %26, %28 : vector<18x18x4xi1>
    %c0_i32_12 = arith.constant 0 : i32
    %30 = vector.broadcast %c0_i32_12 : i32 to vector<18x18x4xi32>
    %31 = arith.cmpi ne, %24, %30 : vector<18x18x4xi32>
    %32 = arith.andi %29, %31 : vector<18x18x4xi1>
    %c17_i32_13 = arith.constant 17 : i32
    %33 = vector.broadcast %c17_i32_13 : i32 to vector<18x18x4xi32>
    %34 = arith.cmpi ne, %24, %33 : vector<18x18x4xi32>
    %35 = arith.andi %32, %34 : vector<18x18x4xi1>
    %cst_14 = arith.constant 0.000000e+00 : f32
    %36 = vector.broadcast %cst_14 : f32 to vector<18x18x4xf32>
    %37 = arith.select %35, %19, %36 : vector<18x18x4xi1>, vector<18x18x4xf32>
    %38 = vector.extract_strided_slice %37 {offsets = [0, 0, 0], sizes = [16, 16, 4], strides = [1, 1, 1]} : vector<18x18x4xf32> to vector<16x16x4xf32>
    %39 = vector.shape_cast %38 : vector<16x16x4xf32> to vector<256x4xf32>
    %40 = vector.extract_strided_slice %37 {offsets = [0, 1, 0], sizes = [16, 16, 4], strides = [1, 1, 1]} : vector<18x18x4xf32> to vector<16x16x4xf32>
    %41 = vector.shape_cast %40 : vector<16x16x4xf32> to vector<256x4xf32>
    %42 = vector.extract_strided_slice %37 {offsets = [0, 2, 0], sizes = [16, 16, 4], strides = [1, 1, 1]} : vector<18x18x4xf32> to vector<16x16x4xf32>
    %43 = vector.shape_cast %42 : vector<16x16x4xf32> to vector<256x4xf32>
    %44 = tpu.concatenate %39, %41, %43 in 1 : vector<256x4xf32>, vector<256x4xf32>, vector<256x4xf32> -> vector<256x12xf32>
    %45 = arith.truncf %44 : vector<256x12xf32> to vector<256x12xbf16>
    %c0_15 = arith.constant 0 : index
    %c0_16 = arith.constant 0 : index
    %c0_17 = arith.constant 0 : index
    %46 = vector.load %arg6[%c0_15, %c0_16, %c0_17] : memref<3x12x4xbf16, #tpu.memory_space<vmem>>, vector<1x12x4xbf16>
    %47 = vector.shape_cast %46 : vector<1x12x4xbf16> to vector<12x4xbf16>
    %cst_18 = arith.constant dense<0.000000e+00> : vector<256x4xf32>
    %48 = tpu.matmul %45, %47, %cst_18 {dimension_numbers = #tpu.dot_dimension_numbers<[1], [0], [0], [1], [0, 0, 1, 1], [], []>} : vector<256x12xbf16>, vector<12x4xbf16>, vector<256x4xf32> -> vector<256x4xf32>
    %49 = vector.extract_strided_slice %37 {offsets = [1, 0, 0], sizes = [16, 16, 4], strides = [1, 1, 1]} : vector<18x18x4xf32> to vector<16x16x4xf32>
    %50 = vector.shape_cast %49 : vector<16x16x4xf32> to vector<256x4xf32>
    %51 = vector.extract_strided_slice %37 {offsets = [1, 1, 0], sizes = [16, 16, 4], strides = [1, 1, 1]} : vector<18x18x4xf32> to vector<16x16x4xf32>
    %52 = vector.shape_cast %51 : vector<16x16x4xf32> to vector<256x4xf32>
    %53 = vector.extract_strided_slice %37 {offsets = [1, 2, 0], sizes = [16, 16, 4], strides = [1, 1, 1]} : vector<18x18x4xf32> to vector<16x16x4xf32>
    %54 = vector.shape_cast %53 : vector<16x16x4xf32> to vector<256x4xf32>
    %55 = tpu.concatenate %50, %52, %54 in 1 : vector<256x4xf32>, vector<256x4xf32>, vector<256x4xf32> -> vector<256x12xf32>
    %56 = arith.truncf %55 : vector<256x12xf32> to vector<256x12xbf16>
    %c1 = arith.constant 1 : index
    %c0_19 = arith.constant 0 : index
    %c0_20 = arith.constant 0 : index
    %57 = vector.load %arg6[%c1, %c0_19, %c0_20] : memref<3x12x4xbf16, #tpu.memory_space<vmem>>, vector<1x12x4xbf16>
    %58 = vector.shape_cast %57 : vector<1x12x4xbf16> to vector<12x4xbf16>
    %cst_21 = arith.constant dense<0.000000e+00> : vector<256x4xf32>
    %59 = tpu.matmul %56, %58, %cst_21 {dimension_numbers = #tpu.dot_dimension_numbers<[1], [0], [0], [1], [0, 0, 1, 1], [], []>} : vector<256x12xbf16>, vector<12x4xbf16>, vector<256x4xf32> -> vector<256x4xf32>
    %60 = arith.addf %48, %59 : vector<256x4xf32>
    %61 = vector.extract_strided_slice %37 {offsets = [2, 0, 0], sizes = [16, 16, 4], strides = [1, 1, 1]} : vector<18x18x4xf32> to vector<16x16x4xf32>
    %62 = vector.shape_cast %61 : vector<16x16x4xf32> to vector<256x4xf32>
    %63 = vector.extract_strided_slice %37 {offsets = [2, 1, 0], sizes = [16, 16, 4], strides = [1, 1, 1]} : vector<18x18x4xf32> to vector<16x16x4xf32>
    %64 = vector.shape_cast %63 : vector<16x16x4xf32> to vector<256x4xf32>
    %65 = vector.extract_strided_slice %37 {offsets = [2, 2, 0], sizes = [16, 16, 4], strides = [1, 1, 1]} : vector<18x18x4xf32> to vector<16x16x4xf32>
    %66 = vector.shape_cast %65 : vector<16x16x4xf32> to vector<256x4xf32>
    %67 = tpu.concatenate %62, %64, %66 in 1 : vector<256x4xf32>, vector<256x4xf32>, vector<256x4xf32> -> vector<256x12xf32>
    %68 = arith.truncf %67 : vector<256x12xf32> to vector<256x12xbf16>
    %c2 = arith.constant 2 : index
    %c0_22 = arith.constant 0 : index
    %c0_23 = arith.constant 0 : index
    %69 = vector.load %arg6[%c2, %c0_22, %c0_23] : memref<3x12x4xbf16, #tpu.memory_space<vmem>>, vector<1x12x4xbf16>
    %70 = vector.shape_cast %69 : vector<1x12x4xbf16> to vector<12x4xbf16>
    %cst_24 = arith.constant dense<0.000000e+00> : vector<256x4xf32>
    %71 = tpu.matmul %68, %70, %cst_24 {dimension_numbers = #tpu.dot_dimension_numbers<[1], [0], [0], [1], [0, 0, 1, 1], [], []>} : vector<256x12xbf16>, vector<12x4xbf16>, vector<256x4xf32> -> vector<256x4xf32>
    %72 = arith.addf %60, %71 : vector<256x4xf32>
    %cst_25 = arith.constant dense<0.000000e+00> : vector<4xf32>
    %73 = vector.multi_reduction <add>, %72, %cst_25 [0] : vector<256x4xf32> to vector<4xf32>
    %74 = vector.shape_cast %73 : vector<4xf32> to vector<1x4xf32>
    %75 = arith.mulf %72, %72 : vector<256x4xf32>
    %cst_26 = arith.constant dense<0.000000e+00> : vector<4xf32>
    %76 = vector.multi_reduction <add>, %75, %cst_26 [0] : vector<256x4xf32> to vector<4xf32>
    %77 = vector.shape_cast %76 : vector<4xf32> to vector<1x4xf32>
    %78 = tpu.concatenate %74, %77 in 0 : vector<1x4xf32>, vector<1x4xf32> -> vector<2x4xf32>
    %c0_27 = arith.constant 0 : index
    %c0_28 = arith.constant 0 : index
    %c0_29 = arith.constant 0 : index
    %c0_30 = arith.constant 0 : index
    %79 = vector.load %arg8[%c0_27, %c0_28, %c0_29, %c0_30] : memref<1x1x2x4xf32, #tpu.memory_space<vmem>>, vector<1x1x2x4xf32>
    %80 = vector.shape_cast %79 : vector<1x1x2x4xf32> to vector<2x4xf32>
    %81 = vector.shape_cast %78 : vector<2x4xf32> to vector<1x1x2x4xf32>
    tpu.vector_store %arg8[%c0_27, %c0_28, %c0_29, %c0_30], %81 {strides = array<i32>} : memref<1x1x2x4xf32, #tpu.memory_space<vmem>>, vector<1x1x2x4xf32>,
    %82 = vector.shape_cast %72 : vector<256x4xf32> to vector<16x16x4xf32>
    %83 = arith.truncf %82 : vector<16x16x4xf32> to vector<16x16x4xbf16>
    %c0_31 = arith.constant 0 : index
    %c0_32 = arith.constant 0 : index
    %c0_33 = arith.constant 0 : index
    %c0_34 = arith.constant 0 : index
    %84 = vector.load %arg7[%c0_31, %c0_32, %c0_33, %c0_34] : memref<1x16x16x4xbf16, #tpu.memory_space<vmem>>, vector<1x16x16x4xbf16>
    %85 = vector.shape_cast %84 : vector<1x16x16x4xbf16> to vector<16x16x4xbf16>
    %86 = vector.shape_cast %83 : vector<16x16x4xbf16> to vector<1x16x16x4xbf16>
    tpu.vector_store %arg7[%c0_31, %c0_32, %c0_33, %c0_34], %86 {strides = array<i32>} : memref<1x16x16x4xbf16, #tpu.memory_space<vmem>>, vector<1x16x16x4xbf16>,
    return
  }
  func.func @transform_0(%arg0: i32, %arg1: i32) -> (i32, i32, i32, i32) {
    %c0_i32 = arith.constant 0 : i32
    %c0_i32_0 = arith.constant 0 : i32
    %c0_i32_1 = arith.constant 0 : i32
    return %arg0, %arg1, %c0_i32, %c0_i32_0 : i32, i32, i32, i32
  }
  func.func @transform_1(%arg0: i32, %arg1: i32) -> (i32, i32, i32, i32) {
    %c1_i32 = arith.constant 1 : i32
    %0 = arith.addi %arg1, %c1_i32 : i32
    %c8_i32 = arith.constant 8 : i32
    %1 = arith.muli %0, %c8_i32 : i32
    %c0_i32 = arith.constant 0 : i32
    %c0_i32_0 = arith.constant 0 : i32
    %c0_i32_1 = arith.constant 0 : i32
    return %arg0, %1, %c0_i32, %c0_i32_0 : i32, i32, i32, i32
  }
  func.func @transform_2(%arg0: i32, %arg1: i32) -> (i32, i32) {
    %c0_i32 = arith.constant 0 : i32
    %c0_i32_0 = arith.constant 0 : i32
    %c0_i32_1 = arith.constant 0 : i32
    return %c0_i32, %c0_i32_0 : i32, i32
  }
  func.func @transform_3(%arg0: i32, %arg1: i32) -> (i32, i32) {
    %c0_i32 = arith.constant 0 : i32
    %c0_i32_0 = arith.constant 0 : i32
    %c0_i32_1 = arith.constant 0 : i32
    return %c0_i32, %c0_i32_0 : i32, i32
  }
  func.func @transform_4(%arg0: i32, %arg1: i32) -> (i32, i32, i32) {
    %c0_i32 = arith.constant 0 : i32
    %c0_i32_0 = arith.constant 0 : i32
    %c0_i32_1 = arith.constant 0 : i32
    %c0_i32_2 = arith.constant 0 : i32
    return %c0_i32, %c0_i32_0, %c0_i32_1 : i32, i32, i32
  }
  func.func @transform_5(%arg0: i32, %arg1: i32) -> (i32, i32, i32, i32) {
    %c0_i32 = arith.constant 0 : i32
    %c0_i32_0 = arith.constant 0 : i32
    %c0_i32_1 = arith.constant 0 : i32
    return %arg0, %arg1, %c0_i32, %c0_i32_0 : i32, i32, i32, i32
  }
  func.func @transform_6(%arg0: i32, %arg1: i32) -> (i32, i32, i32, i32) {
    %c0_i32 = arith.constant 0 : i32
    %c0_i32_0 = arith.constant 0 : i32
    %c0_i32_1 = arith.constant 0 : i32
    return %arg0, %arg1, %c0_i32, %c0_i32_0 : i32, i32, i32, i32
  }
}

module attributes {stable_mosaic.version = 11 : i64} {
  func.func @kernel(%arg0: i32, %arg1: memref<16x64xbf16, #tpu.memory_space<vmem>>, %arg2: memref<1x64xf32, #tpu.memory_space<vmem>>, %arg3: memref<1x64xf32, #tpu.memory_space<vmem>>, %arg4: memref<16x64xf32, #tpu.memory_space<vmem>>) attributes {dimension_semantics = [#tpu.dimension_semantics<parallel>], iteration_bounds = array<i64: 2>, scalar_prefetch = 0 : i64, scratch_operands = 0 : i64, tpu.core_type = #tpu.core_type<tc>, window_params = [{transform_indices = @transform_0, window_bounds = array<i64: 16, 64>}, {pipeline_mode = #tpu.pipeline_mode<synchronous>, transform_indices = @transform_1, window_bounds = array<i64: 1, 64>}, {pipeline_mode = #tpu.pipeline_mode<synchronous>, transform_indices = @transform_2, window_bounds = array<i64: 1, 64>}, {transform_indices = @transform_3, window_bounds = array<i64: 16, 64>}]} {
    %c0 = arith.constant 0 : index
    %c0_0 = arith.constant 0 : index
    %0 = vector.load %arg1[%c0, %c0_0] : memref<16x64xbf16, #tpu.memory_space<vmem>>, vector<16x64xbf16>
    %1 = arith.extf %0 : vector<16x64xbf16> to vector<16x64xf32>
    %c0_1 = arith.constant 0 : index
    %c0_2 = arith.constant 0 : index
    %2 = vector.load %arg2[%c0_1, %c0_2] : memref<1x64xf32, #tpu.memory_space<vmem>>, vector<1x64xf32>
    %3 = vector.broadcast %2 : vector<1x64xf32> to vector<16x64xf32>
    %4 = arith.mulf %1, %3 : vector<16x64xf32>
    %c0_3 = arith.constant 0 : index
    %c0_4 = arith.constant 0 : index
    %5 = vector.load %arg3[%c0_3, %c0_4] : memref<1x64xf32, #tpu.memory_space<vmem>>, vector<1x64xf32>
    %6 = vector.broadcast %5 : vector<1x64xf32> to vector<16x64xf32>
    %7 = arith.addf %4, %6 : vector<16x64xf32>
    %cst = arith.constant 0.000000e+00 : f32
    %8 = vector.broadcast %cst : f32 to vector<16x64xf32>
    %9 = arith.cmpf ogt, %7, %8 : vector<16x64xf32>
    %cst_5 = arith.constant 0.00999999977 : f32
    %10 = vector.broadcast %cst_5 : f32 to vector<16x64xf32>
    %11 = arith.mulf %10, %7 : vector<16x64xf32>
    %12 = arith.select %9, %7, %11 : vector<16x64xi1>, vector<16x64xf32>
    %c0_6 = arith.constant 0 : index
    %c0_7 = arith.constant 0 : index
    %13 = vector.load %arg4[%c0_6, %c0_7] : memref<16x64xf32, #tpu.memory_space<vmem>>, vector<16x64xf32>
    tpu.vector_store %arg4[%c0_6, %c0_7], %12 {strides = array<i32>} : memref<16x64xf32, #tpu.memory_space<vmem>>, vector<16x64xf32>,
    return
  }
  func.func @transform_0(%arg0: i32) -> (i32, i32) {
    %c0_i32 = arith.constant 0 : i32
    %c0_i32_0 = arith.constant 0 : i32
    return %arg0, %c0_i32 : i32, i32
  }
  func.func @transform_1(%arg0: i32) -> (i32, i32) {
    %c0_i32 = arith.constant 0 : i32
    %c0_i32_0 = arith.constant 0 : i32
    %c0_i32_1 = arith.constant 0 : i32
    return %c0_i32, %c0_i32_0 : i32, i32
  }
  func.func @transform_2(%arg0: i32) -> (i32, i32) {
    %c0_i32 = arith.constant 0 : i32
    %c0_i32_0 = arith.constant 0 : i32
    %c0_i32_1 = arith.constant 0 : i32
    return %c0_i32, %c0_i32_0 : i32, i32
  }
  func.func @transform_3(%arg0: i32) -> (i32, i32) {
    %c0_i32 = arith.constant 0 : i32
    %c0_i32_0 = arith.constant 0 : i32
    return %arg0, %c0_i32 : i32, i32
  }
}

</mosaic_0001>

<bundles_post_ra>
// kernel: squeeze.5
= control target key start
LH: loop header
LB: loop body
LE: loop exit
PB: predicated region body
PF: predicated region fallthrough
CT: control target
= control target key end

     0   :  { %vm66_vm0 = vcmask 31744   ;;  %s97_s8 = smov 4   ;;  %vm72_vm1 = vcmask 97344   ;;  %vm78_vm2 = vcmask 64544   ;;  %v98_v9 = vmov 0.0   ;;  %s115_s0 = inlined_call_operand.vmem [shape: bf16[1,3,4,4], index: 0, kind: input, shape index: {}]   ;;  %s116_s1 = inlined_call_operand.vmem [shape: bf16[12,4], index: 1, kind: output, shape index: {}]  }
   0x1   :  { %v90_v0 = vld [vmem:[%s115_s0] sm:$0xff]   ;;  %s96_s0 = smov 8  }
   0x2   :  { %v17_v1 = vunpack.c.h.bf16 %v90_v0  ;;  %v48_v2 = vunpack.c.l.bf16 %v90_v0 }
   0x4   :  { %20 = vst [vmem:[#allocation1 + $0x10] ss:$8 sps:$4 sm:$0xff] %v17_v1   ;;  %51 = vst [vmem:[#allocation1] ss:$8 sps:$4 sm:$0xff] %v48_v2  }
   0xb   :  { %v69_v3 = vld [vmem:[#allocation1 + $0x2] ss:$8 sm:$0xf]   ;;  %v65_v4 = vld [vmem:[#allocation1] ss:$8 sm:$0xf]  }
   0xc   :  { %70 = vrot.lane.b32.xlu0 %v69_v3, %s96_s0  ;;  %v75_v5 = vld [vmem:[#allocation1 + $0x1] ss:$8 sm:$0xf]   ;;  %67 = vst.msk [vmem:[#allocation0] sm:$0xf] %vm66_vm0, %v65_v4  }
  0x10   :  { %76 = vrot.lane.b32.xlu0 %v75_v5, %s97_s8 }
  0x7e   :  { %v71_v6 = vpop.permute.xlu0 %70  }
  0x7f   :  { %73 = vst.msk [vmem:[#allocation0] sm:$0xf] %vm72_vm1, %v71_v6  }
  0x82   :  { %v77_v7 = vpop.permute.xlu0 %76  }
  0x83   :  { %79 = vst.msk [vmem:[#allocation0] sm:$0xf] %vm78_vm2, %v77_v7  }
  0x8a   :  { %v84_v8 = vld [vmem:[#allocation0] sm:$0xf] }
  0x8b   :  { %v85_v10 = vpack.c.bf16 %v98_v9, %v84_v8 }
  0x8d   :  { %87 = vst [vmem:[%s116_s1] sm:$0x3] %v85_v10 }

// kernel: tile.18
= control target key start
LH: loop header
LB: loop body
LE: loop exit
PB: predicated region body
PF: predicated region fallthrough
CT: control target
= control target key end

     0   :  { %s22_s0 = inlined_call_operand.vmem [shape: f32[4], index: 0, kind: input, shape index: {}]   ;;  %s23_s1 = inlined_call_operand.vmem [shape: f32[2,4], index: 1, kind: output, shape index: {}]  }
   0x1   :  { %v4_v0 = vld [vmem:[%s22_s0] ss:$0 sm:$0xff] }
   0x2   :  { %5 = vst [vmem:[%s23_s1] sm:$0x3] %v4_v0 }

// kernel: tile.19
= control target key start
LH: loop header
LB: loop body
LE: loop exit
PB: predicated region body
PF: predicated region fallthrough
CT: control target
= control target key end

     0   :  { %vm7_vm0 = vcmask 31744   ;;  %vm13_vm1 = vcmask 64544   ;;  %s39_s0 = inlined_call_operand.vmem [shape: f32[2,4], index: 0, kind: input, shape index: {}]   ;;  %s40_s1 = inlined_call_operand.vmem [shape: f32[1,8], index: 1, kind: output, shape index: {}]  }
   0x1   :  { %v4_v0 = vld [vmem:[%s39_s0] sm:$0x3]  ;;  %s22_s0 = smov 4  }
   0x2   :  { %5 = vst [vmem:[#allocation1] sm:$0x3] %v4_v0 }
   0x9   :  { %v10_v1 = vld [vmem:[#allocation1 + $0x1] sm:$0x1]   ;;  %v6_v2 = vld [vmem:[#allocation1] sm:$0x1]  }
   0xa   :  { %11 = vrot.lane.b32.xlu0 %v10_v1, %s22_s0  ;;  %8 = vst.msk [vmem:[#allocation0] sm:$0x1] %vm7_vm0, %v6_v2  }
  0x7c   :  { %v12_v3 = vpop.permute.xlu0 %11  }
  0x7d   :  { %14 = vst.msk [vmem:[#allocation0] sm:$0x1] %vm13_vm1, %v12_v3  }
  0x84   :  { %v18_v4 = vld [vmem:[#allocation0] sm:$0x1] }
  0x85   :  { %20 = vst [vmem:[%s40_s1] sm:$0x1] %v18_v4 }

// kernel: squeeze.0
= control target key start
LH: loop header
LB: loop body
LE: loop exit
PB: predicated region body
PF: predicated region fallthrough
CT: control target
= control target key end

     0   :  { %vm66_vm0 = vcmask 31744   ;;  %s97_s8 = smov 4   ;;  %vm72_vm1 = vcmask 97344   ;;  %vm78_vm2 = vcmask 64544   ;;  %v98_v9 = vmov 0.0   ;;  %s115_s0 = inlined_call_operand.vmem [shape: bf16[1,3,4,4], index: 0, kind: input, shape index: {}]   ;;  %s116_s1 = inlined_call_operand.vmem [shape: bf16[1,12,4], index: 1, kind: output, shape index: {}]  }
   0x1   :  { %v90_v0 = vld [vmem:[%s115_s0] sm:$0xff]   ;;  %s96_s0 = smov 8  }
   0x2   :  { %v17_v1 = vunpack.c.h.bf16 %v90_v0  ;;  %v48_v2 = vunpack.c.l.bf16 %v90_v0 }
   0x4   :  { %20 = vst [vmem:[#allocation1 + $0x10] ss:$8 sps:$4 sm:$0xff] %v17_v1   ;;  %51 = vst [vmem:[#allocation1] ss:$8 sps:$4 sm:$0xff] %v48_v2  }
   0xb   :  { %v69_v3 = vld [vmem:[#allocation1 + $0x2] ss:$8 sm:$0xf]   ;;  %v65_v4 = vld [vmem:[#allocation1] ss:$8 sm:$0xf]  }
   0xc   :  { %70 = vrot.lane.b32.xlu0 %v69_v3, %s96_s0  ;;  %v75_v5 = vld [vmem:[#allocation1 + $0x1] ss:$8 sm:$0xf]   ;;  %67 = vst.msk [vmem:[#allocation0] sm:$0xf] %vm66_vm0, %v65_v4  }
  0x10   :  { %76 = vrot.lane.b32.xlu0 %v75_v5, %s97_s8 }
  0x7e   :  { %v71_v6 = vpop.permute.xlu0 %70  }
  0x7f   :  { %73 = vst.msk [vmem:[#allocation0] sm:$0xf] %vm72_vm1, %v71_v6  }
  0x82   :  { %v77_v7 = vpop.permute.xlu0 %76  }
  0x83   :  { %79 = vst.msk [vmem:[#allocation0] sm:$0xf] %vm78_vm2, %v77_v7  }
  0x8a   :  { %v84_v8 = vld [vmem:[#allocation0] sm:$0xf] }
  0x8b   :  { %v85_v10 = vpack.c.bf16 %v98_v9, %v84_v8 }
  0x8d   :  { %87 = vst [vmem:[%s116_s1] sm:$0x3] %v85_v10 }

// kernel: tile.23
= control target key start
LH: loop header
LB: loop body
LE: loop exit
PB: predicated region body
PF: predicated region fallthrough
CT: control target
= control target key end

     0   :  { %s28_s0 = inlined_call_operand.vmem [shape: f32[4], index: 0, kind: input, shape index: {}]   ;;  %s29_s1 = inlined_call_operand.vmem [shape: f32[16,4], index: 1, kind: output, shape index: {}]  }
   0x1   :  { %v4_v0 = vld [vmem:[%s28_s0] ss:$0 sm:$0xff] }
   0x2   :  { %5 = vst [vmem:[%s29_s1] sm:$0xff] %v4_v0  ;;  %8 = vst [vmem:[%s29_s1 + $0x8] sm:$0xff] %v4_v0 }

// kernel: tile.24
= control target key start
LH: loop header
LB: loop body
LE: loop exit
PB: predicated region body
PF: predicated region fallthrough
CT: control target
= control target key end

     0   :  { %s131_s10 = smov 60   ;;  %s132_s11 = smov 52   ;;  %vm3_vm0 = vcmask 31744   ;;  %vm9_vm1 = vcmask 523744   ;;  %vm15_vm2 = vcmask 490944   ;;  %vm21_vm3 = vcmask 458144   ;;  %s207_s0 = inlined_call_operand.vmem [shape: f32[16,4], index: 0, kind: input, shape index: {}]   ;;  %s208_s1 = inlined_call_operand.vmem [shape: f32[1,64], index: 1, kind: output, shape index: {}]  }
   0x1   :  { %v101_v0 = vld [vmem:[%s207_s0 + $0xf] sm:$0x1]   ;;  %v103_v1 = vld [vmem:[%s207_s0 + $0xd] sm:$0x1]   ;;  %v102_v2 = vld [vmem:[%s207_s0 + $0xe] sm:$0x1]  }
   0x2   :  { %7 = vrot.lane.b32.xlu0 %v101_v0, %s131_s10  ;;  %19 = vrot.lane.b32.xlu1 %v103_v1, %s132_s11  ;;  %v104_v3 = vld [vmem:[%s207_s0 + $0xc] sm:$0x1]   ;;  %s133_s16 = smov 56   ;;  %s134_s17 = smov 48   ;;  %v105_v4 = vld [vmem:[%s207_s0 + $0xb] sm:$0x1]  }
   0x3   :  { %v106_v5 = vld [vmem:[%s207_s0 + $0xa] sm:$0x1]   ;;  %v2_v6 = vld [vmem:[%s207_s0] sm:$0x1]   ;;  %s135_s24 = smov 44   ;;  %s136_s25 = smov 40  }
   0x4   :  { %4 = vst.msk [vmem:[#allocation0] sm:$0x1] %vm3_vm0, %v2_v6   ;;  %v107_v7 = vld [vmem:[%s207_s0 + $0x9] sm:$0x1]   ;;  %v108_v8 = vld [vmem:[%s207_s0 + $0x8] sm:$0x1]  }
   0x5   :  { %s137_s30 = smov 36   ;;  %s138_s2 = smov 32   ;;  %v109_v9 = vld [vmem:[%s207_s0 + $0x7] sm:$0x1]   ;;  %v110_v10 = vld [vmem:[%s207_s0 + $0x6] sm:$0x1]  }
   0x6   :  { %13 = vrot.lane.b32.xlu0 %v102_v2, %s133_s16  ;;  %25 = vrot.lane.b32.xlu1 %v104_v3, %s134_s17  ;;  %s139_s7 = smov 28   ;;  %s140_s8 = smov 24   ;;  %v111_v11 = vld [vmem:[%s207_s0 + $0x5] sm:$0x1]   ;;  %v112_v12 = vld [vmem:[%s207_s0 + $0x4] sm:$0x1]  }
   0x7   :  { %s141_s13 = smov 20   ;;  %s142_s14 = smov 16   ;;  %v113_v13 = vld [vmem:[%s207_s0 + $0x3] sm:$0x1]   ;;  %v114_v14 = vld [vmem:[%s207_s0 + $0x2] sm:$0x1]  }
   0x8   :  { %s143_s19 = smov 12   ;;  %s144_s20 = smov 8   ;;  %v115_v15 = vld [vmem:[%s207_s0 + $0x1] sm:$0x1]   ;;  %vm27_vm4 = vcmask 425344   ;;  %vm33_vm5 = vcmask 392544  }
   0x9   :  { %s145_s0 = smov 4   ;;  %vm39_vm6 = vcmask 359744   ;;  %vm45_vm7 = vcmask 326944   ;;  %vm51_vm8 = vcmask 294144   ;;  %vm57_vm9 = vcmask 261344  }
   0xa   :  { %31 = vrot.lane.b32.xlu0 %v105_v4, %s135_s24  ;;  %37 = vrot.lane.b32.xlu1 %v106_v5, %s136_s25  ;;  %vm63_vm10 = vcmask 228544   ;;  %vm69_vm11 = vcmask 195744   ;;  %vm75_vm12 = vcmask 162944   ;;  %vm81_vm13 = vcmask 130144  }
   0xb   :  { %vm87_vm14 = vcmask 97344   ;;  %vm93_vm15 = vcmask 64544  }
   0xe   :  { %43 = vrot.lane.b32.xlu0 %v107_v7, %s137_s30  ;;  %49 = vrot.lane.b32.xlu1 %v108_v8, %s138_s2 }
  0x12   :  { %55 = vrot.lane.b32.xlu0 %v109_v9, %s139_s7  ;;  %61 = vrot.lane.b32.xlu1 %v110_v10, %s140_s8 }
  0x16   :  { %67 = vrot.lane.b32.xlu0 %v111_v11, %s141_s13  ;;  %73 = vrot.lane.b32.xlu1 %v112_v12, %s142_s14 }
  0x1a   :  { %79 = vrot.lane.b32.xlu0 %v113_v13, %s143_s19  ;;  %85 = vrot.lane.b32.xlu1 %v114_v14, %s144_s20 }
  0x1e   :  { %91 = vrot.lane.b32.xlu0 %v115_v15, %s145_s0 }
  0x74   :  { %v8_v16 = vpop.permute.xlu0 %7   ;;  %v20_v17 = vpop.permute.xlu1 %19  }
  0x75   :  { %10 = vst.msk [vmem:[#allocation0] sm:$0x1] %vm9_vm1, %v8_v16  }
  0x78   :  { %v14_v18 = vpop.permute.xlu0 %13   ;;  %v26_v19 = vpop.permute.xlu1 %25  }
  0x79   :  { %16 = vst.msk [vmem:[#allocation0] sm:$0x1] %vm15_vm2, %v14_v18  }
  0x7a   :  { %22 = vst.msk [vmem:[#allocation0] sm:$0x1] %vm21_vm3, %v20_v17  }
  0x7b   :  { %28 = vst.msk [vmem:[#allocation0] sm:$0x1] %vm27_vm4, %v26_v19  }
  0x7c   :  { %v32_v20 = vpop.permute.xlu0 %31   ;;  %v38_v21 = vpop.permute.xlu1 %37  }
  0x7d   :  { %34 = vst.msk [vmem:[#allocation0] sm:$0x1] %vm33_vm5, %v32_v20  }
  0x7e   :  { %40 = vst.msk [vmem:[#allocation0] sm:$0x1] %vm39_vm6, %v38_v21  }
  0x80   :  { %v44_v22 = vpop.permute.xlu0 %43   ;;  %v50_v23 = vpop.permute.xlu1 %49  }
  0x81   :  { %46 = vst.msk [vmem:[#allocation0] sm:$0x1] %vm45_vm7, %v44_v22  }
  0x82   :  { %52 = vst.msk [vmem:[#allocation0] sm:$0x1] %vm51_vm8, %v50_v23  }
  0x84   :  { %v56_v24 = vpop.permute.xlu0 %55   ;;  %v62_v25 = vpop.permute.xlu1 %61  }
  0x85   :  { %58 = vst.msk [vmem:[#allocation0] sm:$0x1] %vm57_vm9, %v56_v24  }
  0x86   :  { %64 = vst.msk [vmem:[#allocation0] sm:$0x1] %vm63_vm10, %v62_v25  }
  0x88   :  { %v68_v26 = vpop.permute.xlu0 %67   ;;  %v74_v27 = vpop.permute.xlu1 %73  }
  0x89   :  { %70 = vst.msk [vmem:[#allocation0] sm:$0x1] %vm69_vm11, %v68_v26  }
  0x8a   :  { %76 = vst.msk [vmem:[#allocation0] sm:$0x1] %vm75_vm12, %v74_v27  }
  0x8c   :  { %v80_v28 = vpop.permute.xlu0 %79   ;;  %v86_v29 = vpop.permute.xlu1 %85  }
  0x8d   :  { %82 = vst.msk [vmem:[#allocation0] sm:$0x1] %vm81_vm13, %v80_v28  }
  0x8e   :  { %88 = vst.msk [vmem:[#allocation0] sm:$0x1] %vm87_vm14, %v86_v29  }
  0x90   :  { %v92_v30 = vpop.permute.xlu0 %91  }
  0x91   :  { %94 = vst.msk [vmem:[#allocation0] sm:$0x1] %vm93_vm15, %v92_v30  }
  0x98   :  { %v98_v31 = vld [vmem:[#allocation0] sm:$0x1] }
  0x99   :  { %100 = vst [vmem:[%s208_s1] sm:$0x1] %v98_v31 }

// kernel: decode_block_forward.4
= control target key start
LH: loop header
LB: loop body
LE: loop exit
PB: predicated region body
PF: predicated region fallthrough
CT: control target
= control target key end

     0   :  { %s540_s12 = smov 0   ;;  %s615_s0 = inlined_call_operand.vmem [shape: f32[16,8,8], index: 0, kind: input, shape index: {}]   ;;  %s616_s1 = inlined_call_operand.vmem [shape: bf16[2,8,8], index: 1, kind: input, shape index: {}]   ;;  %s617_s2 = inlined_call_operand.vmem [shape: f32[1,8], index: 2, kind: input, shape index: {}]   ;;  %s618_s3 = inlined_call_operand.vmem [shape: bf16[16,2,8,8], index: 3, kind: output, shape index: {}]  }
   0x1 LB: > { %s441_s13 = sadd.s32 4294967295, %s518_s12   ;;  %p445_p0 = scmp.ge.s32.totalorder %s518_s12, 1  ;;  %s518_s12 = sphi %s540_s12, %s13_s12  }
   0x2   : > { %p138_p1 = scmp.lt.s32.totalorder %s518_s12, 3 }
   0x4   : > { %p139_p2 = pnand %p445_p0, %p138_p1 }
   0x5   : > { %v190_v0 = vld [vmem:[%s616_s1] sm:$0xf] (!%p139_p2)  ;;  %vm210_vm0 = vcmask (!%p139_p2), 1043456   ;;  %v456_v1 = vld [vmem:[%s616_s1 + $0x4] sm:$0xf] (!%p139_p2)  ;;  %s446_s18 = sshll.u32 (!%p139_p2), %s441_s13, 3 }
   0x6   : > { %142 = sbr.rel (%p139_p2) target bundleno = 248 (0xf8), region = 32  ;;  %502 = vmatprep.subr.msk.bf16.mxu0 (!%p139_p2), %vm210_vm0, %v190_v0  ;;  %503 = vmatprep.subr.msk.bf16.mxu1 (!%p139_p2), %vm210_vm0, %v456_v1  ;;  %v212_v2 = vsel (!%p139_p2), %vm210_vm0, %v190_v0, 0  ;;  %v299_v3 = vsel (!%p139_p2), %vm210_vm0, %v456_v1, 0  ;;  %p164_p3 = scmp.lt.s32.totalorder (!%p139_p2), %s446_s18, 15  ;;  %vm197_vm1 = vcmask (!%p139_p2), 64512   ;;  %vm287_vm2 = vcmask (!%p139_p2), 60416  }
   0x7   : > { %483 = vmatpush3.bf16.msra.mxu0 (!%p139_p2), %v212_v2  ;;  %493 = vmatpush3.bf16.msra.mxu1 (!%p139_p2), %v299_v3  ;;  %v451_v16 = vld [vmem:[%s617_s2] ss:$0 sm:$0xff] (!%p139_p2) }
   0xd   : > { %s620_s18 = smov (!%p164_p3, %s446_s18), 15 }
   0xe   : > { %s447_s19 = sshll.u32 %s620_s18, 3 }
   0xf   : > { %s167_s22 = scalar_lea.vmem %s615_s0, %s447_s19  ;;  %s578_s27 = scalar_lea.vmem %s618_s3, %s447_s19 }
  0x10   : > { %v177_v4 = vld [vmem:[%s167_s22] sm:$0xff]  ;;  %v178_v5 = vld [vmem:[%s167_s22 + $0x8] sm:$0xff]  ;;  %v179_v6 = vld [vmem:[%s167_s22 + $0x10] sm:$0xff] }
  0x11   : > { %v185_v7 = vpack.c.bf16 %v178_v5, %v177_v4  ;;  %v180_v8 = vld [vmem:[%s167_s22 + $0x18] sm:$0xff]  ;;  %v181_v9 = vld [vmem:[%s167_s22 + $0x20] sm:$0xff]  ;;  %v182_v10 = vld [vmem:[%s167_s22 + $0x28] sm:$0xff] }
  0x12   : > { %v186_v11 = vpack.c.bf16 %v180_v8, %v179_v6  ;;  %v187_v12 = vpack.c.bf16 %v182_v10, %v181_v9  ;;  %v183_v13 = vld [vmem:[%s167_s22 + $0x30] sm:$0xff]  ;;  %v184_v14 = vld [vmem:[%s167_s22 + $0x38] sm:$0xff] }
  0x13   : > { %484 = vmatprep.mubr.msk.bf16.mxu0 %vm197_vm1, %v185_v7  ;;  %494 = vmatprep.mubr.msk.bf16.mxu1 %vm197_vm1, %v185_v7  ;;  %v188_v15 = vpack.c.bf16 %v184_v14, %v183_v13 }
  0x14   : > { %485 = vmatmul.mubr.msk.bf16.vlgmr.msra.gmra.mrb[0].mxu0 %vm197_vm1, %v186_v11  ;;  %495 = vmatmul.mubr.msk.bf16.vlgmr.msra.gmra.mrb[0].mxu1 %vm197_vm1, %v186_v11 }
  0x15   : > { %488 = vmatprep.mubr.msk.bf16.mxu0 %vm197_vm1, %v187_v12  ;;  %498 = vmatprep.mubr.msk.bf16.mxu1 %vm197_vm1, %v187_v12 }
  0x1c   : > { %489 = vmatmul.mubr.msk.bf16.gmra.mrb[4].mxu0 %vm197_vm1, %v188_v15  ;;  %499 = vmatmul.mubr.msk.bf16.gmra.mrb[4].mxu1 %vm197_vm1, %v188_v15 }
  0xe7   : > { %v486_v17 = vpop.f32.mrb[0].mxu0  ;;  %v496_v18 = vpop.f32.mrb[0].mxu1 }
  0xe8   : > { %v257_v19 = vadd.f32 %v486_v17, %v451_v16  ;;  %v344_v20 = vadd.f32 %v496_v18, %v451_v16  ;;  %v248_v21 = vpop.f32.mrb[1].mxu0  ;;  %v335_v22 = vpop.f32.mrb[1].mxu1 }
  0xe9   : > { %v249_v23 = vadd.f32 %v451_v16, %v248_v21  ;;  %v336_v24 = vadd.f32 %v451_v16, %v335_v22  ;;  %v487_v25 = vpop.f32.mrb[2].mxu0  ;;  %v497_v26 = vpop.f32.mrb[2].mxu1 }
  0xea   : > { %v281_v27 = vpack.c.bf16 %v257_v19, %v257_v19  ;;  %v368_v28 = vpack.c.bf16 %v344_v20, %v344_v20  ;;  %v260_v29 = vadd.f32 %v487_v25, %v451_v16  ;;  %v347_v30 = vadd.f32 %v497_v26, %v451_v16  ;;  %v251_v31 = vpop.f32.mrb[3].mxu0  ;;  %v338_v32 = vpop.f32.mrb[3].mxu1 }
  0xeb   : > { %v279_v33 = vpack.c.bf16 %v249_v23, %v249_v23  ;;  %v366_v34 = vpack.c.bf16 %v336_v24, %v336_v24  ;;  %v252_v35 = vadd.f32 %v451_v16, %v251_v31  ;;  %v339_v36 = vadd.f32 %v451_v16, %v338_v32 }
  0xec   : > { %290 = vst.msk [vmem:[%s578_s27 + $0x10] sm:$0xf] %vm287_vm2, %v281_v27  ;;  %463 = vst.msk [vmem:[%s578_s27 + $0x14] sm:$0xf] %vm287_vm2, %v368_v28  ;;  %v282_v37 = vpack.c.bf16 %v260_v29, %v260_v29  ;;  %v369_v38 = vpack.c.bf16 %v347_v30, %v347_v30 }
  0xed   : > { %288 = vst.msk [vmem:[%s578_s27] sm:$0xf] %vm287_vm2, %v279_v33  ;;  %461 = vst.msk [vmem:[%s578_s27 + $0x4] sm:$0xf] %vm287_vm2, %v366_v34  ;;  %v280_v39 = vpack.c.bf16 %v252_v35, %v252_v35  ;;  %v367_v40 = vpack.c.bf16 %v339_v36, %v339_v36 }
  0xee   : > { %291 = vst.msk [vmem:[%s578_s27 + $0x18] sm:$0xf] %vm287_vm2, %v282_v37  ;;  %464 = vst.msk [vmem:[%s578_s27 + $0x1c] sm:$0xf] %vm287_vm2, %v369_v38 }
  0xef   : > { %289 = vst.msk [vmem:[%s578_s27 + $0x8] sm:$0xf] %vm287_vm2, %v280_v39  ;;  %462 = vst.msk [vmem:[%s578_s27 + $0xc] sm:$0xf] %vm287_vm2, %v367_v40  ;;  %v490_v41 = vpop.f32.mrb[4].mxu0  ;;  %v500_v42 = vpop.f32.mrb[4].mxu1 }
  0xf0   : > { %v273_v43 = vadd.f32 %v490_v41, %v451_v16  ;;  %v360_v44 = vadd.f32 %v500_v42, %v451_v16  ;;  %v264_v45 = vpop.f32.mrb[5].mxu0  ;;  %v351_v46 = vpop.f32.mrb[5].mxu1 }
  0xf1   : > { %v265_v47 = vadd.f32 %v451_v16, %v264_v45  ;;  %v352_v48 = vadd.f32 %v451_v16, %v351_v46  ;;  %v491_v49 = vpop.f32.mrb[6].mxu0  ;;  %v501_v50 = vpop.f32.mrb[6].mxu1 }
  0xf2   : > { %v285_v51 = vpack.c.bf16 %v273_v43, %v273_v43  ;;  %v372_v52 = vpack.c.bf16 %v360_v44, %v360_v44  ;;  %v276_v53 = vadd.f32 %v491_v49, %v451_v16  ;;  %v363_v54 = vadd.f32 %v501_v50, %v451_v16  ;;  %v267_v55 = vpop.f32.mrb[7].mxu0  ;;  %v354_v56 = vpop.f32.mrb[7].mxu1 }
  0xf3   : > { %v283_v57 = vpack.c.bf16 %v265_v47, %v265_v47  ;;  %v370_v58 = vpack.c.bf16 %v352_v48, %v352_v48  ;;  %v268_v59 = vadd.f32 %v451_v16, %v267_v55  ;;  %v355_v60 = vadd.f32 %v451_v16, %v354_v56 }
  0xf4   : > { %294 = vst.msk [vmem:[%s578_s27 + $0x30] sm:$0xf] %vm287_vm2, %v285_v51  ;;  %467 = vst.msk [vmem:[%s578_s27 + $0x34] sm:$0xf] %vm287_vm2, %v372_v52  ;;  %v286_v61 = vpack.c.bf16 %v276_v53, %v276_v53  ;;  %v373_v62 = vpack.c.bf16 %v363_v54, %v363_v54 }
  0xf5   : > { %292 = vst.msk [vmem:[%s578_s27 + $0x20] sm:$0xf] %vm287_vm2, %v283_v57  ;;  %465 = vst.msk [vmem:[%s578_s27 + $0x24] sm:$0xf] %vm287_vm2, %v370_v58  ;;  %v284_v63 = vpack.c.bf16 %v268_v59, %v268_v59  ;;  %v371_v0 = vpack.c.bf16 %v355_v60, %v355_v60 }
  0xf6   : > { %295 = vst.msk [vmem:[%s578_s27 + $0x38] sm:$0xf] %vm287_vm2, %v286_v61  ;;  %468 = vst.msk [vmem:[%s578_s27 + $0x3c] sm:$0xf] %vm287_vm2, %v373_v62 }
  0xf7   : > { %293 = vst.msk [vmem:[%s578_s27 + $0x28] sm:$0xf] %vm287_vm2, %v284_v63  ;;  %466 = vst.msk [vmem:[%s578_s27 + $0x2c] sm:$0xf] %vm287_vm2, %v371_v0 }
  0xf8 PF: > { %s13_s12 = sadd.s32 1, %s518_s12  }
  0xf9   : > { %p10_p4 = scmp.ge.s32.totalorder %s13_s12, 4  }
  0xfb   :  { %12 = sbr.rel (!%p10_p4) target bundleno = 1 (0x1), region = 64 }

// kernel: decode_block_forward.7
= control target key start
LH: loop header
LB: loop body
LE: loop exit
PB: predicated region body
PF: predicated region fallthrough
CT: control target
= control target key end

     0   :  { %s314_s12 = smov 0   ;;  %s337_s0 = inlined_call_operand.vmem [shape: bf16[32,64], index: 0, kind: input, shape index: {}]   ;;  %s338_s1 = inlined_call_operand.vmem [shape: f32[1,64], index: 1, kind: input, shape index: {}]   ;;  %s339_s2 = inlined_call_operand.vmem [shape: f32[1,64], index: 2, kind: input, shape index: {}]   ;;  %s340_s3 = inlined_call_operand.vmem [shape: f32[32,64], index: 3, kind: output, shape index: {}]  }
   0x1 LB: > { %s261_s13 = sadd.s32 4294967295, %s292_s12   ;;  %p265_p0 = scmp.ge.s32.totalorder %s292_s12, 1  ;;  %s292_s12 = sphi %s314_s12, %s13_s12  }
   0x2   : > { %p138_p1 = scmp.lt.s32.totalorder %s292_s12, 3 }
   0x4   : > { %p139_p2 = pnand %p265_p0, %p138_p1 }
   0x5   : > { %s266_s14 = sshll.u32 (!%p139_p2), %s261_s13, 1  ;;  %v270_v1 = vld [vmem:[%s338_s1] ss:$0 sm:$0xff] (!%p139_p2)  ;;  %vm202_vm0 = vcmask (!%p139_p2), 523264  }
   0x6   : > { %142 = sbr.rel (%p139_p2) target bundleno = 27 (0x1b), region = 32  ;;  %p163_p3 = scmp.lt.s32.totalorder (!%p139_p2), %s266_s14, 3  ;;  %v271_v4 = vld [vmem:[%s339_s2] ss:$0 sm:$0xff] (!%p139_p2) }
   0xd   : > { %s342_s14 = smov (!%p163_p3, %s266_s14), 3 }
   0xe   : > { %s267_s15 = sshll.u32 %s342_s14, 2  ;;  %s269_s23 = sshll.u32 %s342_s14, 3 }
   0xf   : > { %s166_s18 = scalar_lea.vmem %s337_s0, %s267_s15  ;;  %s172_s26 = scalar_lea.vmem %s340_s3, %s269_s23 }
  0x10   : > { %v275_v0 = vld [vmem:[%s166_s18] sm:$0xff]  }
  0x11   : > { %v276_v2 = vunpack.c.l.bf16 %v275_v0  ;;  %v277_v3 = vunpack.c.h.bf16 %v275_v0 }
  0x13   : > { %v185_v5 = vmul.f32 %v276_v2, %v270_v1  ;;  %v186_v6 = vmul.f32 %v277_v3, %v270_v1 }
  0x15   : > { %v194_v7 = vadd.f32 %v271_v4, %v185_v5  ;;  %v195_v8 = vadd.f32 %v271_v4, %v186_v6 }
  0x17   : > { %vm196_vm1 = vcmp.gt.f32.partialorder %v194_v7, 0.0  ;;  %v198_v9 = vmul.f32 0.01, %v194_v7  ;;  %vm197_vm2 = vcmp.gt.f32.partialorder %v195_v8, 0.0  ;;  %v199_v10 = vmul.f32 0.01, %v195_v8 }
  0x19   : > { %v200_v11 = vsel %vm196_vm1, %v194_v7, %v198_v9  ;;  %v201_v12 = vsel %vm197_vm2, %v195_v8, %v199_v10 }
  0x1a   : > { %203 = vst.msk [vmem:[%s172_s26] sm:$0xff] %vm202_vm0, %v200_v11  ;;  %204 = vst.msk [vmem:[%s172_s26 + $0x8] sm:$0xff] %vm202_vm0, %v201_v12 }
  0x1b PF: > { %s13_s12 = sadd.s32 1, %s292_s12  }
  0x1c   : > { %p10_p4 = scmp.ge.s32.totalorder %s13_s12, 4  }
  0x1e   :  { %12 = sbr.rel (!%p10_p4) target bundleno = 1 (0x1), region = 62 }

// kernel: decode_block_forward.6
= control target key start
LH: loop header
LB: loop body
LE: loop exit
PB: predicated region body
PF: predicated region fallthrough
CT: control target
= control target key end

     0   :  { %s3347_s21 = smov 0   ;;  %s3349_s22 = smov 0   ;;  %s4249_s0 = inlined_call_operand.vmem [shape: bf16[2,18,18,4], index: 0, kind: input, shape index: {}, may-alias: {0,1}]   ;;  %s4250_s1 = inlined_call_operand.vmem [shape: bf16[2,18,18,4], index: 1, kind: input, shape index: {}, may-alias: {0,1}]   ;;  %s4251_s2 = inlined_call_operand.vmem [shape: f32[1,4], index: 2, kind: input, shape index: {}]   ;;  %s4252_s3 = inlined_call_operand.vmem [shape: f32[1,4], index: 3, kind: input, shape index: {}]   ;;  %s4253_s4 = inlined_call_operand.vmem [shape: bf16[3,12,4], index: 4, kind: input, shape index: {}]   ;;  %s4254_s5 = inlined_call_operand.vmem [shape: bf16[2,16,16,4], index: 5, kind: output, shape index: {0}]   ;;  %s4255_s6 = inlined_call_operand.vmem [shape: f32[2,1,2,4], index: 6, kind: output, shape index: {1}]  }
   0x1   :  { %s3351_s23 = smov 0  }
   0x2 LB: > { %s29_s24 = sadd.s32 1, %s3303_s22  ;;  %p2674_p0 = scmp.ge.s32.totalorder %s3307_s23, 1  ;;  %s3307_s23 = sphi %s3351_s23, %s17_s23   ;;  %s3303_s22 = sphi %s3349_s22, %s4257_s22   ;;  %s3299_s21 = sphi %s3347_s21, %s4256_s21  }
   0x3   : > { %p31_p1 = scmp.ge.s32.totalorder %s29_s24, 2  ;;  %p275_p2 = scmp.lt.s32.totalorder %s3307_s23, 3 }
   0x5   : > { %s4259_s24 = smov (%p31_p1, %s29_s24), 0  ;;  %p276_p3 = pnand %p2674_p0, %p275_p2 }
   0x6   : > { %v805_v0 = vlaneseq (!%p276_p3)  ;;  %v3309_v1 = vmov (!%p276_p3), 0.0   ;;  %p345_p4 = scmp.lt.s32.totalorder (!%p276_p3), %s3299_s21, 1  ;;  %s3310_s25 = smov (!%p276_p3), 8   ;;  %v3391_v8 = vld [vmem:[%s4251_s2] ss:$0 sm:$0xff] (!%p276_p3)  ;;  %vm1079_vm2 = vcmask (!%p276_p3), 1046528  }
   0x7   : > { %279 = sbr.rel (%p276_p3) target bundleno = 545 (0x221), region = 40  ;;  %v1161_v2 = vrot.slane (!%p276_p3), %v3309_v1, 2  ;;  %v1080_v3 = vrot.slane (!%p276_p3), %v3309_v1, 1  ;;  %s3311_s26 = smov (!%p276_p3), 4   ;;  %v3404_v19 = vld [vmem:[%s4252_s3] ss:$0 sm:$0xff] (!%p276_p3) }
   0x8   : > { %v3365_v4 = vshrl.u32 (!%p276_p3), %v805_v0, 7  ;;  %vm1160_vm3 = vcmask (!%p276_p3), 1045504  }
   0x9   : > { %v3367_v5 = vpack.i.bf16 (!%p276_p3), %v1161_v2, %v1161_v2  ;;  %v3369_v6 = vpack.i.bf16 (!%p276_p3), %v1080_v3, %v1080_v3 }
   0xa   : > { %v3374_v7 = vadd.s32 (!%p276_p3), 16, %v3365_v4  ;;  %vm863_vm0 = vcmp.ne.s32.totalorder (!%p276_p3), %v3365_v4, 0 }
   0xb   : > { %3104 = vrot.lane.b32.xlu1 (!%p276_p3), %v3367_v5, %s3310_s25  ;;  %3099 = vrot.lane.b32.xlu0 (!%p276_p3), %v3369_v6, %s3311_s26 }
   0xc   : > { %vm922_vm1 = vcmp.ne.s32.totalorder (!%p276_p3), %v3374_v7, 17 }
   0xe   : > { %s4261_s21 = smov (!%p345_p4, %s3299_s21), 1 }
   0xf   : > { %s3068_s27 = smul.u32 216, %s4261_s21  ;;  %s2679_s13 = sshll.u32 %s4261_s21, 1 }
  0x10   : > { %s392_s16 = scalar_lea.vmem %s4255_s6, %s2679_s13 }
  0x11   : > { %s3386_s30 = scalar_lea.vmem %s4249_s0, %s3068_s27  ;;  %s2772_s15 = sadd.s32 192, %s3068_s27 }
  0x12   : > { %v2838_v9 = vld [vmem:[%s3386_s30 + $0x18] sm:$0xff]   ;;  %v402_v10 = vld [vmem:[%s3386_s30 + $0x20] sm:$0x1]  ;;  %v397_v11 = vld [vmem:[%s3386_s30 + $0xc] sm:$0xff]   ;;  %s371_s18 = scalar_lea.vmem %s4250_s1, %s2772_s15 }
  0x13   : > { %v2808_v12 = vunpack.c.l.bf16 %v2838_v9  ;;  %v2809_v13 = vunpack.c.h.bf16 %v2838_v9  ;;  %v450_v14 = vunpack.c.l.bf16 %v402_v10  ;;  %v399_v15 = vld [vmem:[%s3386_s30 + $0x14] sm:$0x1]  ;;  %v445_v16 = vunpack.c.l.bf16 %v397_v11  ;;  %v408_v18 = vld [vmem:[%s3386_s30 + $0x38] sm:$0x1] }
  0x14   : > { %v2839_v17 = vld [vmem:[%s3386_s30 + $0x30] sm:$0xff]   ;;  %v446_v20 = vunpack.c.h.bf16 %v397_v11  ;;  %v447_v21 = vunpack.c.l.bf16 %v399_v15  ;;  %v456_v30 = vunpack.c.l.bf16 %v408_v18  ;;  %v3278_v11 = vld [vmem:[%s4253_s4 + $0x8] sm:$0x3f]  }
  0x15   : > { %v2812_v22 = vunpack.c.l.bf16 %v2839_v17  ;;  %v2813_v23 = vunpack.c.h.bf16 %v2839_v17  ;;  %v515_v24 = vmul.f32 %v2808_v12, %v3391_v8  ;;  %v516_v25 = vmul.f32 %v2809_v13, %v3391_v8  ;;  %v3279_v12 = vld [vmem:[%s4253_s4] sm:$0x3f]   ;;  %3064 = vmatprep.subr.msk.bf16.mxu1 %vm1160_vm3, %v3278_v11 }
  0x16   : > { %v517_v26 = vmul.f32 %v3391_v8, %v450_v14  ;;  %v512_v27 = vmul.f32 %v3391_v8, %v445_v16  ;;  %v513_v28 = vmul.f32 %v3391_v8, %v446_v20  ;;  %v514_v29 = vmul.f32 %v3391_v8, %v447_v21  ;;  %3065 = vmatprep.subr.msk.bf16.mxu0 %vm1160_vm3, %v3279_v12 }
  0x17   : > { %v521_v31 = vmul.f32 %v2812_v22, %v3391_v8  ;;  %v576_v32 = vadd.f32 %v3404_v19, %v515_v24  ;;  %v577_v33 = vadd.f32 %v3404_v19, %v516_v25  ;;  %v522_v38 = vmul.f32 %v2813_v23, %v3391_v8  ;;  %v403_v22 = vld [vmem:[%s3386_s30 + $0x24] sm:$0xff]  }
  0x18   : > { %v578_v34 = vadd.f32 %v3404_v19, %v517_v26  ;;  %v573_v35 = vadd.f32 %v3404_v19, %v512_v27  ;;  %v574_v36 = vadd.f32 %v3404_v19, %v513_v28  ;;  %v575_v37 = vadd.f32 %v3404_v19, %v514_v29  ;;  %v405_v27 = vld [vmem:[%s3386_s30 + $0x2c] sm:$0x1] }
  0x19   : > { %v523_v39 = vmul.f32 %v3391_v8, %v456_v30  ;;  %vm630_vm4 = vcmp.gt.f32.partialorder %v576_v32, 0.0  ;;  %vm631_vm5 = vcmp.gt.f32.partialorder %v577_v33, 0.0  ;;  %v684_v40 = vmul.f32 0.01, %v576_v32  ;;  %v3466_v28 = vld [vmem:[%s3386_s30 + $0x48] sm:$0xff]  }
  0x1a   : > { %vm632_vm6 = vcmp.gt.f32.partialorder %v578_v34, 0.0  ;;  %v685_v41 = vmul.f32 0.01, %v577_v33  ;;  %v686_v42 = vmul.f32 0.01, %v578_v34  ;;  %vm627_vm7 = vcmp.gt.f32.partialorder %v573_v35, 0.0 }
  0x1b   : > { %vm628_vm8 = vcmp.gt.f32.partialorder %v574_v36, 0.0  ;;  %v738_v43 = vsel %vm630_vm4, %v576_v32, %v684_v40  ;;  %vm629_vm9 = vcmp.gt.f32.partialorder %v575_v37, 0.0  ;;  %v681_v44 = vmul.f32 0.01, %v573_v35 }
  0x1c   : > { %v682_v45 = vmul.f32 0.01, %v574_v36  ;;  %v3421_v46 = vsel %vm631_vm5, %v577_v33, %v685_v41  ;;  %v740_v47 = vsel %vm632_vm6, %v578_v34, %v686_v42  ;;  %v3425_v48 = vsel %vm863_vm0, %v738_v43, 0.0 }
  0x1d   : > { %v683_v49 = vmul.f32 0.01, %v575_v37  ;;  %v985_v50 = vsel %vm922_vm1, %v740_v47, 0.0  ;;  %v1090_v51 = vrot.slane %v3425_v48, 1  ;;  %v1091_v52 = vrot.slane %v3421_v46, 1 }
  0x1e   : > { %v735_v53 = vsel %vm627_vm7, %v573_v35, %v681_v44  ;;  %v1093_v54 = vrot.slane %v985_v50, 1  ;;  %v3431_v55 = vsel %vm628_vm8, %v574_v36, %v682_v45  ;;  %v1171_v0 = vrot.slane %v3425_v48, 2 }
  0x1f   : > { %v737_v56 = vsel %vm629_vm9, %v575_v37, %v683_v49  ;;  %v3435_v57 = vsel %vm863_vm0, %v735_v53, 0.0  ;;  %v1092_v58 = vsel %vm1079_vm2, %v1090_v51, %v1091_v52  ;;  %v1086_v61 = vrot.slane %v3431_v55, 1 }
  0x20   : > { %v982_v59 = vsel %vm922_vm1, %v737_v56, 0.0  ;;  %v1085_v60 = vrot.slane %v3435_v57, 1  ;;  %v1094_v62 = vsel %vm1079_vm2, %v1091_v52, %v1093_v54  ;;  %v1172_v1 = vrot.slane %v3421_v46, 2 }
  0x21   : > { %v1088_v63 = vrot.slane %v982_v59, 1  ;;  %v3113_v2 = vpack.i.bf16 %v1094_v62, %v1092_v58  ;;  %v1174_v9 = vrot.slane %v985_v50, 2  ;;  %v1166_v10 = vrot.slane %v3435_v57, 2 }
  0x22   : > { %v1087_v3 = vsel %vm1079_vm2, %v1085_v60, %v1086_v61  ;;  %v1173_v14 = vsel %vm1160_vm3, %v1171_v0, %v1172_v1  ;;  %v1167_v15 = vrot.slane %v3431_v55, 2  ;;  %v1169_v16 = vrot.slane %v982_v59, 2 }
  0x23   : > { %v1089_v13 = vsel %vm1079_vm2, %v1086_v61, %v1088_v63  ;;  %3114 = vrot.lane.b32.xlu1 %v3113_v2, %s3311_s26  ;;  %v1175_v18 = vsel %vm1160_vm3, %v1172_v1, %v1174_v9  ;;  %v582_v20 = vadd.f32 %v3404_v19, %v521_v31  ;;  %v583_v21 = vadd.f32 %v3404_v19, %v522_v38 }
  0x24   : > { %v3108_v17 = vpack.i.bf16 %v1089_v13, %v1087_v3  ;;  %v3123_v23 = vpack.i.bf16 %v1175_v18, %v1173_v14  ;;  %v1168_v24 = vsel %vm1160_vm3, %v1166_v10, %v1167_v15  ;;  %v1170_v25 = vsel %vm1160_vm3, %v1167_v15, %v1169_v16  ;;  %v414_v3 = vld [vmem:[%s3386_s30 + $0x50] sm:$0x1] }
  0x25   : > { %v584_v26 = vadd.f32 %v3404_v19, %v523_v39  ;;  %v3118_v29 = vpack.i.bf16 %v1170_v25, %v1168_v24  ;;  %vm636_vm10 = vcmp.gt.f32.partialorder %v582_v20, 0.0  ;;  %vm637_vm11 = vcmp.gt.f32.partialorder %v583_v21, 0.0 }
  0x26   : > { %3109 = vrot.lane.b32.xlu0 %v3108_v17, %s3311_s26  ;;  %v690_v30 = vmul.f32 0.01, %v582_v20  ;;  %v691_v31 = vmul.f32 0.01, %v583_v21  ;;  %v451_v33 = vunpack.c.l.bf16 %v403_v22  ;;  %v452_v35 = vunpack.c.h.bf16 %v403_v22  ;;  %v409_v17 = vld [vmem:[%s3386_s30 + $0x3c] sm:$0xff]  }
  0x27   : > { %vm638_vm12 = vcmp.gt.f32.partialorder %v584_v26, 0.0  ;;  %v692_v32 = vmul.f32 0.01, %v584_v26  ;;  %3124 = vrot.lane.b32.xlu1 %v3123_v23, %s3310_s25  ;;  %v453_v36 = vunpack.c.l.bf16 %v405_v27  ;;  %v2816_v37 = vunpack.c.l.bf16 %v3466_v28 }
  0x28   : > { %v744_v34 = vsel %vm636_vm10, %v582_v20, %v690_v30  ;;  %v3473_v38 = vsel %vm637_vm11, %v583_v21, %v691_v31  ;;  %v518_v41 = vmul.f32 %v3391_v8, %v451_v33  ;;  %v519_v45 = vmul.f32 %v3391_v8, %v452_v35  ;;  %v411_v30 = vld [vmem:[%s3386_s30 + $0x44] sm:$0x1] }
  0x29   : > { %v746_v39 = vsel %vm638_vm12, %v584_v26, %v692_v32  ;;  %v3477_v40 = vsel %vm863_vm0, %v744_v34, 0.0  ;;  %v1101_v44 = vrot.slane %v3473_v38, 1  ;;  %v520_v49 = vmul.f32 %v3391_v8, %v453_v36 }
  0x2a   : > { %3119 = vrot.lane.b32.xlu0 %v3118_v29, %s3310_s25  ;;  %v991_v42 = vsel %vm922_vm1, %v746_v39, 0.0  ;;  %v1100_v43 = vrot.slane %v3477_v40, 1  ;;  %v579_v50 = vadd.f32 %v3404_v19, %v518_v41  ;;  %v1181_v51 = vrot.slane %v3477_v40, 2  ;;  %v3525_v41 = vld [vmem:[%s3386_s30 + $0x60] sm:$0xff]  }
  0x2b   : > { %v1103_v47 = vrot.slane %v991_v42, 1  ;;  %v580_v53 = vadd.f32 %v3404_v19, %v519_v45  ;;  %v1182_v54 = vrot.slane %v3473_v38, 2  ;;  %v1184_v56 = vrot.slane %v991_v42, 2 }
  0x2c   : > { %v1102_v52 = vsel %vm1079_vm2, %v1100_v43, %v1101_v44  ;;  %v581_v59 = vadd.f32 %v3404_v19, %v520_v49  ;;  %vm633_vm13 = vcmp.gt.f32.partialorder %v579_v50, 0.0  ;;  %v687_v60 = vmul.f32 0.01, %v579_v50 }
  0x2d   : > { %v1104_v58 = vsel %vm1079_vm2, %v1101_v44, %v1103_v47  ;;  %vm634_vm14 = vcmp.gt.f32.partialorder %v580_v53, 0.0  ;;  %v688_v62 = vmul.f32 0.01, %v580_v53  ;;  %v1183_v63 = vsel %vm1160_vm3, %v1181_v51, %v1182_v54 }
  0x2e   : > { %v3133_v61 = vpack.i.bf16 %v1104_v58, %v1102_v52  ;;  %vm635_vm15 = vcmp.gt.f32.partialorder %v581_v59, 0.0  ;;  %v689_v0 = vmul.f32 0.01, %v581_v59  ;;  %v741_v1 = vsel %vm633_vm13, %v579_v50, %v687_v60 }
  0x2f   : > { %v1185_v2 = vsel %vm1160_vm3, %v1182_v54, %v1184_v56  ;;  %v3498_v9 = vsel %vm634_vm14, %v580_v53, %v688_v62  ;;  %v3502_v10 = vsel %vm863_vm0, %v741_v1, 0.0  ;;  %v2817_v12 = vunpack.c.h.bf16 %v3466_v28 }
  0x30   : > { %3134 = vrot.lane.b32.xlu1 %v3133_v61, %s3311_s26  ;;  %v3143_v11 = vpack.i.bf16 %v1185_v2, %v1183_v63  ;;  %v743_v13 = vsel %vm635_vm15, %v581_v59, %v689_v0  ;;  %v1095_v14 = vrot.slane %v3502_v10, 1  ;;  %v1096_v15 = vrot.slane %v3498_v9, 1 }
  0x31   : > { %v1176_v16 = vrot.slane %v3502_v10, 2  ;;  %v988_v18 = vsel %vm922_vm1, %v743_v13, 0.0  ;;  %v1177_v20 = vrot.slane %v3498_v9, 2  ;;  %v462_v21 = vunpack.c.l.bf16 %v414_v3 }
  0x32   : > { %v527_v22 = vmul.f32 %v2816_v37, %v3391_v8  ;;  %v1097_v23 = vsel %vm1079_vm2, %v1095_v14, %v1096_v15  ;;  %v1098_v24 = vrot.slane %v988_v18, 1  ;;  %v1179_v25 = vrot.slane %v988_v18, 2 }
  0x33   : > { %v528_v26 = vmul.f32 %v2817_v12, %v3391_v8  ;;  %v1178_v27 = vsel %vm1160_vm3, %v1176_v16, %v1177_v20  ;;  %v529_v28 = vmul.f32 %v3391_v8, %v462_v21  ;;  %v457_v31 = vunpack.c.l.bf16 %v409_v17 }
  0x34   : > { %3144 = vrot.lane.b32.xlu1 %v3143_v11, %s3310_s25  ;;  %v588_v29 = vadd.f32 %v3404_v19, %v527_v22  ;;  %v1099_v32 = vsel %vm1079_vm2, %v1096_v15, %v1098_v24  ;;  %v1180_v33 = vsel %vm1160_vm3, %v1177_v20, %v1179_v25  ;;  %v458_v35 = vunpack.c.h.bf16 %v409_v17  ;;  %v420_v25 = vld [vmem:[%s3386_s30 + $0x68] sm:$0x1] }
  0x35   : > { %v589_v34 = vadd.f32 %v3404_v19, %v528_v26  ;;  %v3128_v36 = vpack.i.bf16 %v1099_v32, %v1097_v23  ;;  %v3138_v37 = vpack.i.bf16 %v1180_v33, %v1178_v27  ;;  %v590_v39 = vadd.f32 %v3404_v19, %v529_v28 }
  0x36   : > { %vm642_vm4 = vcmp.gt.f32.partialorder %v588_v29, 0.0  ;;  %v696_v42 = vmul.f32 0.01, %v588_v29  ;;  %v459_v44 = vunpack.c.l.bf16 %v411_v30  ;;  %v524_v47 = vmul.f32 %v3391_v8, %v457_v31  ;;  %v415_v30 = vld [vmem:[%s3386_s30 + $0x54] sm:$0xff]  }
  0x37   : > { %vm643_vm5 = vcmp.gt.f32.partialorder %v589_v34, 0.0  ;;  %v697_v43 = vmul.f32 0.01, %v589_v34  ;;  %3129 = vrot.lane.b32.xlu0 %v3128_v36, %s3311_s26  ;;  %vm644_vm6 = vcmp.gt.f32.partialorder %v590_v39, 0.0  ;;  %v698_v45 = vmul.f32 0.01, %v590_v39 }
  0x38   : > { %v525_v49 = vmul.f32 %v3391_v8, %v458_v35  ;;  %v750_v50 = vsel %vm642_vm4, %v588_v29, %v696_v42  ;;  %v526_v52 = vmul.f32 %v3391_v8, %v459_v44  ;;  %v2820_v53 = vunpack.c.l.bf16 %v3525_v41  ;;  %v417_v42 = vld [vmem:[%s3386_s30 + $0x5c] sm:$0x1] }
  0x39   : > { %v3530_v51 = vsel %vm643_vm5, %v589_v34, %v697_v43  ;;  %v752_v54 = vsel %vm644_vm6, %v590_v39, %v698_v45  ;;  %v3536_v56 = vsel %vm863_vm0, %v750_v50, 0.0  ;;  %v585_v59 = vadd.f32 %v3404_v19, %v524_v47 }
  0x3a   : > { %v1111_v58 = vrot.slane %v3530_v51, 1  ;;  %v997_v60 = vsel %vm922_vm1, %v752_v54, 0.0  ;;  %v1110_v61 = vrot.slane %v3536_v56, 1  ;;  %v586_v62 = vadd.f32 %v3404_v19, %v525_v49  ;;  %v3575_v49 = vld [vmem:[%s3386_s30 + $0x78] sm:$0xff]  }
  0x3b   : > { %v587_v63 = vadd.f32 %v3404_v19, %v526_v52  ;;  %3139 = vrot.lane.b32.xlu0 %v3138_v37, %s3310_s25  ;;  %v1113_v0 = vrot.slane %v997_v60, 1  ;;  %vm639_vm7 = vcmp.gt.f32.partialorder %v585_v59, 0.0  ;;  %v693_v1 = vmul.f32 0.01, %v585_v59 }
  0x3c   : > { %v1191_v2 = vrot.slane %v3536_v56, 2  ;;  %v1112_v3 = vsel %vm1079_vm2, %v1110_v61, %v1111_v58  ;;  %vm640_vm8 = vcmp.gt.f32.partialorder %v586_v62, 0.0  ;;  %v694_v11 = vmul.f32 0.01, %v586_v62 }
  0x3d   : > { %vm641_vm9 = vcmp.gt.f32.partialorder %v587_v63, 0.0  ;;  %v1114_v12 = vsel %vm1079_vm2, %v1111_v58, %v1113_v0  ;;  %v695_v13 = vmul.f32 0.01, %v587_v63  ;;  %v747_v14 = vsel %vm639_vm7, %v585_v59, %v693_v1 }
  0x3e   : > { %v1192_v15 = vrot.slane %v3530_v51, 2  ;;  %v3153_v16 = vpack.i.bf16 %v1114_v12, %v1112_v3  ;;  %v3550_v17 = vsel %vm640_vm8, %v586_v62, %v694_v11  ;;  %v3554_v18 = vsel %vm863_vm0, %v747_v14, 0.0 }
  0x3f   : > { %v1194_v20 = vrot.slane %v997_v60, 2  ;;  %v749_v21 = vsel %vm641_vm9, %v587_v63, %v695_v13  ;;  %v1105_v22 = vrot.slane %v3554_v18, 1  ;;  %v1106_v23 = vrot.slane %v3550_v17, 1 }
  0x40   : > { %v1193_v24 = vsel %vm1160_vm3, %v1191_v2, %v1192_v15  ;;  %3154 = vrot.lane.b32.xlu1 %v3153_v16, %s3311_s26  ;;  %v994_v26 = vsel %vm922_vm1, %v749_v21, 0.0  ;;  %v1186_v28 = vrot.slane %v3554_v18, 2  ;;  %v1187_v29 = vrot.slane %v3550_v17, 2 }
  0x41   : > { %v1195_v27 = vsel %vm1160_vm3, %v1192_v15, %v1194_v20  ;;  %v1107_v31 = vsel %vm1079_vm2, %v1105_v22, %v1106_v23  ;;  %v1108_v32 = vrot.slane %v994_v26, 1  ;;  %v1189_v34 = vrot.slane %v994_v26, 2 }
  0x42   : > { %v3163_v33 = vpack.i.bf16 %v1195_v27, %v1193_v24  ;;  %v1188_v35 = vsel %vm1160_vm3, %v1186_v28, %v1187_v29  ;;  %v2821_v36 = vunpack.c.h.bf16 %v3525_v41  ;;  %v468_v37 = vunpack.c.l.bf16 %v420_v25 }
  0x43   : > { %v533_v39 = vmul.f32 %v2820_v53, %v3391_v8  ;;  %v1109_v43 = vsel %vm1079_vm2, %v1106_v23, %v1108_v32  ;;  %v1190_v44 = vsel %vm1160_vm3, %v1187_v29, %v1189_v34  ;;  %v463_v45 = vunpack.c.l.bf16 %v415_v30 }
  0x44   : > { %v464_v47 = vunpack.c.h.bf16 %v415_v30  ;;  %v3148_v50 = vpack.i.bf16 %v1109_v43, %v1107_v31  ;;  %3164 = vrot.lane.b32.xlu1 %v3163_v33, %s3310_s25  ;;  %v3158_v52 = vpack.i.bf16 %v1190_v44, %v1188_v35  ;;  %v534_v54 = vmul.f32 %v2821_v36, %v3391_v8 }
  0x45   : > { %v535_v41 = vmul.f32 %v3391_v8, %v468_v37  ;;  %v594_v58 = vadd.f32 %v3404_v19, %v533_v39  ;;  %v465_v53 = vunpack.c.l.bf16 %v417_v42  ;;  %v530_v59 = vmul.f32 %v3391_v8, %v463_v45  ;;  %v426_v37 = vld [vmem:[%s3386_s30 + $0x80] sm:$0x1] }
  0x46   : > { %v531_v60 = vmul.f32 %v3391_v8, %v464_v47  ;;  %3149 = vrot.lane.b32.xlu0 %v3148_v50, %s3311_s26  ;;  %v595_v61 = vadd.f32 %v3404_v19, %v534_v54  ;;  %v2824_v63 = vunpack.c.l.bf16 %v3575_v49  ;;  %v2825_v0 = vunpack.c.h.bf16 %v3575_v49 }
  0x47   : > { %v596_v62 = vadd.f32 %v3404_v19, %v535_v41  ;;  %vm648_vm10 = vcmp.gt.f32.partialorder %v594_v58, 0.0  ;;  %v702_v1 = vmul.f32 0.01, %v594_v58  ;;  %v532_v2 = vmul.f32 %v3391_v8, %v465_v53 }
  0x48   : > { %v591_v3 = vadd.f32 %v3404_v19, %v530_v59  ;;  %vm649_vm11 = vcmp.gt.f32.partialorder %v595_v61, 0.0  ;;  %v703_v11 = vmul.f32 0.01, %v595_v61  ;;  %v592_v14 = vadd.f32 %v3404_v19, %v531_v60 }
  0x49   : > { %vm650_vm12 = vcmp.gt.f32.partialorder %v596_v62, 0.0  ;;  %v704_v12 = vmul.f32 0.01, %v596_v62  ;;  %v756_v13 = vsel %vm648_vm10, %v594_v58, %v702_v1  ;;  %v593_v15 = vadd.f32 %v3404_v19, %v532_v2  ;;  %v423_v1 = vld [vmem:[%s3386_s30 + $0x74] sm:$0x1] }
  0x4a   : > { %vm645_vm13 = vcmp.gt.f32.partialorder %v591_v3, 0.0  ;;  %3159 = vrot.lane.b32.xlu0 %v3158_v52, %s3310_s25  ;;  %v3593_v16 = vsel %vm649_vm11, %v595_v61, %v703_v11  ;;  %v3597_v21 = vsel %vm863_vm0, %v756_v13, 0.0  ;;  %v699_v22 = vmul.f32 0.01, %v591_v3  ;;  %v3630_v2 = vld [vmem:[%s3386_s30 + $0x90] sm:$0xff]  }
  0x4b   : > { %v758_v20 = vsel %vm650_vm12, %v596_v62, %v704_v12  ;;  %v1120_v24 = vrot.slane %v3597_v21, 1  ;;  %v1121_v25 = vrot.slane %v3593_v16, 1  ;;  %vm646_vm14 = vcmp.gt.f32.partialorder %v592_v14, 0.0  ;;  %v421_v62 = vld [vmem:[%s3386_s30 + $0x6c] sm:$0xff]  }
  0x4c   : > { %v1003_v23 = vsel %vm922_vm1, %v758_v20, 0.0  ;;  %vm647_vm15 = vcmp.gt.f32.partialorder %v593_v15, 0.0  ;;  %v700_v27 = vmul.f32 0.01, %v592_v14  ;;  %v701_v28 = vmul.f32 0.01, %v593_v15 }
  0x4d   : > { %v1123_v26 = vrot.slane %v1003_v23, 1  ;;  %v1122_v29 = vsel %vm1079_vm2, %v1120_v24, %v1121_v25  ;;  %v753_v30 = vsel %vm645_vm13, %v591_v3, %v699_v22  ;;  %v1201_v31 = vrot.slane %v3597_v21, 2 }
  0x4e   : > { %v1202_v32 = vrot.slane %v3593_v16, 2  ;;  %v3607_v34 = vsel %vm646_vm14, %v592_v14, %v700_v27  ;;  %v755_v35 = vsel %vm647_vm15, %v593_v15, %v701_v28  ;;  %v3611_v36 = vsel %vm863_vm0, %v753_v30, 0.0 }
  0x4f   : > { %v1124_v33 = vsel %vm1079_vm2, %v1121_v25, %v1123_v26  ;;  %v1000_v42 = vsel %vm922_vm1, %v755_v35, 0.0  ;;  %v1115_v43 = vrot.slane %v3611_v36, 1  ;;  %v1116_v44 = vrot.slane %v3607_v34, 1 }
  0x50   : > { %v3173_v39 = vpack.i.bf16 %v1124_v33, %v1122_v29  ;;  %v1118_v45 = vrot.slane %v1000_v42, 1  ;;  %v1203_v47 = vsel %vm1160_vm3, %v1201_v31, %v1202_v32  ;;  %v1204_v49 = vrot.slane %v1003_v23, 2 }
  0x51   : > { %v1196_v50 = vrot.slane %v3611_v36, 2  ;;  %v1117_v52 = vsel %vm1079_vm2, %v1115_v43, %v1116_v44  ;;  %v1197_v54 = vrot.slane %v3607_v34, 2  ;;  %v1199_v41 = vrot.slane %v1000_v42, 2 }
  0x52   : > { %3174 = vrot.lane.b32.xlu1 %v3173_v39, %s3311_s26  ;;  %v474_v58 = vunpack.c.l.bf16 %v426_v37  ;;  %v1119_v53 = vsel %vm1079_vm2, %v1116_v44, %v1118_v45  ;;  %v1205_v59 = vsel %vm1160_vm3, %v1202_v32, %v1204_v49  ;;  %v539_v60 = vmul.f32 %v2824_v63, %v3391_v8 }
  0x53   : > { %v540_v61 = vmul.f32 %v2825_v0, %v3391_v8  ;;  %v3168_v3 = vpack.i.bf16 %v1119_v53, %v1117_v52  ;;  %v3183_v11 = vpack.i.bf16 %v1205_v59, %v1203_v47  ;;  %v1198_v12 = vsel %vm1160_vm3, %v1196_v50, %v1197_v54 }
  0x54   : > { %v1200_v13 = vsel %vm1160_vm3, %v1197_v54, %v1199_v41  ;;  %v541_v15 = vmul.f32 %v3391_v8, %v474_v58  ;;  %v600_v20 = vadd.f32 %v3404_v19, %v539_v60  ;;  %v469_v63 = vunpack.c.l.bf16 %v421_v62 }
  0x55   : > { %v3178_v14 = vpack.i.bf16 %v1200_v13, %v1198_v12  ;;  %v601_v22 = vadd.f32 %v3404_v19, %v540_v61  ;;  %3169 = vrot.lane.b32.xlu0 %v3168_v3, %s3311_s26  ;;  %v470_v0 = vunpack.c.h.bf16 %v421_v62  ;;  %v471_v23 = vunpack.c.l.bf16 %v423_v1 }
  0x56   : > { %3184 = vrot.lane.b32.xlu1 %v3183_v11, %s3310_s25  ;;  %v2828_v24 = vunpack.c.l.bf16 %v3630_v2  ;;  %v602_v25 = vadd.f32 %v3404_v19, %v541_v15  ;;  %vm654_vm4 = vcmp.gt.f32.partialorder %v600_v20, 0.0  ;;  %v708_v26 = vmul.f32 0.01, %v600_v20 }
  0x57   : > { %vm655_vm5 = vcmp.gt.f32.partialorder %v601_v22, 0.0  ;;  %v709_v27 = vmul.f32 0.01, %v601_v22  ;;  %v536_v28 = vmul.f32 %v3391_v8, %v469_v63  ;;  %v537_v29 = vmul.f32 %v3391_v8, %v470_v0  ;;  %v427_v0 = vld [vmem:[%s3386_s30 + $0x84] sm:$0xff]  }
  0x58   : > { %v538_v30 = vmul.f32 %v3391_v8, %v471_v23  ;;  %vm656_vm6 = vcmp.gt.f32.partialorder %v602_v25, 0.0  ;;  %v710_v31 = vmul.f32 0.01, %v602_v25  ;;  %v762_v32 = vsel %vm654_vm4, %v600_v20, %v708_v26 }
  0x59   : > { %v2829_v33 = vunpack.c.h.bf16 %v3630_v2  ;;  %3179 = vrot.lane.b32.xlu0 %v3178_v14, %s3310_s25  ;;  %v3646_v35 = vsel %vm655_vm5, %v601_v22, %v709_v27  ;;  %v3650_v37 = vsel %vm863_vm0, %v762_v32, 0.0  ;;  %v597_v39 = vadd.f32 %v3404_v19, %v536_v28  ;;  %v432_v14 = vld [vmem:[%s3386_s30 + $0x98] sm:$0x1]  ;;  %v429_v32 = vld [vmem:[%s3386_s30 + $0x8c] sm:$0x1] }
  0x5a   : > { %v598_v42 = vadd.f32 %v3404_v19, %v537_v29  ;;  %v764_v43 = vsel %vm656_vm6, %v602_v25, %v710_v31  ;;  %v1130_v44 = vrot.slane %v3650_v37, 1  ;;  %v1131_v45 = vrot.slane %v3646_v35, 1 }
  0x5b   : > { %v599_v47 = vadd.f32 %v3404_v19, %v538_v30  ;;  %v1009_v49 = vsel %vm922_vm1, %v764_v43, 0.0  ;;  %vm651_vm7 = vcmp.gt.f32.partialorder %v597_v39, 0.0  ;;  %v705_v50 = vmul.f32 0.01, %v597_v39 }
  0x5c   : > { %vm652_vm8 = vcmp.gt.f32.partialorder %v598_v42, 0.0  ;;  %v1132_v52 = vsel %vm1079_vm2, %v1130_v44, %v1131_v45  ;;  %v1133_v54 = vrot.slane %v1009_v49, 1  ;;  %v706_v41 = vmul.f32 0.01, %v598_v42 }
  0x5d   : > { %vm653_vm9 = vcmp.gt.f32.partialorder %v599_v47, 0.0  ;;  %v707_v58 = vmul.f32 0.01, %v599_v47  ;;  %v759_v53 = vsel %vm651_vm7, %v597_v39, %v705_v50  ;;  %v1211_v59 = vrot.slane %v3650_v37, 2 }
  0x5e   : > { %v1212_v60 = vrot.slane %v3646_v35, 2  ;;  %v1134_v61 = vsel %vm1079_vm2, %v1131_v45, %v1133_v54  ;;  %v3663_v62 = vsel %vm652_vm8, %v598_v42, %v706_v41  ;;  %v3667_v1 = vsel %vm863_vm0, %v759_v53, 0.0 }
  0x5f   : > { %v1214_v2 = vrot.slane %v1009_v49, 2  ;;  %v3193_v3 = vpack.i.bf16 %v1134_v61, %v1132_v52  ;;  %v761_v11 = vsel %vm653_vm9, %v599_v47, %v707_v58  ;;  %v1125_v12 = vrot.slane %v3667_v1, 1 }
  0x60   : > { %v1126_v13 = vrot.slane %v3663_v62, 1  ;;  %v1006_v15 = vsel %vm922_vm1, %v761_v11, 0.0  ;;  %v1213_v20 = vsel %vm1160_vm3, %v1211_v59, %v1212_v60  ;;  %v1206_v63 = vrot.slane %v3667_v1, 2 }
  0x61   : > { %v1215_v22 = vsel %vm1160_vm3, %v1212_v60, %v1214_v2  ;;  %3194 = vrot.lane.b32.xlu1 %v3193_v3, %s3311_s26  ;;  %v1128_v25 = vrot.slane %v1006_v15, 1  ;;  %v1207_v27 = vrot.slane %v3663_v62, 2  ;;  %v1209_v28 = vrot.slane %v1006_v15, 2 }
  0x62   : > { %v1127_v23 = vsel %vm1079_vm2, %v1125_v12, %v1126_v13  ;;  %v3203_v26 = vpack.i.bf16 %v1215_v22, %v1213_v20  ;;  %v480_v29 = vunpack.c.l.bf16 %v432_v14  ;;  %v545_v30 = vmul.f32 %v2828_v24, %v3391_v8 }
  0x63   : > { %v546_v31 = vmul.f32 %v2829_v33, %v3391_v8  ;;  %v1129_v39 = vsel %vm1079_vm2, %v1126_v13, %v1128_v25  ;;  %v1208_v42 = vsel %vm1160_vm3, %v1206_v63, %v1207_v27  ;;  %v475_v43 = vunpack.c.l.bf16 %v427_v0 }
  0x64   : > { %v476_v44 = vunpack.c.h.bf16 %v427_v0  ;;  %v3188_v45 = vpack.i.bf16 %v1129_v39, %v1127_v23  ;;  %v1210_v47 = vsel %vm1160_vm3, %v1207_v27, %v1209_v28  ;;  %v547_v49 = vmul.f32 %v3391_v8, %v480_v29 }
  0x65   : > { %v606_v50 = vadd.f32 %v3404_v19, %v545_v30  ;;  %3204 = vrot.lane.b32.xlu1 %v3203_v26, %s3310_s25  ;;  %v3198_v52 = vpack.i.bf16 %v1210_v47, %v1208_v42  ;;  %v607_v24 = vadd.f32 %v3404_v19, %v546_v31  ;;  %v477_v33 = vunpack.c.l.bf16 %v429_v32 }
  0x66   : > { %v542_v54 = vmul.f32 %v3391_v8, %v475_v43  ;;  %3189 = vrot.lane.b32.xlu0 %v3188_v45, %s3311_s26  ;;  %v608_v41 = vadd.f32 %v3404_v19, %v547_v49  ;;  %v543_v53 = vmul.f32 %v3391_v8, %v476_v44  ;;  %v2844_v45 = vld [vmem:[%s3386_s30 + $0xa8] sm:$0xff]  }
  0x67   : > { %vm660_vm10 = vcmp.gt.f32.partialorder %v606_v50, 0.0  ;;  %v714_v58 = vmul.f32 0.01, %v606_v50  ;;  %vm661_vm11 = vcmp.gt.f32.partialorder %v607_v24, 0.0  ;;  %v715_v59 = vmul.f32 0.01, %v607_v24 }
  0x68   : > { %v544_v60 = vmul.f32 %v3391_v8, %v477_v33  ;;  %v603_v61 = vadd.f32 %v3404_v19, %v542_v54  ;;  %vm662_vm12 = vcmp.gt.f32.partialorder %v608_v41, 0.0  ;;  %v716_v2 = vmul.f32 0.01, %v608_v41 }
  0x69   : > { %v768_v3 = vsel %vm660_vm10, %v606_v50, %v714_v58  ;;  %v604_v11 = vadd.f32 %v3404_v19, %v543_v53  ;;  %v3698_v12 = vsel %vm661_vm11, %v607_v24, %v715_v59  ;;  %v438_v24 = vld [vmem:[%s3386_s30 + $0xb0] sm:$0x1]  ;;  %v433_v53 = vld [vmem:[%s3386_s30 + $0x9c] sm:$0xff]  }
  0x6a   : > { %v3702_v13 = vsel %vm863_vm0, %v768_v3, 0.0  ;;  %v605_v14 = vadd.f32 %v3404_v19, %v544_v60  ;;  %vm657_vm13 = vcmp.gt.f32.partialorder %v603_v61, 0.0  ;;  %3199 = vrot.lane.b32.xlu0 %v3198_v52, %s3310_s25  ;;  %v770_v15 = vsel %vm662_vm12, %v608_v41, %v716_v2 }
  0x6b   : > { %v1140_v20 = vrot.slane %v3702_v13, 1  ;;  %v1141_v22 = vrot.slane %v3698_v12, 1  ;;  %vm658_vm14 = vcmp.gt.f32.partialorder %v604_v11, 0.0  ;;  %v1015_v63 = vsel %vm922_vm1, %v770_v15, 0.0 }
  0x6c   : > { %vm659_vm15 = vcmp.gt.f32.partialorder %v605_v14, 0.0  ;;  %v711_v0 = vmul.f32 0.01, %v603_v61  ;;  %v712_v23 = vmul.f32 0.01, %v604_v11  ;;  %v1143_v26 = vrot.slane %v1015_v63, 1 }
  0x6d   : > { %v1142_v25 = vsel %vm1079_vm2, %v1140_v20, %v1141_v22  ;;  %v713_v27 = vmul.f32 0.01, %v605_v14  ;;  %v1221_v28 = vrot.slane %v3702_v13, 2  ;;  %v1222_v31 = vrot.slane %v3698_v12, 2  ;;  %v435_v20 = vld [vmem:[%s3386_s30 + $0xa4] sm:$0x1] }
  0x6e   : > { %v765_v29 = vsel %vm657_vm13, %v603_v61, %v711_v0  ;;  %v3712_v30 = vsel %vm658_vm14, %v604_v11, %v712_v23  ;;  %v1224_v32 = vrot.slane %v1015_v63, 2  ;;  %v1144_v39 = vsel %vm1079_vm2, %v1141_v22, %v1143_v26  ;;  %v3737_v22 = vld [vmem:[%s3386_s30 + $0xb4] sm:$0xff]  }
  0x6f   : > { %v767_v42 = vsel %vm659_vm15, %v605_v14, %v713_v27  ;;  %v3718_v43 = vsel %vm863_vm0, %v765_v29, 0.0  ;;  %v1136_v44 = vrot.slane %v3712_v30, 1  ;;  %v3213_v47 = vpack.i.bf16 %v1144_v39, %v1142_v25 }
  0x70   : > { %v1012_v49 = vsel %vm922_vm1, %v767_v42, 0.0  ;;  %v1135_v50 = vrot.slane %v3718_v43, 1  ;;  %v1223_v52 = vsel %vm1160_vm3, %v1221_v28, %v1222_v31  ;;  %v1225_v54 = vsel %vm1160_vm3, %v1222_v31, %v1224_v32 }
  0x71   : > { %v1138_v33 = vrot.slane %v1012_v49, 1  ;;  %v1216_v41 = vrot.slane %v3718_v43, 2  ;;  %v1217_v58 = vrot.slane %v3712_v30, 2  ;;  %3214 = vrot.lane.b32.xlu1 %v3213_v47, %s3311_s26  ;;  %v3223_v60 = vpack.i.bf16 %v1225_v54, %v1223_v52 }
  0x72   : > { %v1137_v59 = vsel %vm1079_vm2, %v1135_v50, %v1136_v44  ;;  %v1219_v61 = vrot.slane %v1012_v49, 2  ;;  %v2832_v2 = vunpack.c.l.bf16 %v2844_v45  ;;  %v2833_v14 = vunpack.c.h.bf16 %v2844_v45 }
  0x73   : > { %v1139_v3 = vsel %vm1079_vm2, %v1136_v44, %v1138_v33  ;;  %v1218_v11 = vsel %vm1160_vm3, %v1216_v41, %v1217_v58  ;;  %v486_v15 = vunpack.c.l.bf16 %v438_v24  ;;  %v481_v25 = vunpack.c.l.bf16 %v433_v53 }
  0x74   : > { %v3208_v63 = vpack.i.bf16 %v1139_v3, %v1137_v59  ;;  %v1220_v0 = vsel %vm1160_vm3, %v1217_v58, %v1219_v61  ;;  %v551_v23 = vmul.f32 %v2832_v2, %v3391_v8  ;;  %v552_v27 = vmul.f32 %v2833_v14, %v3391_v8 }
  0x75   : > { %v3218_v26 = vpack.i.bf16 %v1220_v0, %v1218_v11  ;;  %v553_v28 = vmul.f32 %v3391_v8, %v486_v15  ;;  %v482_v29 = vunpack.c.h.bf16 %v433_v53  ;;  %3224 = vrot.lane.b32.xlu1 %v3223_v60, %s3310_s25  ;;  %v483_v32 = vunpack.c.l.bf16 %v435_v20 }
  0x76   : > { %3209 = vrot.lane.b32.xlu0 %v3208_v63, %s3311_s26  ;;  %v612_v31 = vadd.f32 %v3404_v19, %v551_v23  ;;  %v548_v39 = vmul.f32 %v3391_v8, %v481_v25  ;;  %v487_v42 = vunpack.c.l.bf16 %v3737_v22  ;;  %v613_v44 = vadd.f32 %v3404_v19, %v552_v27 }
  0x77   : > { %v614_v45 = vadd.f32 %v3404_v19, %v553_v28  ;;  %v549_v47 = vmul.f32 %v3391_v8, %v482_v29  ;;  %v488_v49 = vunpack.c.h.bf16 %v3737_v22  ;;  %v550_v52 = vmul.f32 %v3391_v8, %v483_v32  ;;  %v441_v29 = vld [vmem:[%s3386_s30 + $0xbc] sm:$0x1] }
  0x78   : > { %vm666_vm4 = vcmp.gt.f32.partialorder %v612_v31, 0.0  ;;  %v720_v50 = vmul.f32 0.01, %v612_v31  ;;  %v609_v24 = vadd.f32 %v3404_v19, %v548_v39  ;;  %vm667_vm5 = vcmp.gt.f32.partialorder %v613_v44, 0.0 }
  0x79   : > { %vm668_vm6 = vcmp.gt.f32.partialorder %v614_v45, 0.0  ;;  %v721_v33 = vmul.f32 0.01, %v613_v44  ;;  %v722_v54 = vmul.f32 0.01, %v614_v45  ;;  %v610_v58 = vadd.f32 %v3404_v19, %v549_v47 }
  0x7a   : > { %3219 = vrot.lane.b32.xlu0 %v3218_v26, %s3310_s25  ;;  %v774_v41 = vsel %vm666_vm4, %v612_v31, %v720_v50  ;;  %v611_v53 = vadd.f32 %v3404_v19, %v550_v52  ;;  %vm663_vm7 = vcmp.gt.f32.partialorder %v609_v24, 0.0  ;;  %v717_v61 = vmul.f32 0.01, %v609_v24 }
  0x7b   : > { %v3757_v59 = vsel %vm667_vm5, %v613_v44, %v721_v33  ;;  %v776_v60 = vsel %vm668_vm6, %v614_v45, %v722_v54  ;;  %v3761_v8 = vsel %vm863_vm0, %v774_v41, 0.0  ;;  %vm664_vm8 = vcmp.gt.f32.partialorder %v610_v58, 0.0 }
  0x7c   : > { %v1021_v2 = vsel %vm922_vm1, %v776_v60, 0.0  ;;  %v1150_v3 = vrot.slane %v3761_v8, 1  ;;  %v1151_v11 = vrot.slane %v3757_v59, 1  ;;  %vm665_vm9 = vcmp.gt.f32.partialorder %v611_v53, 0.0  ;;  %v3281_v60 = vld [vmem:[%s4251_s2] ss:$0 sm:$0xff] }
  0x7d   : > { %v1153_v14 = vrot.slane %v1021_v2, 1  ;;  %v718_v15 = vmul.f32 0.01, %v610_v58  ;;  %v719_v20 = vmul.f32 0.01, %v611_v53  ;;  %v771_v63 = vsel %vm663_vm7, %v609_v24, %v717_v61 }
  0x7e   : > { %v1152_v22 = vsel %vm1079_vm2, %v1150_v3, %v1151_v11  ;;  %v1231_v0 = vrot.slane %v3761_v8, 2  ;;  %v1232_v23 = vrot.slane %v3757_v59, 2  ;;  %v3777_v28 = vsel %vm863_vm0, %v771_v63, 0.0  ;;  %v2835_v3 = vld [vmem:[%s371_s18] sm:$0xff]  }
  0x7f   : > { %v1154_v25 = vsel %vm1079_vm2, %v1151_v11, %v1153_v14  ;;  %v3773_v26 = vsel %vm664_vm8, %v610_v58, %v718_v15  ;;  %v773_v27 = vsel %vm665_vm9, %v611_v53, %v719_v20  ;;  %v1145_v39 = vrot.slane %v3777_v28, 1  ;;  %v492_v11 = vld [vmem:[%s371_s18 + $0x8] sm:$0x1] }
  0x80   : > { %v3233_v31 = vpack.i.bf16 %v1154_v25, %v1152_v22  ;;  %v1018_v32 = vsel %vm922_vm1, %v773_v27, 0.0  ;;  %v1146_v44 = vrot.slane %v3773_v26, 1  ;;  %v1233_v47 = vsel %vm1160_vm3, %v1231_v0, %v1232_v23 }
  0x81   : > { %v1148_v45 = vrot.slane %v1018_v32, 1  ;;  %v1234_v50 = vrot.slane %v1021_v2, 2  ;;  %v1226_v52 = vrot.slane %v3777_v28, 2  ;;  %v1227_v33 = vrot.slane %v3773_v26, 2 }
  0x82   : > { %3234 = vrot.lane.b32.xlu1 %v3233_v31, %s3311_s26  ;;  %v1147_v24 = vsel %vm1079_vm2, %v1145_v39, %v1146_v44  ;;  %v1229_v54 = vrot.slane %v1018_v32, 2  ;;  %v489_v41 = vunpack.c.l.bf16 %v441_v29  ;;  %v554_v61 = vmul.f32 %v3281_v60, %v487_v42  ;;  %v3282_v29 = vld [vmem:[%s4252_s3] ss:$0 sm:$0xff] }
  0x83   : > { %v1149_v58 = vsel %vm1079_vm2, %v1146_v44, %v1148_v45  ;;  %v1235_v53 = vsel %vm1160_vm3, %v1232_v23, %v1234_v50  ;;  %v555_v2 = vmul.f32 %v3281_v60, %v488_v49  ;;  %v1228_v20 = vsel %vm1160_vm3, %v1226_v52, %v1227_v33 }
  0x84   : > { %v3228_v14 = vpack.i.bf16 %v1149_v58, %v1147_v24  ;;  %v3243_v15 = vpack.i.bf16 %v1235_v53, %v1233_v47  ;;  %v1230_v22 = vsel %vm1160_vm3, %v1227_v33, %v1229_v54  ;;  %v556_v63 = vmul.f32 %v3281_v60, %v489_v41 }
  0x85   : > { %v615_v0 = vadd.f32 %v3404_v19, %v554_v61  ;;  %v616_v25 = vadd.f32 %v3404_v19, %v555_v2  ;;  %v3238_v23 = vpack.i.bf16 %v1230_v22, %v1228_v20  ;;  %v2836_v42 = vunpack.c.l.bf16 %v2835_v3 }
  0x86   : > { %3229 = vrot.lane.b32.xlu0 %v3228_v14, %s3311_s26  ;;  %3244 = vrot.lane.b32.xlu1 %v3243_v15, %s3310_s25  ;;  %v2837_v49 = vunpack.c.h.bf16 %v2835_v3  ;;  %v498_v27 = vunpack.c.l.bf16 %v492_v11  ;;  %v617_v31 = vadd.f32 %v3282_v29, %v556_v63  ;;  %v3105_v11 = vpop.permute.xlu1 %3104  ;;  %vm1466_vm4 = vcmask 64512  }
  0x87   : > { %vm669_vm10 = vcmp.gt.f32.partialorder %v615_v0, 0.0  ;;  %vm670_vm11 = vcmp.gt.f32.partialorder %v616_v25, 0.0  ;;  %v723_v32 = vmul.f32 0.01, %v615_v0  ;;  %v724_v39 = vmul.f32 0.01, %v616_v25 }
  0x88   : > { %v557_v44 = vmul.f32 %v3281_v60, %v2836_v42  ;;  %v558_v45 = vmul.f32 %v3281_v60, %v2837_v49  ;;  %v559_v19 = vmul.f32 %v3281_v60, %v498_v27  ;;  %vm671_vm12 = vcmp.gt.f32.partialorder %v617_v31, 0.0 }
  0x89   : > { %v725_v47 = vmul.f32 0.01, %v617_v31  ;;  %v777_v50 = vsel %vm669_vm10, %v615_v0, %v723_v32  ;;  %v3807_v52 = vsel %vm670_vm11, %v616_v25, %v724_v39  ;;  %v3107_v49 = vunpack.i.h.bf16 %v3105_v11  ;;  %v3100_v39 = vpop.permute.xlu0 %3099 }
  0x8a   : > { %3239 = vrot.lane.b32.xlu0 %v3238_v23, %s3310_s25  ;;  %v3811_v24 = vsel %vm863_vm0, %v777_v50, 0.0  ;;  %v618_v33 = vadd.f32 %v3282_v29, %v557_v44  ;;  %v619_v54 = vadd.f32 %v3282_v29, %v558_v45  ;;  %v1156_v53 = vrot.slane %v3807_v52, 1 }
  0x8b   : > { %v779_v41 = vsel %vm671_vm12, %v617_v31, %v725_v47  ;;  %v1155_v58 = vrot.slane %v3811_v24, 1  ;;  %v1236_v60 = vrot.slane %v3811_v24, 2  ;;  %v1237_v2 = vrot.slane %v3807_v52, 2 }
  0x8c   : > { %v1024_v61 = vsel %vm922_vm1, %v779_v41, 0.0  ;;  %v620_v3 = vadd.f32 %v3282_v29, %v559_v19  ;;  %vm672_vm13 = vcmp.gt.f32.partialorder %v618_v33, 0.0  ;;  %vm673_vm14 = vcmp.gt.f32.partialorder %v619_v54, 0.0 }
  0x8d   : > { %v1157_v14 = vsel %vm1079_vm2, %v1155_v58, %v1156_v53  ;;  %v1158_v15 = vrot.slane %v1024_v61, 1  ;;  %v1239_v20 = vrot.slane %v1024_v61, 2  ;;  %v1238_v22 = vsel %vm1160_vm3, %v1236_v60, %v1237_v2 }
  0x8e   : > { %vm674_vm15 = vcmp.gt.f32.partialorder %v620_v3, 0.0  ;;  %v726_v63 = vmul.f32 0.01, %v618_v33  ;;  %v727_v0 = vmul.f32 0.01, %v619_v54  ;;  %v3106_v41 = vunpack.i.l.bf16 %v3105_v11 }
  0x8f   : > { %v1159_v25 = vsel %vm1079_vm2, %v1156_v53, %v1158_v15  ;;  %v1240_v23 = vsel %vm1160_vm3, %v1237_v2, %v1239_v20  ;;  %v728_v42 = vmul.f32 0.01, %v620_v3  ;;  %v3102_v53 = vunpack.i.h.bf16 %v3100_v39 }
  0x90   : > { %v3248_v27 = vpack.i.bf16 %v1159_v25, %v1157_v14  ;;  %v3253_v29 = vpack.i.bf16 %v1240_v23, %v1238_v22  ;;  %v780_v31 = vsel %vm672_vm13, %v618_v33, %v726_v63  ;;  %v3824_v32 = vsel %vm673_vm14, %v619_v54, %v727_v0  ;;  %v3283_v25 = vld [vmem:[%s4253_s4 + $0x8] sm:$0x3f]  }
  0x91   : > { %v782_v44 = vsel %vm674_vm15, %v620_v3, %v728_v42  ;;  %v3828_v45 = vsel %vm863_vm0, %v780_v31, 0.0  ;;  %v1521_v19 = vrot.slane %v3824_v32, 1  ;;  %v1526_v47 = vrot.slane %v3824_v32, 2  ;;  %v3280_v42 = vld [vmem:[%s4253_s4 + $0x10] sm:$0x3f]  }
  0x92   : > { %3249 = vrot.lane.b32.xlu0 %v3248_v27, %s3311_s26  ;;  %3254 = vrot.lane.b32.xlu1 %v3253_v29, %s3310_s25  ;;  %v1027_v50 = vsel %vm922_vm1, %v782_v44, 0.0  ;;  %v1520_v33 = vrot.slane %v3828_v45, 1  ;;  %v1525_v54 = vrot.slane %v3828_v45, 2  ;;  %vm1433_vm0 = vcmask 31744  }
  0x93   : > { %v1523_v58 = vrot.slane %v1027_v50, 1  ;;  %v1528_v4 = vrot.slane %v1027_v50, 2  ;;  %v3101_v2 = vunpack.i.l.bf16 %v3100_v39  ;;  %v1435_v14 = vsel %vm1433_vm0, 0.0, %v3102_v53  ;;  %v3284_v39 = vld [vmem:[%s4253_s4] sm:$0x3f]  }
  0x94   : > { %v1522_v60 = vsel %vm1079_vm2, %v1520_v33, %v1521_v19  ;;  %v1527_v61 = vsel %vm1160_vm3, %v1525_v54, %v1526_v47  ;;  %v1468_v63 = vsel %vm1466_vm4, %v1435_v14, %v3107_v49  ;;  %vm1555_vm1 = vcmask 97280  }
  0x95   : > { %v1524_v3 = vsel %vm1079_vm2, %v1521_v19, %v1523_v58  ;;  %v1529_v7 = vsel %vm1160_vm3, %v1526_v47, %v1528_v4  ;;  %v1434_v11 = vsel %vm1433_vm0, 0.0, %v3101_v2  ;;  %v3115_v22 = vpop.permute.xlu1 %3114  ;;  %v1605_v23 = vsel %vm1160_vm3, %v3283_v25, 0 }
  0x96   : > { %v3258_v15 = vpack.i.bf16 %v1524_v3, %v1522_v60  ;;  %v3263_v20 = vpack.i.bf16 %v1529_v7, %v1527_v61  ;;  %v1467_v0 = vsel %vm1466_vm4, %v1434_v11, %v3106_v41  ;;  %v3117_v27 = vunpack.i.h.bf16 %v3115_v22  ;;  %2897 = vmatpush3.bf16.msra.mxu1 %v1605_v23 }
  0x97   : > { %v3116_v29 = vunpack.i.l.bf16 %v3115_v22  ;;  %v1499_v31 = vpack.c.bf16 %v1468_v63, %v1467_v0  ;;  %v1777_v44 = vsel %vm1160_vm3, %v3284_v39, 0  ;;  %3066 = vmatprep.subr.msk.bf16.mxu1 %vm1160_vm3, %v3284_v39  ;;  %v1982_v14 = vsel %vm1160_vm3, %v3280_v42, 0 }
  0x98   : > { %3259 = vrot.lane.b32.xlu0 %v3258_v15, %s3311_s26  ;;  %3264 = vrot.lane.b32.xlu1 %v3263_v20, %s3310_s25  ;;  %v3110_v49 = vpop.permute.xlu0 %3109  ;;  %v1439_v41 = vsel %vm1433_vm0, %v3421_v46, %v3117_v27  ;;  %vm2479_vm2 = vcmask 27648   ;;  %vm2349_vm5 = vcmask 25600  }
  0x99   : > { %2931 = vmatpush3.bf16.msra.mxu0 %v1777_v44  ;;  %v3112_v19 = vunpack.i.h.bf16 %v3110_v49  ;;  %v3111_v47 = vunpack.i.l.bf16 %v3110_v49  ;;  %2932 = vmatprep.mubr.msk.bf16.mxu0 %vm1555_vm1, %v1499_v31  ;;  %v3125_v50 = vpop.permute.xlu1 %3124  ;;  %v1438_v58 = vsel %vm1433_vm0, %v3425_v48, %v3116_v29 }
  0x9a   : > { %v3127_v33 = vunpack.i.h.bf16 %v3125_v50  ;;  %v3126_v54 = vunpack.i.l.bf16 %v3125_v50  ;;  %3067 = vmatprep.subr.msk.bf16.mxu0 %vm1160_vm3, %v3280_v42  ;;  %vm2347_vm3 = vcmask 1040384  }
  0x9b   : > { %v1436_v3 = vsel %vm1433_vm0, %v3435_v57, %v3111_v47 }
  0x9c   : > { %3269 = vrot.lane.b32.xlu0 %v3369_v6, %s3311_s26  ;;  %3274 = vrot.lane.b32.xlu1 %v3367_v5, %s3310_s25  ;;  %v3120_v4 = vpop.permute.xlu0 %3119  ;;  %v1471_v53 = vsel %vm1466_vm4, %v1438_v58, %v3126_v54  ;;  %v1472_v60 = vsel %vm1466_vm4, %v1439_v41, %v3127_v33  ;;  %v1437_v6 = vsel %vm1433_vm0, %v3431_v55, %v3112_v19  ;;  %s2773_s25 = sshll.u32 %s4261_s21, 7 }
  0x9d   : > { %v3122_v61 = vunpack.i.h.bf16 %v3120_v4  ;;  %v3121_v2 = vunpack.i.l.bf16 %v3120_v4  ;;  %v3876_v5 = vpack.c.bf16 %v1472_v60, %v1471_v53  ;;  %s4074_s12 = scalar_lea.vmem %s4254_s5, %s2773_s25 }
  0x9f   : > { %v1469_v46 = vsel %vm1466_vm4, %v1436_v3, %v3121_v2  ;;  %v1470_v7 = vsel %vm1466_vm4, %v1437_v6, %v3122_v61 }
  0xa0   : > { %v1500_v48 = vpack.c.bf16 %v1470_v7, %v1469_v46 }
  0xa2   : > { %v3135_v15 = vpop.permute.xlu1 %3134  ;;  %2898 = vmatprep.mubr.msk.bf16.mxu1 %vm1555_vm1, %v1500_v48  ;;  %2933 = vmatmul.mubr.msk.bf16.vlgmr.msra.gmra.mrb[0].mxu0 %vm1555_vm1, %v1500_v48 }
  0xa3   : > { %2899 = vmatmul.mubr.msk.bf16.vlgmr.msra.gmra.mrb[0].mxu1 %vm1555_vm1, %v3876_v5  ;;  %2936 = vmatprep.mubr.msk.bf16.mxu0 %vm1555_vm1, %v3876_v5  ;;  %v3137_v57 = vunpack.i.h.bf16 %v3135_v15  ;;  %v3136_v20 = vunpack.i.l.bf16 %v3135_v15 }
  0xa4   : > { %2999 = vmatpush3.bf16.msra.mxu1 %v1777_v44  ;;  %2965 = vmatpush3.bf16.msra.mxu0 %v1982_v14 }
  0xa5   : > { %v1443_v23 = vsel %vm1433_vm0, %v3473_v38, %v3137_v57  ;;  %v1442_v42 = vsel %vm1433_vm0, %v3477_v40, %v3136_v20 }
  0xa6   : > { %v3145_v55 = vpop.permute.xlu1 %3144 }
  0xa7   : > { %v3147_v22 = vunpack.i.h.bf16 %v3145_v55  ;;  %v3146_v63 = vunpack.i.l.bf16 %v3145_v55 }
  0xa9   : > { %v3130_v11 = vpop.permute.xlu0 %3129  ;;  %v1475_v27 = vsel %vm1466_vm4, %v1442_v42, %v3146_v63  ;;  %v1476_v29 = vsel %vm1466_vm4, %v1443_v23, %v3147_v22 }
  0xaa   : > { %v3132_v0 = vunpack.i.h.bf16 %v3130_v11  ;;  %v3131_v25 = vunpack.i.l.bf16 %v3130_v11  ;;  %v3897_v47 = vpack.c.bf16 %v1476_v29, %v1475_v27 }
  0xac   : > { %v1441_v44 = vsel %vm1433_vm0, %v3498_v9, %v3132_v0  ;;  %v1440_v19 = vsel %vm1433_vm0, %v3502_v10, %v3131_v25 }
  0xad   : > { %v3140_v49 = vpop.permute.xlu0 %3139 }
  0xae   : > { %v3142_v31 = vunpack.i.h.bf16 %v3140_v49  ;;  %v3141_v39 = vunpack.i.l.bf16 %v3140_v49 }
  0xb0   : > { %v1473_v38 = vsel %vm1466_vm4, %v1440_v19, %v3141_v39  ;;  %v1474_v50 = vsel %vm1466_vm4, %v1441_v44, %v3142_v31 }
  0xb1   : > { %v3901_v40 = vpack.c.bf16 %v1474_v50, %v1473_v38 }
  0xb2   : > { %v3155_v33 = vpop.permute.xlu1 %3154 }
  0xb3   : > { %2902 = vmatprep.mubr.msk.bf16.mxu1 %vm1555_vm1, %v3901_v40  ;;  %2937 = vmatmul.mubr.msk.bf16.gmra.mrb[4].mxu0 %vm1555_vm1, %v3901_v40  ;;  %v3157_v10 = vunpack.i.h.bf16 %v3155_v33  ;;  %v3156_v54 = vunpack.i.l.bf16 %v3155_v33 }
  0xb4   : > { %2903 = vmatmul.mubr.msk.bf16.gmra.mrb[4].mxu1 %vm1555_vm1, %v3897_v47  ;;  %2940 = vmatprep.mubr.msk.bf16.mxu0 %vm1555_vm1, %v3897_v47 }
  0xb5   : > { %v1447_v61 = vsel %vm1433_vm0, %v3530_v51, %v3157_v10  ;;  %v1446_v2 = vsel %vm1433_vm0, %v3536_v56, %v3156_v54 }
  0xb6   : > { %v3165_v9 = vpop.permute.xlu1 %3164 }
  0xb7   : > { %v3167_v58 = vunpack.i.h.bf16 %v3165_v9  ;;  %v3166_v4 = vunpack.i.l.bf16 %v3165_v9 }
  0xb8   : > { %v3150_v41 = vpop.permute.xlu0 %3149 }
  0xb9   : > { %v3152_v53 = vunpack.i.h.bf16 %v3150_v41  ;;  %v3151_v60 = vunpack.i.l.bf16 %v3150_v41  ;;  %v1479_v3 = vsel %vm1466_vm4, %v1446_v2, %v3166_v4  ;;  %v1480_v6 = vsel %vm1466_vm4, %v1447_v61, %v3167_v58 }
  0xba   : > { %v1505_v55 = vpack.c.bf16 %v1480_v6, %v1479_v3 }
  0xbb   : > { %v1445_v14 = vsel %vm1433_vm0, %v3550_v17, %v3152_v53  ;;  %v1444_v15 = vsel %vm1433_vm0, %v3554_v18, %v3151_v60 }
  0xbc   : > { %v3160_v46 = vpop.permute.xlu0 %3159 }
  0xbd   : > { %v3162_v7 = vunpack.i.h.bf16 %v3160_v46  ;;  %v3161_v48 = vunpack.i.l.bf16 %v3160_v46 }
  0xbf   : > { %v1477_v57 = vsel %vm1466_vm4, %v1444_v15, %v3161_v48  ;;  %v1478_v51 = vsel %vm1466_vm4, %v1445_v14, %v3162_v7 }
  0xc0   : > { %v1504_v20 = vpack.c.bf16 %v1478_v51, %v1477_v57 }
  0xc2   : > { %2906 = vmatprep.mubr.msk.bf16.mxu1 %vm1555_vm1, %v1504_v20  ;;  %2941 = vmatmul.mubr.msk.bf16.gmra.mrb[8].mxu0 %vm1555_vm1, %v1504_v20 }
  0xc3   : > { %2907 = vmatmul.mubr.msk.bf16.gmra.mrb[8].mxu1 %vm1555_vm1, %v1505_v55  ;;  %2944 = vmatprep.mubr.msk.bf16.mxu0 %vm1555_vm1, %v1505_v55 }
  0xc4   : > { %v3175_v56 = vpop.permute.xlu1 %3174 }
  0xc5   : > { %v3177_v11 = vunpack.i.h.bf16 %v3175_v56  ;;  %v3176_v17 = vunpack.i.l.bf16 %v3175_v56 }
  0xc7   : > { %v3170_v22 = vpop.permute.xlu0 %3169  ;;  %v1451_v42 = vsel %vm1433_vm0, %v3593_v16, %v3177_v11  ;;  %v1450_v27 = vsel %vm1433_vm0, %v3597_v21, %v3176_v17 }
  0xc8   : > { %v3185_v63 = vpop.permute.xlu1 %3184  ;;  %v3172_v25 = vunpack.i.h.bf16 %v3170_v22  ;;  %v3171_v23 = vunpack.i.l.bf16 %v3170_v22 }
  0xc9   : > { %v3187_v18 = vunpack.i.h.bf16 %v3185_v63  ;;  %v3186_v0 = vunpack.i.l.bf16 %v3185_v63 }
  0xca   : > { %v1449_v19 = vsel %vm1433_vm0, %v3607_v34, %v3172_v25  ;;  %v1448_v38 = vsel %vm1433_vm0, %v3611_v36, %v3171_v23 }
  0xcb   : > { %v1483_v29 = vsel %vm1466_vm4, %v1450_v27, %v3186_v0  ;;  %v1484_v49 = vsel %vm1466_vm4, %v1451_v42, %v3187_v18  ;;  %v3180_v31 = vpop.permute.xlu0 %3179 }
  0xcc   : > { %v3182_v39 = vunpack.i.h.bf16 %v3180_v31  ;;  %v3181_v44 = vunpack.i.l.bf16 %v3180_v31  ;;  %v3937_v50 = vpack.c.bf16 %v1484_v49, %v1483_v29 }
  0xce   : > { %v1481_v16 = vsel %vm1466_vm4, %v1448_v38, %v3181_v44  ;;  %v1482_v33 = vsel %vm1466_vm4, %v1449_v19, %v3182_v39 }
  0xcf   : > { %v1506_v21 = vpack.c.bf16 %v1482_v33, %v1481_v16 }
  0xd1   : > { %2910 = vmatprep.mubr.msk.bf16.mxu1 %vm1555_vm1, %v1506_v21  ;;  %2945 = vmatmul.mubr.msk.bf16.gmra.mrb[12].mxu0 %vm1555_vm1, %v1506_v21 }
  0xd2   : > { %2911 = vmatmul.mubr.msk.bf16.gmra.mrb[12].mxu1 %vm1555_vm1, %v3937_v50  ;;  %2966 = vmatprep.mubr.msk.bf16.mxu0 %vm1555_vm1, %v3876_v5 }
  0xd3   : > { %v3195_v34 = vpop.permute.xlu1 %3194 }
  0xd4   : > { %v3197_v9 = vunpack.i.h.bf16 %v3195_v34  ;;  %v3196_v36 = vunpack.i.l.bf16 %v3195_v34 }
  0xd6   : > { %v1455_v60 = vsel %vm1433_vm0, %v3646_v35, %v3197_v9  ;;  %v1454_v5 = vsel %vm1433_vm0, %v3650_v37, %v3196_v36 }
  0xd7   : > { %v3205_v10 = vpop.permute.xlu1 %3204 }
  0xd8   : > { %v3190_v54 = vpop.permute.xlu0 %3189  ;;  %v3207_v41 = vunpack.i.h.bf16 %v3205_v10  ;;  %v3206_v58 = vunpack.i.l.bf16 %v3205_v10 }
  0xd9   : > { %2967 = vmatmul.mubr.msk.bf16.vlgmr.msra.gmra.mrb[0].mxu0 %vm1555_vm1, %v3901_v40  ;;  %v3192_v4 = vunpack.i.h.bf16 %v3190_v54  ;;  %v3191_v53 = vunpack.i.l.bf16 %v3190_v54 }
  0xda   : > { %2970 = vmatprep.mubr.msk.bf16.mxu0 %vm1555_vm1, %v3897_v47  ;;  %v1487_v61 = vsel %vm1466_vm4, %v1454_v5, %v3206_v58  ;;  %v1488_v2 = vsel %vm1466_vm4, %v1455_v60, %v3207_v41 }
  0xdb   : > { %v1453_v40 = vsel %vm1433_vm0, %v3663_v62, %v3192_v4  ;;  %v1452_v7 = vsel %vm1433_vm0, %v3667_v1, %v3191_v53  ;;  %v3961_v47 = vpack.c.bf16 %v1488_v2, %v1487_v61 }
  0xdc   : > { %v3200_v3 = vpop.permute.xlu0 %3199 }
  0xdd   : > { %v3202_v6 = vunpack.i.h.bf16 %v3200_v3  ;;  %v3201_v46 = vunpack.i.l.bf16 %v3200_v3 }
  0xdf   : > { %v1485_v35 = vsel %vm1466_vm4, %v1452_v7, %v3201_v46  ;;  %v1486_v48 = vsel %vm1466_vm4, %v1453_v40, %v3202_v6 }
  0xe0   : > { %v3965_v37 = vpack.c.bf16 %v1486_v48, %v1485_v35 }
  0xe1   : > { %2971 = vmatmul.mubr.msk.bf16.gmra.mrb[4].mxu0 %vm1555_vm1, %v1504_v20 }
  0xe2   : > { %2914 = vmatprep.mubr.msk.bf16.mxu1 %vm1555_vm1, %v3965_v37  ;;  %2974 = vmatprep.mubr.msk.bf16.mxu0 %vm1555_vm1, %v1505_v55 }
  0xe3   : > { %v3215_v14 = vpop.permute.xlu1 %3214  ;;  %2915 = vmatmul.mubr.msk.bf16.gmra.mrb[16].mxu1 %vm1555_vm1, %v3961_v47 }
  0xe4   : > { %v3217_v62 = vunpack.i.h.bf16 %v3215_v14  ;;  %v3216_v1 = vunpack.i.l.bf16 %v3215_v14 }
  0xe6   : > { %v1459_v20 = vsel %vm1433_vm0, %v3698_v12, %v3217_v62  ;;  %v1458_v55 = vsel %vm1433_vm0, %v3702_v13, %v3216_v1 }
  0xe7   : > { %v3225_v57 = vpop.permute.xlu1 %3224 }
  0xe8   : > { %v3210_v15 = vpop.permute.xlu0 %3209  ;;  %v3227_v51 = vunpack.i.h.bf16 %v3225_v57  ;;  %v3226_v56 = vunpack.i.l.bf16 %v3225_v57 }
  0xe9   : > { %v3212_v11 = vunpack.i.h.bf16 %v3210_v15  ;;  %v3211_v17 = vunpack.i.l.bf16 %v3210_v15  ;;  %2975 = vmatmul.mubr.msk.bf16.gmra.mrb[8].mxu0 %vm1555_vm1, %v1506_v21 }
  0xea   : > { %2978 = vmatprep.mubr.msk.bf16.mxu0 %vm1555_vm1, %v3937_v50  ;;  %v1491_v22 = vsel %vm1466_vm4, %v1458_v55, %v3226_v56  ;;  %v1492_v63 = vsel %vm1466_vm4, %v1459_v20, %v3227_v51 }
  0xeb   : > { %v1457_v23 = vsel %vm1433_vm0, %v3712_v30, %v3212_v11  ;;  %v1456_v42 = vsel %vm1433_vm0, %v3718_v43, %v3211_v17  ;;  %v3986_v12 = vpack.c.bf16 %v1492_v63, %v1491_v22 }
  0xec   : > { %v3220_v18 = vpop.permute.xlu0 %3219 }
  0xed   : > { %v3222_v0 = vunpack.i.h.bf16 %v3220_v18  ;;  %v3221_v25 = vunpack.i.l.bf16 %v3220_v18 }
  0xef   : > { %v1489_v13 = vsel %vm1466_vm4, %v1456_v42, %v3221_v25  ;;  %v1490_v27 = vsel %vm1466_vm4, %v1457_v23, %v3222_v0 }
  0xf0   : > { %v3990_v29 = vpack.c.bf16 %v1490_v27, %v1489_v13 }
  0xf1   : > { %2979 = vmatmul.mubr.msk.bf16.gmra.mrb[12].mxu0 %vm1555_vm1, %v3965_v37 }
  0xf2   : > { %2918 = vmatprep.mubr.msk.bf16.mxu1 %vm1555_vm1, %v3990_v29  ;;  %2982 = vmatprep.mubr.msk.bf16.mxu0 %vm1555_vm1, %v3961_v47 }
  0xf3   : > { %2919 = vmatmul.mubr.msk.bf16.gmra.mrb[20].mxu1 %vm1555_vm1, %v3986_v12 }
  0xf4   : > { %v3235_v30 = vpop.permute.xlu1 %3234 }
  0xf5   : > { %v3237_v43 = vunpack.i.h.bf16 %v3235_v30  ;;  %v3236_v49 = vunpack.i.l.bf16 %v3235_v30 }
  0xf7   : > { %v1463_v33 = vsel %vm1433_vm0, %v3757_v59, %v3237_v43  ;;  %v1462_v21 = vsel %vm1433_vm0, %v3761_v8, %v3236_v49 }
  0xf8   : > { %v3230_v31 = vpop.permute.xlu0 %3229  ;;  %v3245_v39 = vpop.permute.xlu1 %3244 }
  0xf9   : > { %v3247_v44 = vunpack.i.h.bf16 %v3245_v39  ;;  %v3246_v19 = vunpack.i.l.bf16 %v3245_v39  ;;  %v3232_v38 = vunpack.i.h.bf16 %v3230_v31  ;;  %v3231_v16 = vunpack.i.l.bf16 %v3230_v31  ;;  %2983 = vmatmul.mubr.msk.bf16.gmra.mrb[16].mxu0 %vm1555_vm1, %v3990_v29 }
  0xfa   : > { %2986 = vmatprep.mubr.msk.bf16.mxu0 %vm1555_vm1, %v3986_v12 }
  0xfb   : > { %v1495_v34 = vsel %vm1466_vm4, %v1462_v21, %v3246_v19  ;;  %v1496_v9 = vsel %vm1466_vm4, %v1463_v33, %v3247_v44  ;;  %v1461_v41 = vsel %vm1433_vm0, %v3773_v26, %v3232_v38  ;;  %v1460_v58 = vsel %vm1433_vm0, %v3777_v28, %v3231_v16 }
  0xfc   : > { %v3240_v36 = vpop.permute.xlu0 %3239  ;;  %v1513_v59 = vpack.c.bf16 %v1496_v9, %v1495_v34 }
  0xfd   : > { %v3242_v10 = vunpack.i.h.bf16 %v3240_v36  ;;  %v3241_v54 = vunpack.i.l.bf16 %v3240_v36 }
  0xff   : > { %v1493_v4 = vsel %vm1466_vm4, %v1460_v58, %v3241_v54  ;;  %v1494_v8 = vsel %vm1466_vm4, %v1461_v41, %v3242_v10 }
 0x100   : > { %v1512_v53 = vpack.c.bf16 %v1494_v8, %v1493_v4 }
 0x102   : > { %2922 = vmatprep.mubr.msk.bf16.mxu1 %vm1555_vm1, %v1512_v53  ;;  %2987 = vmatmul.mubr.msk.bf16.gmra.mrb[20].mxu0 %vm1555_vm1, %v1512_v53 }
 0x103   : > { %2923 = vmatmul.mubr.msk.bf16.gmra.mrb[24].mxu1 %vm1555_vm1, %v1513_v59  ;;  %2990 = vmatprep.mubr.msk.bf16.mxu0 %vm1555_vm1, %v1513_v59 }
 0x104   : > { %v3250_v60 = vpop.permute.xlu0 %3249  ;;  %v3255_v5 = vpop.permute.xlu1 %3254 }
 0x105   : > { %v3252_v26 = vunpack.i.h.bf16 %v3250_v60  ;;  %v3251_v61 = vunpack.i.l.bf16 %v3250_v60  ;;  %v3257_v2 = vunpack.i.h.bf16 %v3255_v5  ;;  %v3256_v28 = vunpack.i.l.bf16 %v3255_v5 }
 0x107   : > { %v1465_v3 = vsel %vm1433_vm0, %v3807_v52, %v3252_v26  ;;  %v1464_v6 = vsel %vm1433_vm0, %v3811_v24, %v3251_v61 }
 0x108   : > { %v1497_v46 = vsel %vm1466_vm4, %v1464_v6, %v3256_v28  ;;  %v1498_v40 = vsel %vm1466_vm4, %v1465_v3, %v3257_v2 }
 0x109   : > { %v1514_v7 = vpack.c.bf16 %v1498_v40, %v1497_v46 }
 0x10a   : > { %v3260_v35 = vpop.permute.xlu0 %3259  ;;  %v3265_v48 = vpop.permute.xlu1 %3264 }
 0x10b   : > { %v3262_v14 = vunpack.i.h.bf16 %v3260_v35  ;;  %v3261_v62 = vunpack.i.l.bf16 %v3260_v35  ;;  %v3267_v1 = vunpack.i.h.bf16 %v3265_v48  ;;  %v3266_v15 = vunpack.i.l.bf16 %v3265_v48  ;;  %2926 = vmatprep.mubr.msk.bf16.mxu1 %vm1555_vm1, %v1514_v7  ;;  %2991 = vmatmul.mubr.msk.bf16.gmra.mrb[24].mxu0 %vm1555_vm1, %v1514_v7 }
 0x10d   : > { %v1543_v52 = vsel %vm1433_vm0, %v3824_v32, %v3262_v14  ;;  %v1542_v24 = vsel %vm1433_vm0, %v3828_v45, %v3261_v62 }
 0x10e   : > { %v1544_v57 = vsel %vm1466_vm4, %v1542_v24, %v3266_v15  ;;  %v1545_v51 = vsel %vm1466_vm4, %v1543_v52, %v3267_v1  ;;  %v3270_v56 = vpop.permute.xlu0 %3269  ;;  %v3275_v11 = vpop.permute.xlu1 %3274 }
 0x10f   : > { %v1546_v17 = vpack.c.bf16 %v1545_v51, %v1544_v57  ;;  %v3272_v20 = vunpack.i.h.bf16 %v3270_v56  ;;  %v3271_v55 = vunpack.i.l.bf16 %v3270_v56  ;;  %v3277_v22 = vunpack.i.h.bf16 %v3275_v11 }
 0x110   : > { %v3276_v63 = vunpack.i.l.bf16 %v3275_v11 }
 0x111   : > { %2927 = vmatmul.mubr.msk.bf16.gmra.mrb[28].mxu1 %vm1555_vm1, %v1546_v17  ;;  %v1966_v18 = vsel %vm1433_vm0, 0.0, %v3272_v20  ;;  %v1965_v32 = vsel %vm1433_vm0, 0.0, %v3271_v55  ;;  %2994 = vmatprep.mubr.msk.bf16.mxu0 %vm1555_vm1, %v1546_v17 }
 0x112   : > { %2948 = vmatprep.mubr.msk.bf16.mxu1 %vm1555_vm1, %v3937_v50  ;;  %v1967_v45 = vsel %vm1466_vm4, %v1965_v32, %v3276_v63  ;;  %v1968_v0 = vsel %vm1466_vm4, %v1966_v18, %v3277_v22 }
 0x113   : > { %v1969_v25 = vpack.c.bf16 %v1968_v0, %v1967_v45 }
 0x115   : > { %2995 = vmatmul.mubr.msk.bf16.gmra.mrb[28].mxu0 %vm1555_vm1, %v1969_v25 }
 0x119   : > { %2949 = vmatmul.mubr.msk.bf16.vlgmr.msra.gmra.mrb[16].mxu1 %vm1555_vm1, %v3965_v37 }
 0x11a   : > { %2952 = vmatprep.mubr.msk.bf16.mxu1 %vm1555_vm1, %v3961_v47 }
 0x121   : > { %2953 = vmatmul.mubr.msk.bf16.gmra.mrb[20].mxu1 %vm1555_vm1, %v3990_v29 }
 0x122   : > { %2956 = vmatprep.mubr.msk.bf16.mxu1 %vm1555_vm1, %v3986_v12 }
 0x129   : > { %2957 = vmatmul.mubr.msk.bf16.gmra.mrb[24].mxu1 %vm1555_vm1, %v1512_v53 }
 0x12a   : > { %2960 = vmatprep.mubr.msk.bf16.mxu1 %vm1555_vm1, %v1513_v59 }
 0x131   : > { %2961 = vmatmul.mubr.msk.bf16.gmra.mrb[28].mxu1 %vm1555_vm1, %v1514_v7 }
 0x176   : > { %v2900_v50 = vpop.f32.mrb[0].mxu1 }
 0x177   : > { %v1641_v23 = vpop.f32.mrb[1].mxu1 }
 0x178   : > { %v2901_v42 = vpop.f32.mrb[2].mxu1 }
 0x179   : > { %v1644_v37 = vpop.f32.mrb[3].mxu1 }
 0x187   : > { %v2904_v13 = vpop.f32.mrb[4].mxu1 }
 0x188   : > { %v1657_v27 = vpop.f32.mrb[5].mxu1 }
 0x189   : > { %v2905_v47 = vpop.f32.mrb[6].mxu1 }
 0x18a   : > { %v1660_v30 = vpop.f32.mrb[7].mxu1 }
 0x196   : > { %v4054_v43 = vpop.f32.mrb[8].mxu1 }
 0x197   : > { %v4056_v29 = vpop.f32.mrb[9].mxu1 }
 0x198   : > { %v4058_v12 = vpop.f32.mrb[10].mxu1 }
 0x199   : > { %v4060_v49 = vpop.f32.mrb[11].mxu1 }
 0x1a5   : > { %v4062_v31 = vpop.f32.mrb[12].mxu1 }
 0x1a6   : > { %v4064_v39 = vpop.f32.mrb[13].mxu1 }
 0x1a7   : > { %v4066_v44 = vpop.f32.mrb[14].mxu1 }
 0x1a8   : > { %v4068_v19 = vpop.f32.mrb[15].mxu1 }
 0x1ac   : > { %v2968_v38 = vpop.f32.mrb[0].mxu0 }
 0x1ad   : > { %v3000_v16 = vadd.f32 %v2968_v38, %v2900_v50  ;;  %v2018_v33 = vpop.f32.mrb[1].mxu0 }
 0x1ae   : > { %v3001_v21 = vadd.f32 %v2018_v33, %v1641_v23  ;;  %v2969_v34 = vpop.f32.mrb[2].mxu0 }
 0x1af   : > { %v2776_v9 = vpack.c.bf16 %v3000_v16, %v3000_v16  ;;  %v3002_v36 = vadd.f32 %v2969_v34, %v2901_v42  ;;  %v2021_v10 = vpop.f32.mrb[3].mxu0  ;;  %v2248_v59 = vmul.f32 %v3000_v16, %v3000_v16  ;;  %v2180_v2 = vsel %vm1433_vm0, %v3000_v16, 0.0 }
 0x1b0   : > { %v2246_v54 = vmul.f32 %v3001_v21, %v3001_v21  ;;  %v2774_v41 = vpack.c.bf16 %v3001_v21, %v3001_v21  ;;  %v3003_v58 = vadd.f32 %v2021_v10, %v1644_v37  ;;  %v2177_v8 = vsel %vm1433_vm0, %v3001_v21, 0.0 }
 0x1b1   : > { %2482 = vst.msk [vmem:[%s4074_s12 + $0x8] sm:$0xf] %vm2479_vm2, %v2776_v9  ;;  %v2777_v4 = vpack.c.bf16 %v3002_v36, %v3002_v36  ;;  %v2249_v26 = vmul.f32 %v3002_v36, %v3002_v36  ;;  %v2281_v48 = vsel %vm1433_vm0, %v2248_v59, 0.0  ;;  %v2182_v1 = vsel %vm1433_vm0, %v3002_v36, 0.0 }
 0x1b2   : > { %2480 = vst.msk [vmem:[%s4074_s12] sm:$0xf] %vm2479_vm2, %v2774_v41  ;;  %v2178_v53 = vsel %vm1433_vm0, %v3003_v58, 0.0  ;;  %v2247_v60 = vmul.f32 %v3003_v58, %v3003_v58  ;;  %v2775_v5 = vpack.c.bf16 %v3003_v58, %v3003_v58  ;;  %v2278_v28 = vsel %vm1433_vm0, %v2246_v54, 0.0 }
 0x1b3   : > { %2483 = vst.msk [vmem:[%s4074_s12 + $0xc] sm:$0xf] %vm2479_vm2, %v2777_v4  ;;  %v2179_v61 = vadd.f32 %v2178_v53, %v2177_v8  ;;  %v2283_v15 = vsel %vm1433_vm0, %v2249_v26, 0.0 }
 0x1b4   : > { %v2279_v3 = vsel %vm1433_vm0, %v2247_v60, 0.0  ;;  %2481 = vst.msk [vmem:[%s4074_s12 + $0x4] sm:$0xf] %vm2479_vm2, %v2775_v5  ;;  %v2972_v6 = vpop.f32.mrb[4].mxu0 }
 0x1b5   : > { %v2181_v46 = vadd.f32 %v2180_v2, %v2179_v61  ;;  %v2280_v40 = vadd.f32 %v2279_v3, %v2278_v28  ;;  %v3004_v7 = vadd.f32 %v2972_v6, %v2904_v13  ;;  %v2034_v35 = vpop.f32.mrb[5].mxu0 }
 0x1b6   : > { %v3005_v14 = vadd.f32 %v2034_v35, %v1657_v27  ;;  %v2973_v62 = vpop.f32.mrb[6].mxu0 }
 0x1b7   : > { %v2282_v52 = vadd.f32 %v2281_v48, %v2280_v40  ;;  %v2780_v24 = vpack.c.bf16 %v3004_v7, %v3004_v7  ;;  %v2037_v57 = vpop.f32.mrb[7].mxu0  ;;  %v2183_v51 = vadd.f32 %v2182_v1, %v2181_v46  ;;  %v3006_v55 = vadd.f32 %v2973_v62, %v2905_v47 }
 0x1b8   : > { %v2184_v56 = vsel %vm1433_vm0, %v3005_v14, 0.0  ;;  %v2250_v11 = vmul.f32 %v3005_v14, %v3005_v14  ;;  %v2778_v17 = vpack.c.bf16 %v3005_v14, %v3005_v14  ;;  %v3007_v22 = vadd.f32 %v2037_v57, %v1660_v30 }
 0x1b9   : > { %2486 = vst.msk [vmem:[%s4074_s12 + $0x18] sm:$0xf] %vm2479_vm2, %v2780_v24  ;;  %v2284_v20 = vadd.f32 %v2283_v15, %v2282_v52  ;;  %v2185_v63 = vadd.f32 %v2184_v56, %v2183_v51  ;;  %v2252_v32 = vmul.f32 %v3004_v7, %v3004_v7  ;;  %v2781_v0 = vpack.c.bf16 %v3006_v55, %v3006_v55 }
 0x1ba   : > { %v2285_v18 = vsel %vm1433_vm0, %v2250_v11, 0.0  ;;  %2484 = vst.msk [vmem:[%s4074_s12 + $0x10] sm:$0xf] %vm2479_vm2, %v2778_v17  ;;  %v2186_v25 = vsel %vm1433_vm0, %v3007_v22, 0.0  ;;  %v2251_v50 = vmul.f32 %v3007_v22, %v3007_v22  ;;  %v2779_v23 = vpack.c.bf16 %v3007_v22, %v3007_v22 }
 0x1bb   : > { %v2286_v45 = vadd.f32 %v2285_v18, %v2284_v20  ;;  %2487 = vst.msk [vmem:[%s4074_s12 + $0x1c] sm:$0xf] %vm2479_vm2, %v2781_v0  ;;  %v2187_v37 = vadd.f32 %v2186_v25, %v2185_v63  ;;  %v2188_v47 = vsel %vm1433_vm0, %v3004_v7, 0.0  ;;  %v2253_v30 = vmul.f32 %v3006_v55, %v3006_v55 }
 0x1bc   : > { %v2976_v42 = vpop.f32.mrb[8].mxu0  ;;  %v2287_v38 = vsel %vm1433_vm0, %v2251_v50, 0.0  ;;  %2485 = vst.msk [vmem:[%s4074_s12 + $0x14] sm:$0xf] %vm2479_vm2, %v2779_v23  ;;  %v2289_v21 = vsel %vm1433_vm0, %v2252_v32, 0.0  ;;  %v2190_v34 = vsel %vm1433_vm0, %v3006_v55, 0.0 }
 0x1bd   : > { %v3008_v13 = vadd.f32 %v2976_v42, %v4054_v43  ;;  %v2050_v27 = vpop.f32.mrb[9].mxu0  ;;  %v2189_v9 = vadd.f32 %v2188_v47, %v2187_v37  ;;  %v2288_v36 = vadd.f32 %v2287_v38, %v2286_v45 }
 0x1be   : > { %v3009_v16 = vadd.f32 %v2050_v27, %v4056_v29  ;;  %v2977_v33 = vpop.f32.mrb[10].mxu0  ;;  %v2291_v29 = vsel %vm1433_vm0, %v2253_v30, 0.0 }
 0x1bf   : > { %v2053_v43 = vpop.f32.mrb[11].mxu0  ;;  %v2784_v10 = vpack.c.bf16 %v3008_v13, %v3008_v13  ;;  %v2290_v59 = vadd.f32 %v2289_v21, %v2288_v36  ;;  %v2191_v4 = vadd.f32 %v2190_v34, %v2189_v9  ;;  %v3010_v8 = vadd.f32 %v2977_v33, %v4058_v12 }
 0x1c0   : > { %v2192_v54 = vsel %vm1433_vm0, %v3009_v16, 0.0  ;;  %v2254_v41 = vmul.f32 %v3009_v16, %v3009_v16  ;;  %v2782_v58 = vpack.c.bf16 %v3009_v16, %v3009_v16  ;;  %v3011_v60 = vadd.f32 %v2053_v43, %v4060_v49 }
 0x1c1   : > { %2490 = vst.msk [vmem:[%s4074_s12 + $0x28] sm:$0xf] %vm2479_vm2, %v2784_v10  ;;  %v2256_v5 = vmul.f32 %v3008_v13, %v3008_v13  ;;  %v2193_v26 = vadd.f32 %v2192_v54, %v2191_v4  ;;  %v2292_v61 = vadd.f32 %v2291_v29, %v2290_v59  ;;  %v2785_v2 = vpack.c.bf16 %v3010_v8, %v3010_v8 }
 0x1c2   : > { %v2293_v53 = vsel %vm1433_vm0, %v2254_v41, 0.0  ;;  %2488 = vst.msk [vmem:[%s4074_s12 + $0x20] sm:$0xf] %vm2479_vm2, %v2782_v58  ;;  %v2194_v28 = vsel %vm1433_vm0, %v3011_v60, 0.0  ;;  %v2255_v3 = vmul.f32 %v3011_v60, %v3011_v60  ;;  %v2783_v12 = vpack.c.bf16 %v3011_v60, %v3011_v60 }
 0x1c3   : > { %v2294_v46 = vadd.f32 %v2293_v53, %v2292_v61  ;;  %v2195_v40 = vadd.f32 %v2194_v28, %v2193_v26  ;;  %v2196_v48 = vsel %vm1433_vm0, %v3008_v13, 0.0  ;;  %v2257_v14 = vmul.f32 %v3010_v8, %v3010_v8  ;;  %2491 = vst.msk [vmem:[%s4074_s12 + $0x2c] sm:$0xf] %vm2479_vm2, %v2785_v2 }
 0x1c4   : > { %v2980_v6 = vpop.f32.mrb[12].mxu0  ;;  %v2295_v49 = vsel %vm1433_vm0, %v2255_v3, 0.0  ;;  %2489 = vst.msk [vmem:[%s4074_s12 + $0x24] sm:$0xf] %vm2479_vm2, %v2783_v12  ;;  %v2297_v15 = vsel %vm1433_vm0, %v2256_v5, 0.0  ;;  %v2198_v52 = vsel %vm1433_vm0, %v3010_v8, 0.0 }
 0x1c5   : > { %v3012_v7 = vadd.f32 %v2980_v6, %v4062_v31  ;;  %v2066_v35 = vpop.f32.mrb[13].mxu0  ;;  %v2197_v31 = vadd.f32 %v2196_v48, %v2195_v40  ;;  %v2296_v24 = vadd.f32 %v2295_v49, %v2294_v46 }
 0x1c6   : > { %v3013_v62 = vadd.f32 %v2066_v35, %v4064_v39  ;;  %v2981_v1 = vpop.f32.mrb[14].mxu0  ;;  %v2299_v39 = vsel %vm1433_vm0, %v2257_v14, 0.0 }
 0x1c7   : > { %v2069_v57 = vpop.f32.mrb[15].mxu0  ;;  %v2788_v51 = vpack.c.bf16 %v3012_v7, %v3012_v7  ;;  %v2298_v20 = vadd.f32 %v2297_v15, %v2296_v24  ;;  %v2199_v55 = vadd.f32 %v2198_v52, %v2197_v31  ;;  %v3014_v22 = vadd.f32 %v2981_v1, %v4066_v44 }
 0x1c8   : > { %v2200_v56 = vsel %vm1433_vm0, %v3013_v62, 0.0  ;;  %v2258_v11 = vmul.f32 %v3013_v62, %v3013_v62  ;;  %v2786_v17 = vpack.c.bf16 %v3013_v62, %v3013_v62  ;;  %v3015_v18 = vadd.f32 %v2069_v57, %v4068_v19 }
 0x1c9   : > { %2494 = vst.msk [vmem:[%s4074_s12 + $0x38] sm:$0xf] %vm2479_vm2, %v2788_v51  ;;  %v2260_v32 = vmul.f32 %v3012_v7, %v3012_v7  ;;  %v2201_v45 = vadd.f32 %v2200_v56, %v2199_v55  ;;  %v2300_v0 = vadd.f32 %v2299_v39, %v2298_v20  ;;  %v2789_v25 = vpack.c.bf16 %v3014_v22, %v3014_v22 }
 0x1ca   : > { %v2301_v63 = vsel %vm1433_vm0, %v2258_v11, 0.0  ;;  %2492 = vst.msk [vmem:[%s4074_s12 + $0x30] sm:$0xf] %vm2479_vm2, %v2786_v17  ;;  %v2202_v50 = vsel %vm1433_vm0, %v3015_v18, 0.0  ;;  %v2259_v23 = vmul.f32 %v3015_v18, %v3015_v18  ;;  %v2787_v44 = vpack.c.bf16 %v3015_v18, %v3015_v18 }
 0x1cb   : > { %v2302_v37 = vadd.f32 %v2301_v63, %v2300_v0  ;;  %v2203_v13 = vadd.f32 %v2202_v50, %v2201_v45  ;;  %v2204_v47 = vsel %vm1433_vm0, %v3012_v7, 0.0  ;;  %v2261_v30 = vmul.f32 %v3014_v22, %v3014_v22  ;;  %2495 = vst.msk [vmem:[%s4074_s12 + $0x3c] sm:$0xf] %vm2479_vm2, %v2789_v25 }
 0x1cc   : > { %v2984_v42 = vpop.f32.mrb[16].mxu0  ;;  %v2303_v19 = vsel %vm1433_vm0, %v2259_v23, 0.0  ;;  %2493 = vst.msk [vmem:[%s4074_s12 + $0x34] sm:$0xf] %vm2479_vm2, %v2787_v44  ;;  %v2305_v34 = vsel %vm1433_vm0, %v2260_v32, 0.0  ;;  %v2206_v9 = vsel %vm1433_vm0, %v3014_v22, 0.0 }
 0x1cd   : > { %v2082_v27 = vpop.f32.mrb[17].mxu0  ;;  %v2205_v16 = vadd.f32 %v2204_v47, %v2203_v13  ;;  %v2304_v33 = vadd.f32 %v2303_v19, %v2302_v37  ;;  %v2307_v10 = vsel %vm1433_vm0, %v2261_v30, 0.0 }
 0x1ce   : > { %v2985_v38 = vpop.f32.mrb[18].mxu0 }
 0x1cf   : > { %v2085_v21 = vpop.f32.mrb[19].mxu0  ;;  %v2306_v36 = vadd.f32 %v2305_v34, %v2304_v33  ;;  %v2207_v43 = vadd.f32 %v2206_v9, %v2205_v16 }
 0x1d1   : > { %v2308_v54 = vadd.f32 %v2307_v10, %v2306_v36 }
 0x1d5   : > { %v2988_v41 = vpop.f32.mrb[20].mxu0 }
 0x1d6   : > { %v2098_v58 = vpop.f32.mrb[21].mxu0 }
 0x1d7   : > { %v2989_v59 = vpop.f32.mrb[22].mxu0 }
 0x1d8   : > { %v2101_v4 = vpop.f32.mrb[23].mxu0 }
 0x1de   : > { %v4148_v8 = vpop.f32.mrb[24].mxu0 }
 0x1df   : > { %v4150_v29 = vpop.f32.mrb[25].mxu0 }
 0x1e0   : > { %v4152_v53 = vpop.f32.mrb[26].mxu0 }
 0x1e1   : > { %v4154_v60 = vpop.f32.mrb[27].mxu0 }
 0x1e8   : > { %v4156_v5 = vpop.f32.mrb[28].mxu0 }
 0x1e9   : > { %v4158_v26 = vpop.f32.mrb[29].mxu0 }
 0x1ea   : > { %v4160_v61 = vpop.f32.mrb[30].mxu0 }
 0x1eb   : > { %v4162_v2 = vpop.f32.mrb[31].mxu0 }
 0x1ec   : > { %v2950_v28 = vpop.f32.mrb[16].mxu1 }
 0x1ed   : > { %v3016_v3 = vadd.f32 %v2984_v42, %v2950_v28  ;;  %v1877_v12 = vpop.f32.mrb[17].mxu1 }
 0x1ee   : > { %v3017_v6 = vadd.f32 %v2082_v27, %v1877_v12  ;;  %v2951_v46 = vpop.f32.mrb[18].mxu1 }
 0x1ef   : > { %v2792_v40 = vpack.c.bf16 %v3016_v3, %v3016_v3  ;;  %v3018_v7 = vadd.f32 %v2985_v38, %v2951_v46  ;;  %v1880_v35 = vpop.f32.mrb[19].mxu1  ;;  %v2264_v1 = vmul.f32 %v3016_v3, %v3016_v3  ;;  %v2212_v20 = vsel %vm1433_vm0, %v3016_v3, 0.0 }
 0x1f0   : > { %v2208_v48 = vsel %vm1433_vm0, %v3017_v6, 0.0  ;;  %v2262_v14 = vmul.f32 %v3017_v6, %v3017_v6  ;;  %v2790_v49 = vpack.c.bf16 %v3017_v6, %v3017_v6  ;;  %v3019_v62 = vadd.f32 %v2085_v21, %v1880_v35 }
 0x1f1   : > { %2498 = vst.msk [vmem:[%s4074_s12 + $0x48] sm:$0xf] %vm2479_vm2, %v2792_v40  ;;  %v2209_v15 = vadd.f32 %v2208_v48, %v2207_v43  ;;  %v2793_v31 = vpack.c.bf16 %v3018_v7, %v3018_v7  ;;  %v2265_v56 = vmul.f32 %v3018_v7, %v3018_v7  ;;  %v2313_v45 = vsel %vm1433_vm0, %v2264_v1, 0.0 }
 0x1f2   : > { %v2309_v52 = vsel %vm1433_vm0, %v2262_v14, 0.0  ;;  %2496 = vst.msk [vmem:[%s4074_s12 + $0x40] sm:$0xf] %vm2479_vm2, %v2790_v49  ;;  %v2210_v24 = vsel %vm1433_vm0, %v3019_v62, 0.0  ;;  %v2263_v57 = vmul.f32 %v3019_v62, %v3019_v62  ;;  %v2791_v17 = vpack.c.bf16 %v3019_v62, %v3019_v62 }
 0x1f3   : > { %v2310_v51 = vadd.f32 %v2309_v52, %v2308_v54  ;;  %v2211_v11 = vadd.f32 %v2210_v24, %v2209_v15  ;;  %2499 = vst.msk [vmem:[%s4074_s12 + $0x4c] sm:$0xf] %vm2479_vm2, %v2793_v31  ;;  %v2214_v50 = vsel %vm1433_vm0, %v3018_v7, 0.0  ;;  %v2315_v23 = vsel %vm1433_vm0, %v2265_v56, 0.0 }
 0x1f4   : > { %v2311_v55 = vsel %vm1433_vm0, %v2263_v57, 0.0  ;;  %v2954_v22 = vpop.f32.mrb[20].mxu1  ;;  %2497 = vst.msk [vmem:[%s4074_s12 + $0x44] sm:$0xf] %vm2479_vm2, %v2791_v17 }
 0x1f5   : > { %v2213_v39 = vadd.f32 %v2212_v20, %v2211_v11  ;;  %v2312_v63 = vadd.f32 %v2311_v55, %v2310_v51  ;;  %v3020_v18 = vadd.f32 %v2988_v41, %v2954_v22  ;;  %v1893_v32 = vpop.f32.mrb[21].mxu1 }
 0x1f6   : > { %v3021_v0 = vadd.f32 %v2098_v58, %v1893_v32  ;;  %v2955_v25 = vpop.f32.mrb[22].mxu1 }
 0x1f7   : > { %v2314_v44 = vadd.f32 %v2313_v45, %v2312_v63  ;;  %v2796_v42 = vpack.c.bf16 %v3020_v18, %v3020_v18  ;;  %v1896_v37 = vpop.f32.mrb[23].mxu1  ;;  %v2215_v13 = vadd.f32 %v2214_v50, %v2213_v39  ;;  %v3022_v38 = vadd.f32 %v2989_v59, %v2955_v25 }
 0x1f8   : > { %v2216_v27 = vsel %vm1433_vm0, %v3021_v0, 0.0  ;;  %v2266_v47 = vmul.f32 %v3021_v0, %v3021_v0  ;;  %v2794_v30 = vpack.c.bf16 %v3021_v0, %v3021_v0  ;;  %v3023_v16 = vadd.f32 %v2101_v4, %v1896_v37 }
 0x1f9   : > { %2502 = vst.msk [vmem:[%s4074_s12 + $0x58] sm:$0xf] %vm2479_vm2, %v2796_v42  ;;  %v2316_v19 = vadd.f32 %v2315_v23, %v2314_v44  ;;  %v2217_v33 = vadd.f32 %v2216_v27, %v2215_v13  ;;  %v2268_v34 = vmul.f32 %v3020_v18, %v3020_v18  ;;  %v2797_v36 = vpack.c.bf16 %v3022_v38, %v3022_v38 }
 0x1fa   : > { %v2317_v21 = vsel %vm1433_vm0, %v2266_v47, 0.0  ;;  %2500 = vst.msk [vmem:[%s4074_s12 + $0x50] sm:$0xf] %vm2479_vm2, %v2794_v30  ;;  %v2218_v43 = vsel %vm1433_vm0, %v3023_v16, 0.0  ;;  %v2267_v10 = vmul.f32 %v3023_v16, %v3023_v16  ;;  %v2795_v54 = vpack.c.bf16 %v3023_v16, %v3023_v16 }
 0x1fb   : > { %v2318_v9 = vadd.f32 %v2317_v21, %v2316_v19  ;;  %2503 = vst.msk [vmem:[%s4074_s12 + $0x5c] sm:$0xf] %vm2479_vm2, %v2797_v36  ;;  %v2219_v58 = vadd.f32 %v2218_v43, %v2217_v33  ;;  %v2220_v28 = vsel %vm1433_vm0, %v3020_v18, 0.0  ;;  %v2269_v3 = vmul.f32 %v3022_v38, %v3022_v38 }
 0x1fc   : > { %v2958_v41 = vpop.f32.mrb[24].mxu1  ;;  %v2319_v12 = vsel %vm1433_vm0, %v2267_v10, 0.0  ;;  %2501 = vst.msk [vmem:[%s4074_s12 + $0x54] sm:$0xf] %vm2479_vm2, %v2795_v54  ;;  %v2321_v40 = vsel %vm1433_vm0, %v2268_v34, 0.0  ;;  %v2222_v7 = vsel %vm1433_vm0, %v3022_v38, 0.0 }
 0x1fd   : > { %v3024_v59 = vadd.f32 %v4148_v8, %v2958_v41  ;;  %v1909_v4 = vpop.f32.mrb[25].mxu1  ;;  %v2221_v35 = vadd.f32 %v2220_v28, %v2219_v58  ;;  %v2320_v48 = vadd.f32 %v2319_v12, %v2318_v9 }
 0x1fe   : > { %v3025_v6 = vadd.f32 %v4150_v29, %v1909_v4  ;;  %v2959_v46 = vpop.f32.mrb[26].mxu1  ;;  %v2323_v29 = vsel %vm1433_vm0, %v2269_v3, 0.0 }
 0x1ff   : > { %v1912_v8 = vpop.f32.mrb[27].mxu1  ;;  %v2800_v14 = vpack.c.bf16 %v3024_v59, %v3024_v59  ;;  %v2322_v15 = vadd.f32 %v2321_v40, %v2320_v48  ;;  %v2223_v52 = vadd.f32 %v2222_v7, %v2221_v35  ;;  %v3026_v31 = vadd.f32 %v4152_v53, %v2959_v46 }
 0x200   : > { %v2224_v49 = vsel %vm1433_vm0, %v3025_v6, 0.0  ;;  %v2270_v62 = vmul.f32 %v3025_v6, %v3025_v6  ;;  %v2798_v1 = vpack.c.bf16 %v3025_v6, %v3025_v6  ;;  %v3027_v57 = vadd.f32 %v4154_v60, %v1912_v8 }
 0x201   : > { %2506 = vst.msk [vmem:[%s4074_s12 + $0x68] sm:$0xf] %vm2479_vm2, %v2800_v14  ;;  %v2272_v51 = vmul.f32 %v3024_v59, %v3024_v59  ;;  %v2225_v56 = vadd.f32 %v2224_v49, %v2223_v52  ;;  %v2324_v11 = vadd.f32 %v2323_v29, %v2322_v15  ;;  %v2801_v17 = vpack.c.bf16 %v3026_v31, %v3026_v31 }
 0x202   : > { %v2325_v24 = vsel %vm1433_vm0, %v2270_v62, 0.0  ;;  %2504 = vst.msk [vmem:[%s4074_s12 + $0x60] sm:$0xf] %vm2479_vm2, %v2798_v1  ;;  %v2226_v20 = vsel %vm1433_vm0, %v3027_v57, 0.0  ;;  %v2271_v55 = vmul.f32 %v3027_v57, %v3027_v57  ;;  %v2799_v53 = vpack.c.bf16 %v3027_v57, %v3027_v57 }
 0x203   : > { %v2326_v39 = vadd.f32 %v2325_v24, %v2324_v11  ;;  %v2227_v63 = vadd.f32 %v2226_v20, %v2225_v56  ;;  %v2228_v45 = vsel %vm1433_vm0, %v3024_v59, 0.0  ;;  %v2273_v0 = vmul.f32 %v3026_v31, %v3026_v31  ;;  %2507 = vst.msk [vmem:[%s4074_s12 + $0x6c] sm:$0xf] %vm2479_vm2, %v2801_v17 }
 0x204   : > { %v2962_v22 = vpop.f32.mrb[28].mxu1  ;;  %v2327_v60 = vsel %vm1433_vm0, %v2271_v55, 0.0  ;;  %2505 = vst.msk [vmem:[%s4074_s12 + $0x64] sm:$0xf] %vm2479_vm2, %v2799_v53  ;;  %v2329_v23 = vsel %vm1433_vm0, %v2272_v51, 0.0  ;;  %v2230_v44 = vsel %vm1433_vm0, %v3026_v31, 0.0 }
 0x205   : > { %v3028_v18 = vadd.f32 %v4156_v5, %v2962_v22  ;;  %v1925_v32 = vpop.f32.mrb[29].mxu1  ;;  %v2229_v5 = vadd.f32 %v2228_v45, %v2227_v63  ;;  %v2328_v42 = vadd.f32 %v2327_v60, %v2326_v39 }
 0x206   : > { %v3029_v25 = vadd.f32 %v4158_v26, %v1925_v32  ;;  %v2963_v50 = vpop.f32.mrb[30].mxu1  ;;  %v2331_v26 = vsel %vm1433_vm0, %v2273_v0, 0.0 }
 0x207   : > { %v1928_v37 = vpop.f32.mrb[31].mxu1  ;;  %v2804_v13 = vpack.c.bf16 %v3028_v18, %v3028_v18  ;;  %v2330_v19 = vadd.f32 %v2329_v23, %v2328_v42  ;;  %v2231_v38 = vadd.f32 %v2230_v44, %v2229_v5  ;;  %v3030_v16 = vadd.f32 %v4160_v61, %v2963_v50 }
 0x208   : > { %v2232_v27 = vsel %vm1433_vm0, %v3029_v25, 0.0  ;;  %v2274_v47 = vmul.f32 %v3029_v25, %v3029_v25  ;;  %v2802_v30 = vpack.c.bf16 %v3029_v25, %v3029_v25  ;;  %v3031_v21 = vadd.f32 %v4162_v2, %v1928_v37 }
 0x209   : > { %2510 = vst.msk [vmem:[%s4074_s12 + $0x78] sm:$0xf] %vm2479_vm2, %v2804_v13  ;;  %v2276_v34 = vmul.f32 %v3028_v18, %v3028_v18  ;;  %v2233_v9 = vadd.f32 %v2232_v27, %v2231_v38  ;;  %v2332_v36 = vadd.f32 %v2331_v26, %v2330_v19  ;;  %v2805_v43 = vpack.c.bf16 %v3030_v16, %v3030_v16 }
 0x20a   : > { %v2333_v33 = vsel %vm1433_vm0, %v2274_v47, 0.0  ;;  %2508 = vst.msk [vmem:[%s4074_s12 + $0x70] sm:$0xf] %vm2479_vm2, %v2802_v30  ;;  %v2234_v10 = vsel %vm1433_vm0, %v3031_v21, 0.0  ;;  %v2275_v54 = vmul.f32 %v3031_v21, %v3031_v21  ;;  %v2803_v61 = vpack.c.bf16 %v3031_v21, %v3031_v21 }
 0x20b   : > { %v2334_v41 = vadd.f32 %v2333_v33, %v2332_v36  ;;  %v2235_v58 = vadd.f32 %v2234_v10, %v2233_v9  ;;  %v2236_v59 = vsel %vm1433_vm0, %v3028_v18, 0.0  ;;  %v2277_v4 = vmul.f32 %v3030_v16, %v3030_v16  ;;  %2511 = vst.msk [vmem:[%s4074_s12 + $0x7c] sm:$0xf] %vm2479_vm2, %v2805_v43 }
 0x20c   : > { %v2335_v28 = vsel %vm1433_vm0, %v2275_v54, 0.0  ;;  %2509 = vst.msk [vmem:[%s4074_s12 + $0x74] sm:$0xf] %vm2479_vm2, %v2803_v61  ;;  %v2337_v12 = vsel %vm1433_vm0, %v2276_v34, 0.0  ;;  %v2238_v6 = vsel %vm1433_vm0, %v3030_v16, 0.0 }
 0x20d   : > { %v2237_v2 = vadd.f32 %v2236_v59, %v2235_v58  ;;  %v2336_v3 = vadd.f32 %v2335_v28, %v2334_v41  ;;  %v2339_v7 = vsel %vm1433_vm0, %v2277_v4, 0.0 }
 0x20f   : > { %v2239_v46 = vadd.f32 %v2238_v6, %v2237_v2  ;;  %v2338_v40 = vadd.f32 %v2337_v12, %v2336_v3 }
 0x211   : > { %v2240_v35 = vrot.slane %v2239_v46, 4  ;;  %v2340_v48 = vadd.f32 %v2339_v7, %v2338_v40 }
 0x213   : > { %v2241_v8 = vadd.f32 %v2240_v35, %v2239_v46  ;;  %v2341_v14 = vrot.slane %v2340_v48, 4 }
 0x215   : > { %v2242_v49 = vrot.slane %v2241_v8, 2  ;;  %v2342_v62 = vadd.f32 %v2341_v14, %v2340_v48 }
 0x217   : > { %v2243_v1 = vadd.f32 %v2242_v49, %v2241_v8  ;;  %v2343_v15 = vrot.slane %v2342_v62, 2 }
 0x219   : > { %v2244_v52 = vrot.slane %v2243_v1, 1  ;;  %v2344_v31 = vadd.f32 %v2343_v15, %v2342_v62 }
 0x21b   : > { %v2345_v29 = vrot.slane %v2344_v31, 1  ;;  %v2245_v24 = vadd.f32 %v2244_v52, %v2243_v1 }
 0x21d   : > { %v2346_v57 = vadd.f32 %v2345_v29, %v2344_v31 }
 0x21f   : > { %v2348_v51 = vsel %vm2347_vm3, %v2245_v24, %v2346_v57 }
 0x220   : > { %2350 = vst.msk [vmem:[%s392_s16] sm:$0x3] %vm2349_vm5, %v2348_v51 }
 0x221 PF: > { %s17_s23 = sadd.s32 1, %s3307_s23   ;;  %s4256_s21 = smov %s3303_s22 }
 0x222   : > { %p14_p5 = scmp.ge.s32.totalorder %s17_s23, 4   ;;  %s4257_s22 = smov %s4259_s24 }
 0x224   :  { %16 = sbr.rel (!%p14_p5) target bundleno = 2 (0x2), region = 87 }

// kernel: decode_block_forward.5
= control target key start
LH: loop header
LB: loop body
LE: loop exit
PB: predicated region body
PF: predicated region fallthrough
CT: control target
= control target key end

     0   :  { %s4014_s21 = smov 0   ;;  %s4016_s22 = smov 0   ;;  %s5536_s0 = inlined_call_operand.vmem [shape: bf16[2,18,18,4], index: 0, kind: input, shape index: {}, may-alias: {0,1}]   ;;  %s5537_s1 = inlined_call_operand.vmem [shape: bf16[2,18,18,4], index: 1, kind: input, shape index: {}, may-alias: {0,1}]   ;;  %s5538_s2 = inlined_call_operand.vmem [shape: f32[2,18,18,4], index: 2, kind: input, shape index: {}, may-alias: {2,3}]   ;;  %s5539_s3 = inlined_call_operand.vmem [shape: f32[2,18,18,4], index: 3, kind: input, shape index: {}, may-alias: {2,3}]   ;;  %s5540_s4 = inlined_call_operand.vmem [shape: bf16[3,24,4], index: 4, kind: input, shape index: {}]   ;;  %s5541_s5 = inlined_call_operand.vmem [shape: bf16[2,16,16,4], index: 5, kind: output, shape index: {0}]   ;;  %s5542_s6 = inlined_call_operand.vmem [shape: f32[2,1,2,4], index: 6, kind: output, shape index: {1}]  }
   0x1   :  { %s4018_s23 = smov 0  }
   0x2 LB: > { %s29_s24 = sadd.s32 1, %s3968_s22  ;;  %p3043_p0 = scmp.ge.s32.totalorder %s3972_s23, 1  ;;  %s3972_s23 = sphi %s4018_s23, %s17_s23   ;;  %s3968_s22 = sphi %s4016_s22, %s5643_s22   ;;  %s3964_s21 = sphi %s4014_s21, %s5642_s21  }
   0x3   : > { %p31_p1 = scmp.ge.s32.totalorder %s29_s24, 2  ;;  %p329_p2 = scmp.lt.s32.totalorder %s3972_s23, 3 }
   0x5   : > { %s5645_s24 = smov (%p31_p1, %s29_s24), 0  ;;  %p330_p3 = pnand %p3043_p0, %p329_p2 }
   0x7   : > { %333 = sbr.rel (%p330_p3) target bundleno = 587 (0x24b), region = 40 }
   0xe   : > { %p426_p4 = scmp.lt.s32.totalorder %s3964_s21, 1  ;;  %vm721_vm0 = vcmask 1046528   ;;  %vm802_vm1 = vcmask 1045504   ;;  %s3974_s9 = smov 12   ;;  %vm1884_vm2 = vcmask 1043456   ;;  %vm1571_vm3 = vcmask 31744  }
   0xf   : > { %s3975_s10 = smov 4   ;;  %s3976_s11 = smov 8   ;;  %vm1604_vm4 = vcmask 64512   ;;  %vm1637_vm5 = vcmask 97280   ;;  %vm1670_vm6 = vcmask 130048   ;;  %vm1703_vm7 = vcmask 162816  }
  0x10   : > { %s5647_s21 = smov (!%p426_p4, %s3964_s21), 1  ;;  %s3977_s12 = smov 16   ;;  %vm1835_vm8 = vcmask 195584   ;;  %vm2806_vm9 = vcmask 27648   ;;  %vm2674_vm10 = vcmask 1040384   ;;  %vm2676_vm11 = vcmask 25600  }
  0x11   : > { %s3461_s25 = smul.u32 432, %s5647_s21  ;;  %s3978_s17 = smov 20  }
  0x12   : > { %s3459_s29 = smul.u32 216, %s5647_s21 }
  0x13   : > { %s4040_s28 = scalar_lea.vmem %s5538_s2, %s3461_s25 }
  0x14   : > { %v4044_v0 = vld [vmem:[%s4040_s28 + $0x18] sm:$0xff]  ;;  %v4047_v1 = vld [vmem:[%s4040_s28 + $0x20] sm:$0xff]  ;;  %v4055_v4 = vld [vmem:[%s4040_s28 + $0x8] sm:$0xff]  ;;  %s4062_s8 = scalar_lea.vmem %s5536_s0, %s3459_s29  ;;  %s3146_s7 = sadd.s32 192, %s3459_s29 }
  0x15   : > { %v4050_v2 = vld [vmem:[%s4040_s28] sm:$0xff]  ;;  %v3498_v3 = vpack.i.bf16 %v4047_v1, %v4044_v0  ;;  %v937_v5 = vrot.slane %v4047_v1, 1  ;;  %v3218_v7 = vld [vmem:[%s4062_s8 + $0x18] sm:$0xff]   ;;  %v932_v9 = vrot.slane %v4055_v4, 1  ;;  %v513_v14 = vld [vmem:[%s4062_s8 + $0x8] sm:$0x1]  ;;  %s4589_s14 = scalar_lea.vmem %s5537_s1, %s3146_s7 }
  0x16   : > { %v3493_v6 = vpack.i.bf16 %v4055_v4, %v4050_v2  ;;  %v519_v8 = vld [vmem:[%s4062_s8 + $0x20] sm:$0x1]  ;;  %v931_v10 = vrot.slane %v4050_v2, 1  ;;  %v4072_v11 = vunpack.c.l.bf16 %v3218_v7  ;;  %v4074_v12 = vunpack.c.h.bf16 %v3218_v7  ;;  %v514_v15 = vld [vmem:[%s4062_s8 + $0xc] sm:$0xff]   ;;  %v516_v22 = vld [vmem:[%s4062_s8 + $0x14] sm:$0x1] }
  0x17   : > { %3499 = vrot.lane.b32.xlu1 %v3498_v3, %s3974_s9  ;;  %v3183_v13 = vld [vmem:[%s4062_s8] sm:$0xff]   ;;  %v567_v16 = vunpack.c.l.bf16 %v519_v8  ;;  %v561_v19 = vunpack.c.l.bf16 %v513_v14  ;;  %v4087_v23 = vunpack.c.l.bf16 %v514_v15  ;;  %v4089_v24 = vunpack.c.h.bf16 %v514_v15  ;;  %v621_v49 = vld [vmem:[%s4040_s28 + $0x10] sm:$0x3]  ;;  %v4113_v54 = vld [vmem:[%s4040_s28 + $0x38] sm:$0xff] }
  0x18   : > { %3494 = vrot.lane.b32.xlu0 %v3493_v6, %s3974_s9  ;;  %v4080_v17 = vunpack.c.l.bf16 %v3183_v13  ;;  %v4082_v18 = vunpack.c.h.bf16 %v3183_v13  ;;  %v732_v20 = vrot.slane %v4072_v11, 1  ;;  %v733_v21 = vrot.slane %v4074_v12, 1  ;;  %v625_v59 = vld [vmem:[%s4040_s28 + $0x30] sm:$0xff]  ;;  %v4120_v60 = vld [vmem:[%s4040_s28 + $0x40] sm:$0x3] }
  0x19   : > { %v735_v25 = vrot.slane %v567_v16, 1  ;;  %v725_v28 = vrot.slane %v561_v19, 1  ;;  %v806_v32 = vrot.slane %v561_v19, 2  ;;  %v564_v36 = vunpack.c.l.bf16 %v516_v22  ;;  %v624_v6 = vld [vmem:[%s4040_s28 + $0x28] sm:$0x3] }
  0x1a   : > { %v722_v26 = vrot.slane %v4080_v17, 1  ;;  %v723_v27 = vrot.slane %v4082_v18, 1  ;;  %v734_v29 = vsel %vm721_vm0, %v732_v20, %v733_v21  ;;  %v803_v30 = vrot.slane %v4080_v17, 2 }
  0x1b   : > { %v804_v31 = vrot.slane %v4082_v18, 2  ;;  %v736_v33 = vsel %vm721_vm0, %v733_v21, %v735_v25  ;;  %v727_v42 = vrot.slane %v4087_v23, 1  ;;  %v728_v43 = vrot.slane %v4089_v24, 1  ;;  %v520_v21 = vld [vmem:[%s4062_s8 + $0x24] sm:$0xff]  }
  0x1c   : > { %v724_v34 = vsel %vm721_vm0, %v722_v26, %v723_v27  ;;  %v726_v35 = vsel %vm721_vm0, %v723_v27, %v725_v28  ;;  %v3513_v37 = vpack.i.bf16 %v736_v33, %v734_v29  ;;  %v730_v44 = vrot.slane %v564_v36, 1 }
  0x1d   : > { %v3503_v38 = vpack.i.bf16 %v726_v35, %v724_v34  ;;  %v805_v39 = vsel %vm802_vm1, %v803_v30, %v804_v31  ;;  %v807_v40 = vsel %vm802_vm1, %v804_v31, %v806_v32  ;;  %v813_v45 = vrot.slane %v4072_v11, 2 }
  0x1e   : > { %v3518_v41 = vpack.i.bf16 %v807_v40, %v805_v39  ;;  %3514 = vrot.lane.b32.xlu1 %v3513_v37, %s3975_s10  ;;  %v814_v46 = vrot.slane %v4074_v12, 2  ;;  %v816_v47 = vrot.slane %v567_v16, 2  ;;  %v808_v48 = vrot.slane %v4087_v23, 2 }
  0x1f   : > { %3504 = vrot.lane.b32.xlu0 %v3503_v38, %s3975_s10  ;;  %v729_v50 = vsel %vm721_vm0, %v727_v42, %v728_v43  ;;  %v731_v51 = vsel %vm721_vm0, %v728_v43, %v730_v44  ;;  %v809_v52 = vrot.slane %v4089_v24, 2  ;;  %v811_v53 = vrot.slane %v564_v36, 2  ;;  %v3219_v38 = vld [vmem:[%s4062_s8 + $0x30] sm:$0xff]  }
  0x20   : > { %v1017_v55 = vrot.slane %v4047_v1, 2  ;;  %v3508_v56 = vpack.i.bf16 %v731_v51, %v729_v50  ;;  %v815_v57 = vsel %vm802_vm1, %v813_v45, %v814_v46  ;;  %v817_v58 = vsel %vm802_vm1, %v814_v46, %v816_v47  ;;  %v525_v45 = vld [vmem:[%s4062_s8 + $0x38] sm:$0x1] }
  0x21   : > { %v936_v61 = vrot.slane %v4044_v0, 1  ;;  %v810_v62 = vsel %vm802_vm1, %v808_v48, %v809_v52  ;;  %v812_v63 = vsel %vm802_vm1, %v809_v52, %v811_v53  ;;  %v934_v3 = vrot.slane %v621_v49, 1 }
  0x22   : > { %3519 = vrot.lane.b32.xlu1 %v3518_v41, %s3976_s11  ;;  %v3533_v7 = vpack.i.bf16 %v817_v58, %v815_v57  ;;  %v3523_v8 = vpack.i.bf16 %v812_v63, %v810_v62  ;;  %v933_v13 = vsel %vm721_vm0, %v931_v10, %v932_v9  ;;  %v942_v14 = vrot.slane %v4113_v54, 1  ;;  %v522_v10 = vld [vmem:[%s4062_s8 + $0x2c] sm:$0x1] }
  0x23   : > { %3509 = vrot.lane.b32.xlu0 %v3508_v56, %s3975_s10  ;;  %v1016_v15 = vrot.slane %v4044_v0, 2  ;;  %v935_v16 = vsel %vm721_vm0, %v932_v9, %v934_v3  ;;  %v941_v19 = vrot.slane %v625_v59, 1  ;;  %v944_v20 = vrot.slane %v4120_v60, 1  ;;  %v3944_v62 = vld [vmem:[%s5540_s4 + $0xc] sm:$0xff]  }
  0x24   : > { %v1012_v22 = vrot.slane %v4055_v4, 2  ;;  %v1011_v25 = vrot.slane %v4050_v2, 2  ;;  %v3528_v26 = vpack.i.bf16 %v4113_v54, %v625_v59  ;;  %v939_v27 = vrot.slane %v624_v6, 1  ;;  %3279 = vmatprep.subr.bf16.mxu1 %v3944_v62 }
  0x25   : > { %v3538_v28 = vpack.i.bf16 %v935_v16, %v933_v13  ;;  %v943_v0 = vsel %vm721_vm0, %v941_v19, %v942_v14  ;;  %v938_v9 = vsel %vm721_vm0, %v936_v61, %v937_v5  ;;  %v1019_v29 = vrot.slane %v624_v6, 2  ;;  %v4187_v61 = vld [vmem:[%s5540_s4] sm:$0xff]   ;;  %3280 = vmatpush3.bf16.msra.mxu1 %v3944_v62 }
  0x26   : > { %3534 = vrot.lane.b32.xlu1 %v3533_v7, %s3976_s11  ;;  %v945_v4 = vsel %vm721_vm0, %v942_v14, %v944_v20  ;;  %v940_v2 = vsel %vm721_vm0, %v937_v5, %v939_v27  ;;  %v1014_v30 = vrot.slane %v621_v49, 2  ;;  %v4154_v31 = vunpack.c.l.bf16 %v520_v21  ;;  %v628_v7 = vld [vmem:[%s4040_s28 + $0x48] sm:$0xff]  ;;  %3315 = vmatprep.subr.bf16.mxu0 %v4187_v61 }
  0x27   : > { %3524 = vrot.lane.b32.xlu0 %v3523_v8, %s3976_s11  ;;  %v4156_v32 = vunpack.c.h.bf16 %v520_v21  ;;  %v570_v33 = vunpack.c.l.bf16 %v522_v10  ;;  %v1022_v34 = vrot.slane %v4113_v54, 2  ;;  %v1021_v35 = vrot.slane %v625_v59, 2  ;;  %v629_v8 = vld [vmem:[%s4040_s28 + $0x50] sm:$0xff]  ;;  %v630_v21 = vld [vmem:[%s4040_s28 + $0x58] sm:$0x3]  ;;  %3316 = vmatpush3.bf16.msra.mxu0 %v4187_v61  ;;  %v632_v27 = vld [vmem:[%s4040_s28 + $0x68] sm:$0xff] }
  0x28   : > { %v1018_v36 = vsel %vm802_vm1, %v1016_v15, %v1017_v55  ;;  %v1013_v37 = vsel %vm802_vm1, %v1011_v25, %v1012_v22  ;;  %v3548_v39 = vpack.i.bf16 %v945_v4, %v943_v0  ;;  %v3543_v40 = vpack.i.bf16 %v940_v2, %v938_v9  ;;  %v633_v4 = vld [vmem:[%s4040_s28 + $0x70] sm:$0x3] }
  0x29   : > { %v1020_v1 = vsel %vm802_vm1, %v1017_v55, %v1019_v29  ;;  %v1015_v5 = vsel %vm802_vm1, %v1012_v22, %v1014_v30  ;;  %v737_v41 = vrot.slane %v4154_v31, 1  ;;  %v738_v42 = vrot.slane %v4156_v32, 1  ;;  %v631_v29 = vld [vmem:[%s4040_s28 + $0x60] sm:$0xff] }
  0x2a   : > { %3539 = vrot.lane.b32.xlu1 %v3538_v28, %s3977_s12  ;;  %v740_v43 = vrot.slane %v570_v33, 1  ;;  %v1024_v44 = vrot.slane %v4120_v60, 2  ;;  %v4170_v46 = vunpack.c.l.bf16 %v3219_v38  ;;  %v4172_v47 = vunpack.c.h.bf16 %v3219_v38  ;;  %v526_v30 = vld [vmem:[%s4062_s8 + $0x3c] sm:$0xff]  }
  0x2b   : > { %3529 = vrot.lane.b32.xlu0 %v3528_v26, %s3974_s9  ;;  %v3558_v48 = vpack.i.bf16 %v1020_v1, %v1018_v36  ;;  %v1023_v49 = vsel %vm802_vm1, %v1021_v35, %v1022_v34  ;;  %v3553_v50 = vpack.i.bf16 %v1015_v5, %v1013_v37  ;;  %v818_v51 = vrot.slane %v4154_v31, 2 }
  0x2c   : > { %5569 = vst [vmem:[#allocation2_spill] sm:$0xff] %v4170_v46  ;;  %5570 = vst [vmem:[#allocation3_spill] sm:$0xff] %v4172_v47  ;;  %v819_v52 = vrot.slane %v4156_v32, 2  ;;  %v573_v53 = vunpack.c.l.bf16 %v525_v45  ;;  %v739_v54 = vsel %vm721_vm0, %v737_v41, %v738_v42  ;;  %v741_v55 = vsel %vm721_vm0, %v738_v42, %v740_v43 }
  0x2d   : > { %v1025_v56 = vsel %vm802_vm1, %v1022_v34, %v1024_v44  ;;  %v821_v57 = vrot.slane %v570_v33, 2  ;;  %v742_v58 = vrot.slane %v4170_v46, 1  ;;  %v743_v59 = vrot.slane %v4172_v47, 1  ;;  %v528_v33 = vld [vmem:[%s4062_s8 + $0x44] sm:$0x1] }
  0x2e   : > { %3549 = vrot.lane.b32.xlu1 %v3548_v39, %s3977_s12  ;;  %v745_v60 = vrot.slane %v573_v53, 1  ;;  %v3568_v63 = vpack.i.bf16 %v741_v55, %v739_v54  ;;  %v3563_v3 = vpack.i.bf16 %v1025_v56, %v1023_v49  ;;  %v820_v6 = vsel %vm802_vm1, %v818_v51, %v819_v52  ;;  %v531_v51 = vld [vmem:[%s4062_s8 + $0x50] sm:$0x1] }
  0x2f   : > { %3544 = vrot.lane.b32.xlu0 %v3543_v40, %s3977_s12  ;;  %v822_v13 = vsel %vm802_vm1, %v819_v52, %v821_v57  ;;  %v823_v14 = vrot.slane %v4170_v46, 2  ;;  %v824_v15 = vrot.slane %v4172_v47, 2  ;;  %v826_v16 = vrot.slane %v573_v53, 2 }
  0x30   : > { %v744_v19 = vsel %vm721_vm0, %v742_v58, %v743_v59  ;;  %v746_v20 = vsel %vm721_vm0, %v743_v59, %v745_v60  ;;  %v947_v22 = vrot.slane %v629_v8, 1  ;;  %v946_v25 = vrot.slane %v628_v7, 1 }
  0x31   : > { %v3578_v26 = vpack.i.bf16 %v822_v13, %v820_v6  ;;  %v3573_v10 = vpack.i.bf16 %v746_v20, %v744_v19  ;;  %v825_v28 = vsel %vm802_vm1, %v823_v14, %v824_v15  ;;  %v827_v0 = vsel %vm802_vm1, %v824_v15, %v826_v16 }
  0x32   : > { %3559 = vrot.lane.b32.xlu1 %v3558_v48, %s3978_s17  ;;  %v949_v9 = vrot.slane %v630_v21, 1  ;;  %v1027_v2 = vrot.slane %v629_v8, 2  ;;  %v3588_v34 = vpack.i.bf16 %v629_v8, %v628_v7  ;;  %v1026_v35 = vrot.slane %v628_v7, 2 }
  0x33   : > { %3554 = vrot.lane.b32.xlu0 %v3553_v50, %s3978_s17  ;;  %v948_v36 = vsel %vm721_vm0, %v946_v25, %v947_v22  ;;  %v952_v37 = vrot.slane %v632_v27, 1  ;;  %v3583_v38 = vpack.i.bf16 %v827_v0, %v825_v28  ;;  %v951_v39 = vrot.slane %v631_v29, 1  ;;  %v3220_v50 = vld [vmem:[%s4062_s8 + $0x48] sm:$0xff]   ;;  %v635_v28 = vld [vmem:[%s4040_s28 + $0x80] sm:$0xff] }
  0x34   : > { %v1029_v40 = vrot.slane %v630_v21, 2  ;;  %v954_v1 = vrot.slane %v633_v4, 1  ;;  %v950_v5 = vsel %vm721_vm0, %v947_v22, %v949_v9  ;;  %v4218_v41 = vunpack.c.l.bf16 %v526_v30 }
  0x35   : > { %v4220_v42 = vunpack.c.h.bf16 %v526_v30  ;;  %v576_v43 = vunpack.c.l.bf16 %v528_v33  ;;  %v1032_v44 = vrot.slane %v632_v27, 2  ;;  %v3593_v45 = vpack.i.bf16 %v632_v27, %v631_v29 }
  0x36   : > { %3569 = vrot.lane.b32.xlu1 %v3568_v63, %s3975_s10  ;;  %5571 = vst [vmem:[#allocation4_spill] sm:$0xff] %v4218_v41  ;;  %v1031_v48 = vrot.slane %v631_v29, 2  ;;  %v1028_v49 = vsel %vm802_vm1, %v1026_v35, %v1027_v2  ;;  %v3598_v52 = vpack.i.bf16 %v950_v5, %v948_v36  ;;  %v1030_v53 = vsel %vm802_vm1, %v1027_v2, %v1029_v40  ;;  %v636_v2 = vld [vmem:[%s4040_s28 + $0x88] sm:$0x3]  ;;  %v638_v5 = vld [vmem:[%s4040_s28 + $0x98] sm:$0xff] }
  0x37   : > { %3564 = vrot.lane.b32.xlu0 %v3563_v3, %s3978_s17  ;;  %5572 = vst [vmem:[#allocation5_spill] sm:$0xff] %v4220_v42  ;;  %v953_v54 = vsel %vm721_vm0, %v951_v39, %v952_v37  ;;  %v955_v55 = vsel %vm721_vm0, %v952_v37, %v954_v1  ;;  %v747_v56 = vrot.slane %v4218_v41, 1  ;;  %v748_v57 = vrot.slane %v4220_v42, 1  ;;  %v637_v1 = vld [vmem:[%s4040_s28 + $0x90] sm:$0xff] }
  0x38   : > { %v750_v58 = vrot.slane %v576_v43, 1  ;;  %v1034_v59 = vrot.slane %v633_v4, 2  ;;  %v4232_v60 = vunpack.c.l.bf16 %v3220_v50  ;;  %v4234_v62 = vunpack.c.h.bf16 %v3220_v50 }
  0x39   : > { %v579_v63 = vunpack.c.l.bf16 %v531_v51  ;;  %v1033_v3 = vsel %vm802_vm1, %v1031_v48, %v1032_v44  ;;  %v3608_v6 = vpack.i.bf16 %v1030_v53, %v1028_v49  ;;  %v3603_v7 = vpack.i.bf16 %v955_v55, %v953_v54  ;;  %v534_v51 = vld [vmem:[%s4062_s8 + $0x5c] sm:$0x1] }
  0x3a   : > { %3579 = vrot.lane.b32.xlu1 %v3578_v26, %s3976_s11  ;;  %5573 = vst [vmem:[#allocation6_spill] sm:$0xff] %v4232_v60  ;;  %5574 = vst [vmem:[#allocation7_spill] sm:$0xff] %v4234_v62  ;;  %v828_v8 = vrot.slane %v4218_v41, 2  ;;  %v829_v13 = vrot.slane %v4220_v42, 2  ;;  %v749_v14 = vsel %vm721_vm0, %v747_v56, %v748_v57  ;;  %v751_v15 = vsel %vm721_vm0, %v748_v57, %v750_v58 }
  0x3b   : > { %3574 = vrot.lane.b32.xlu0 %v3573_v10, %s3975_s10  ;;  %v1035_v16 = vsel %vm802_vm1, %v1032_v44, %v1034_v59  ;;  %v831_v19 = vrot.slane %v576_v43, 2  ;;  %v752_v20 = vrot.slane %v4232_v60, 1  ;;  %v753_v21 = vrot.slane %v4234_v62, 1  ;;  %v634_v10 = vld [vmem:[%s4040_s28 + $0x78] sm:$0xff]  ;;  %v639_v43 = vld [vmem:[%s4040_s28 + $0xa0] sm:$0x3] }
  0x3c   : > { %v755_v22 = vrot.slane %v579_v63, 1  ;;  %v3618_v25 = vpack.i.bf16 %v751_v15, %v749_v14  ;;  %v3613_v26 = vpack.i.bf16 %v1035_v16, %v1033_v3  ;;  %v830_v27 = vsel %vm802_vm1, %v828_v8, %v829_v13  ;;  %v532_v44 = vld [vmem:[%s4062_s8 + $0x54] sm:$0xff]   ;;  %v3221_v8 = vld [vmem:[%s4062_s8 + $0x60] sm:$0xff]  }
  0x3d   : > { %v832_v0 = vsel %vm802_vm1, %v829_v13, %v831_v19  ;;  %v833_v9 = vrot.slane %v4232_v60, 2  ;;  %v834_v29 = vrot.slane %v4234_v62, 2  ;;  %v836_v4 = vrot.slane %v579_v63, 2  ;;  %v537_v13 = vld [vmem:[%s4062_s8 + $0x68] sm:$0x1] }
  0x3e   : > { %3589 = vrot.lane.b32.xlu1 %v3588_v34, %s3974_s9  ;;  %v754_v30 = vsel %vm721_vm0, %v752_v20, %v753_v21  ;;  %v756_v33 = vsel %vm721_vm0, %v753_v21, %v755_v22  ;;  %v957_v34 = vrot.slane %v635_v28, 1  ;;  %v956_v35 = vrot.slane %v634_v10, 1 }
  0x3f   : > { %3584 = vrot.lane.b32.xlu0 %v3583_v38, %s3976_s11  ;;  %v3628_v36 = vpack.i.bf16 %v832_v0, %v830_v27  ;;  %v959_v37 = vrot.slane %v636_v2, 1  ;;  %v3623_v38 = vpack.i.bf16 %v756_v33, %v754_v30  ;;  %v835_v39 = vsel %vm802_vm1, %v833_v9, %v834_v29 }
  0x40   : > { %v837_v40 = vsel %vm802_vm1, %v834_v29, %v836_v4  ;;  %v3638_v48 = vpack.i.bf16 %v635_v28, %v634_v10  ;;  %v1036_v49 = vrot.slane %v634_v10, 2  ;;  %v958_v50 = vsel %vm721_vm0, %v956_v35, %v957_v34 }
  0x41   : > { %v960_v53 = vsel %vm721_vm0, %v957_v34, %v959_v37  ;;  %v962_v54 = vrot.slane %v638_v5, 1  ;;  %v961_v55 = vrot.slane %v637_v1, 1  ;;  %v1039_v56 = vrot.slane %v636_v2, 2 }
  0x42   : > { %3599 = vrot.lane.b32.xlu1 %v3598_v52, %s3977_s12  ;;  %v3633_v52 = vpack.i.bf16 %v837_v40, %v835_v39  ;;  %v964_v57 = vrot.slane %v639_v43, 1  ;;  %v4270_v58 = vunpack.c.l.bf16 %v532_v44  ;;  %v4272_v59 = vunpack.c.h.bf16 %v532_v44  ;;  %v641_v44 = vld [vmem:[%s4040_s28 + $0xb0] sm:$0xff] }
  0x43   : > { %3594 = vrot.lane.b32.xlu0 %v3593_v45, %s3974_s9  ;;  %v1037_v45 = vrot.slane %v635_v28, 2  ;;  %v582_v63 = vunpack.c.l.bf16 %v534_v51  ;;  %v3648_v3 = vpack.i.bf16 %v960_v53, %v958_v50  ;;  %v1041_v14 = vrot.slane %v637_v1, 2 }
  0x44   : > { %5575 = vst [vmem:[#allocation8_spill] sm:$0xff] %v4270_v58  ;;  %5576 = vst [vmem:[#allocation9_spill] sm:$0xff] %v4272_v59  ;;  %v963_v16 = vsel %vm721_vm0, %v961_v55, %v962_v54  ;;  %v1044_v19 = vrot.slane %v639_v43, 2  ;;  %v965_v21 = vsel %vm721_vm0, %v962_v54, %v964_v57  ;;  %v757_v22 = vrot.slane %v4270_v58, 1  ;;  %v640_v43 = vld [vmem:[%s4040_s28 + $0xa8] sm:$0xff] }
  0x45   : > { %v1038_v15 = vsel %vm802_vm1, %v1036_v49, %v1037_v45  ;;  %v1040_v20 = vsel %vm802_vm1, %v1037_v45, %v1039_v56  ;;  %v4284_v27 = vunpack.c.l.bf16 %v3221_v8  ;;  %v4286_v10 = vunpack.c.h.bf16 %v3221_v8  ;;  %v644_v8 = vld [vmem:[%s4040_s28 + $0xc8] sm:$0xff] }
  0x46   : > { %3609 = vrot.lane.b32.xlu1 %v3608_v6, %s3978_s17  ;;  %v1042_v6 = vrot.slane %v638_v5, 2  ;;  %v585_v28 = vunpack.c.l.bf16 %v537_v13  ;;  %v3658_v0 = vpack.i.bf16 %v1040_v20, %v1038_v15  ;;  %v3653_v9 = vpack.i.bf16 %v965_v21, %v963_v16  ;;  %v643_v16 = vld [vmem:[%s4040_s28 + $0xc0] sm:$0xff] }
  0x47   : > { %3604 = vrot.lane.b32.xlu0 %v3603_v7, %s3977_s12  ;;  %v3643_v7 = vpack.i.bf16 %v638_v5, %v637_v1  ;;  %5577 = vst [vmem:[#allocation10_spill] sm:$0xff] %v4284_v27  ;;  %5578 = vst [vmem:[#allocation11_spill] sm:$0xff] %v4286_v10  ;;  %v838_v30 = vrot.slane %v4270_v58, 2  ;;  %v839_v33 = vrot.slane %v4272_v59, 2  ;;  %v841_v34 = vrot.slane %v582_v63, 2 }
  0x48   : > { %v1043_v29 = vsel %vm802_vm1, %v1041_v14, %v1042_v6  ;;  %v1045_v4 = vsel %vm802_vm1, %v1042_v6, %v1044_v19  ;;  %v763_v37 = vrot.slane %v4286_v10, 1  ;;  %v843_v45 = vrot.slane %v4284_v27, 2  ;;  %v645_v19 = vld [vmem:[%s4040_s28 + $0xd0] sm:$0x3] }
  0x49   : > { %v3663_v39 = vpack.i.bf16 %v1045_v4, %v1043_v29  ;;  %v840_v1 = vsel %vm802_vm1, %v838_v30, %v839_v33  ;;  %v842_v5 = vsel %vm802_vm1, %v839_v33, %v841_v34  ;;  %v844_v50 = vrot.slane %v4286_v10, 2  ;;  %v543_v34 = vld [vmem:[%s4062_s8 + $0x80] sm:$0x1] }
  0x4a   : > { %3619 = vrot.lane.b32.xlu1 %v3618_v25, %s3975_s10  ;;  %v758_v25 = vrot.slane %v4272_v59, 1  ;;  %v846_v51 = vrot.slane %v585_v28, 2  ;;  %v967_v53 = vrot.slane %v641_v44, 1  ;;  %v966_v54 = vrot.slane %v640_v43, 1 }
  0x4b   : > { %3614 = vrot.lane.b32.xlu0 %v3613_v26, %s3978_s17  ;;  %v760_v26 = vrot.slane %v582_v63, 1  ;;  %v3678_v55 = vpack.i.bf16 %v842_v5, %v840_v1  ;;  %v538_v63 = vld [vmem:[%s4062_s8 + $0x6c] sm:$0xff]   ;;  %v845_v6 = vsel %vm802_vm1, %v843_v45, %v844_v50  ;;  %v1047_v13 = vrot.slane %v641_v44, 2 }
  0x4c   : > { %v759_v2 = vsel %vm721_vm0, %v757_v22, %v758_v25  ;;  %v3688_v14 = vpack.i.bf16 %v641_v44, %v640_v43  ;;  %v1046_v15 = vrot.slane %v640_v43, 2  ;;  %v968_v20 = vsel %vm721_vm0, %v966_v54, %v967_v53 }
  0x4d   : > { %v761_v35 = vsel %vm721_vm0, %v758_v25, %v760_v26  ;;  %v4319_v21 = vunpack.c.l.bf16 %v538_v63  ;;  %v4321_v22 = vunpack.c.h.bf16 %v538_v63  ;;  %v3222_v26 = vld [vmem:[%s4062_s8 + $0x78] sm:$0xff]   ;;  %v1052_v29 = vrot.slane %v644_v8, 2 }
  0x4e   : > { %3629 = vrot.lane.b32.xlu1 %v3628_v36, %s3976_s11  ;;  %v762_v36 = vrot.slane %v4284_v27, 1  ;;  %v3668_v40 = vpack.i.bf16 %v761_v35, %v759_v2  ;;  %v971_v4 = vrot.slane %v643_v16, 1  ;;  %v1051_v2 = vrot.slane %v643_v16, 2 }
  0x4f   : > { %3624 = vrot.lane.b32.xlu0 %v3623_v38, %s3975_s10  ;;  %v765_v38 = vrot.slane %v585_v28, 1  ;;  %5579 = vst [vmem:[#allocation12_spill] sm:$0xff] %v4319_v21  ;;  %5580 = vst [vmem:[#allocation13_spill] sm:$0xff] %v4321_v22  ;;  %v974_v33 = vrot.slane %v645_v19, 1  ;;  %v1054_v35 = vrot.slane %v645_v19, 2  ;;  %v3693_v5 = vpack.i.bf16 %v644_v8, %v643_v16 }
  0x50   : > { %v1048_v43 = vsel %vm802_vm1, %v1046_v15, %v1047_v13  ;;  %v591_v44 = vunpack.c.l.bf16 %v543_v34  ;;  %v546_v34 = vld [vmem:[%s4062_s8 + $0x8c] sm:$0x1] }
  0x51   : > { %v766_v49 = vsel %vm721_vm0, %v763_v37, %v765_v38  ;;  %v768_v38 = vrot.slane %v4321_v22, 1 }
  0x52   : > { %3639 = vrot.lane.b32.xlu1 %v3638_v48, %s3974_s9  ;;  %v764_v48 = vsel %vm721_vm0, %v762_v36, %v763_v37  ;;  %v4328_v36 = vunpack.c.l.bf16 %v3222_v26  ;;  %v767_v37 = vrot.slane %v4319_v21, 1 }
  0x53   : > { %3634 = vrot.lane.b32.xlu0 %v3633_v52, %s3976_s11  ;;  %v642_v52 = vld [vmem:[%s4040_s28 + $0xb8] sm:$0x3]  ;;  %v3673_v56 = vpack.i.bf16 %v766_v49, %v764_v48 }
  0x54   : > { %v969_v57 = vrot.slane %v642_v52, 1  ;;  %v1049_v30 = vrot.slane %v642_v52, 2  ;;  %5581 = vst [vmem:[#allocation14_spill] sm:$0xff] %v4328_v36  ;;  %v848_v52 = vrot.slane %v4319_v21, 2  ;;  %v663_v21 = vld [vmem:[%s4040_s28 + $0x160] sm:$0x3] }
  0x56   : > { %3649 = vrot.lane.b32.xlu1 %v3648_v3, %s3977_s12  ;;  %v540_v3 = vld [vmem:[%s4062_s8 + $0x74] sm:$0x1]  ;;  %v1050_v45 = vsel %vm802_vm1, %v1047_v13, %v1049_v30  ;;  %v4354_v13 = vld [vmem:[%s4040_s28 + $0xe0] sm:$0xff] }
  0x57   : > { %3644 = vrot.lane.b32.xlu0 %v3643_v7, %s3974_s9  ;;  %v847_v7 = vsel %vm802_vm1, %v844_v50, %v846_v51  ;;  %v588_v25 = vunpack.c.l.bf16 %v540_v3  ;;  %v1053_v50 = vsel %vm802_vm1, %v1051_v2, %v1052_v29  ;;  %v1055_v51 = vsel %vm802_vm1, %v1052_v29, %v1054_v35 }
  0x58   : > { %v3683_v28 = vpack.i.bf16 %v847_v7, %v845_v6  ;;  %v3708_v3 = vpack.i.bf16 %v1050_v45, %v1048_v43  ;;  %v775_v7 = vrot.slane %v591_v44, 1  ;;  %v3713_v16 = vpack.i.bf16 %v1055_v51, %v1053_v50  ;;  %v651_v43 = vld [vmem:[%s4040_s28 + $0x100] sm:$0x3] }
  0x59   : > { %v851_v54 = vrot.slane %v588_v25, 2  ;;  %v856_v2 = vrot.slane %v591_v44, 2  ;;  %v594_v51 = vunpack.c.l.bf16 %v546_v34  ;;  %v3946_v34 = vld [vmem:[%s5540_s4 + $0x14] ss:$0 sps:$4 sm:$0xff]  }
  0x5a   : > { %3659 = vrot.lane.b32.xlu1 %v3658_v0, %s3978_s17  ;;  %v970_v0 = vsel %vm721_vm0, %v967_v53, %v969_v57  ;;  %v849_v53 = vrot.slane %v4321_v22, 2  ;;  %v772_v57 = vrot.slane %v4328_v36, 1  ;;  %3455 = vmatprep.subr.msk.bf16.mxu1 %vm1884_vm2, %v3946_v34 }
  0x5b   : > { %3654 = vrot.lane.b32.xlu0 %v3653_v9, %s3977_s12  ;;  %v972_v9 = vrot.slane %v644_v8, 1  ;;  %v3698_v1 = vpack.i.bf16 %v970_v0, %v968_v20  ;;  %v4351_v8 = vld [vmem:[%s4040_s28 + $0xd8] sm:$0xff]  ;;  %v853_v0 = vrot.slane %v4328_v36, 2 }
  0x5c   : > { %v850_v19 = vsel %vm802_vm1, %v848_v52, %v849_v53  ;;  %v852_v20 = vsel %vm802_vm1, %v849_v53, %v851_v54 }
  0x5d   : > { %v973_v48 = vsel %vm721_vm0, %v971_v4, %v972_v9  ;;  %v975_v49 = vsel %vm721_vm0, %v972_v9, %v974_v33  ;;  %v544_v9 = vld [vmem:[%s4062_s8 + $0x84] sm:$0xff]   ;;  %v4369_v33 = vld [vmem:[%s4040_s28 + $0xf8] sm:$0xff]  ;;  %v3728_v35 = vpack.i.bf16 %v852_v20, %v850_v19 }
  0x5e   : > { %3669 = vrot.lane.b32.xlu1 %v3668_v40, %s3975_s10  ;;  %v4332_v40 = vunpack.c.h.bf16 %v3222_v26  ;;  %v3703_v6 = vpack.i.bf16 %v975_v49, %v973_v48  ;;  %v977_v26 = vrot.slane %v4354_v13, 1  ;;  %v4380_v45 = vunpack.c.l.bf16 %v544_v9 }
  0x5f   : > { %3664 = vrot.lane.b32.xlu0 %v3663_v39, %s3978_s17  ;;  %v770_v39 = vrot.slane %v588_v25, 1  ;;  %v4382_v44 = vunpack.c.h.bf16 %v544_v9  ;;  %v982_v50 = vrot.slane %v4369_v33, 1 }
  0x60   : > { %5582 = vst [vmem:[#allocation15_spill] sm:$0xff] %v4332_v40  ;;  %v773_v63 = vrot.slane %v4332_v40, 1  ;;  %v854_v4 = vrot.slane %v4332_v40, 2  ;;  %5583 = vst [vmem:[#allocation16_spill] sm:$0xff] %v4380_v45  ;;  %v858_v19 = vrot.slane %v4380_v45, 2  ;;  %v4639_v40 = vld [vmem:[%s4040_s28 + $0x158] sm:$0xff] }
  0x61   : > { %5584 = vst [vmem:[#allocation17_spill] sm:$0xff] %v4382_v44  ;;  %v859_v20 = vrot.slane %v4382_v44, 2 }
  0x62   : > { %3679 = vrot.lane.b32.xlu1 %v3678_v55, %s3976_s11  ;;  %v769_v55 = vsel %vm721_vm0, %v767_v37, %v768_v38  ;;  %v774_v25 = vsel %vm721_vm0, %v772_v57, %v773_v63  ;;  %v776_v29 = vsel %vm721_vm0, %v773_v63, %v775_v7  ;;  %v1057_v37 = vrot.slane %v4354_v13, 2  ;;  %v549_v7 = vld [vmem:[%s4062_s8 + $0x98] sm:$0x1] }
  0x63   : > { %3674 = vrot.lane.b32.xlu0 %v3673_v56, %s3975_s10  ;;  %v771_v56 = vsel %vm721_vm0, %v768_v38, %v770_v39  ;;  %v1056_v38 = vrot.slane %v4351_v8, 2  ;;  %v3738_v39 = vpack.i.bf16 %v4354_v13, %v4351_v8  ;;  %v3723_v48 = vpack.i.bf16 %v776_v29, %v774_v25 }
  0x64   : > { %v3718_v15 = vpack.i.bf16 %v771_v56, %v769_v55  ;;  %v855_v52 = vsel %vm802_vm1, %v853_v0, %v854_v4  ;;  %v857_v53 = vsel %vm802_vm1, %v854_v4, %v856_v2  ;;  %v1062_v55 = vrot.slane %v4369_v33, 2 }
  0x65   : > { %v4399_v63 = vsel %vm802_vm1, %v1056_v38, %v1057_v37  ;;  %v777_v13 = vrot.slane %v4380_v45, 1  ;;  %v861_v25 = vrot.slane %v594_v51, 2  ;;  %v597_v9 = vunpack.c.l.bf16 %v549_v7 }
  0x66   : > { %3689 = vrot.lane.b32.xlu1 %v3688_v14, %s3974_s9  ;;  %v648_v14 = vld [vmem:[%s4040_s28 + $0xe8] sm:$0x3] }
  0x67   : > { %3684 = vrot.lane.b32.xlu0 %v3683_v28, %s3976_s11  ;;  %v976_v28 = vrot.slane %v4351_v8, 1  ;;  %v979_v30 = vrot.slane %v648_v14, 1 }
  0x69   : > { %v4385_v49 = vsel %vm721_vm0, %v976_v28, %v977_v26  ;;  %v4393_v54 = vsel %vm721_vm0, %v977_v26, %v979_v30  ;;  %v3733_v26 = vpack.i.bf16 %v857_v53, %v855_v52  ;;  %v4426_v30 = vld [vmem:[%s5540_s4 + $0x8] ss:$0 sps:$4 sm:$0xff]  }
  0x6a   : > { %3699 = vrot.lane.b32.xlu1 %v3698_v1, %s3977_s12  ;;  %v4377_v1 = vld [vmem:[%s4040_s28 + $0xf0] sm:$0xff]  ;;  %v3748_v29 = vpack.i.bf16 %v4393_v54, %v4385_v49  ;;  %v4453_v49 = vsel %vm802_vm1, %v858_v19, %v859_v20  ;;  %v785_v54 = vrot.slane %v597_v9, 1  ;;  %3456 = vmatprep.subr.msk.bf16.mxu0 %vm1884_vm2, %v4426_v30  ;;  %v866_v19 = vrot.slane %v597_v9, 2 }
  0x6b   : > { %3694 = vrot.lane.b32.xlu0 %v3693_v5, %s3974_s9  ;;  %v1059_v5 = vrot.slane %v648_v14, 2  ;;  %v981_v56 = vrot.slane %v4377_v1, 1  ;;  %v1061_v57 = vrot.slane %v4377_v1, 2  ;;  %v778_v14 = vrot.slane %v4382_v44, 1 }
  0x6c   : > { %v3743_v4 = vpack.i.bf16 %v4369_v33, %v4377_v1  ;;  %v4441_v1 = vld [vmem:[%s4040_s28 + $0x108] sm:$0xff] }
  0x6d   : > { %v4404_v8 = vsel %vm802_vm1, %v1057_v37, %v1059_v5  ;;  %v4421_v2 = vsel %vm721_vm0, %v981_v56, %v982_v50  ;;  %v4435_v38 = vsel %vm802_vm1, %v1061_v57, %v1062_v55  ;;  %v4444_v5 = vld [vmem:[%s4040_s28 + $0x110] sm:$0xff]  ;;  %v986_v57 = vrot.slane %v4441_v1, 1 }
  0x6e   : > { %3709 = vrot.lane.b32.xlu1 %v3708_v3, %s3978_s17  ;;  %v984_v3 = vrot.slane %v651_v43, 1  ;;  %v987_v56 = vrot.slane %v4444_v5, 1 }
  0x6f   : > { %3704 = vrot.lane.b32.xlu0 %v3703_v6, %s3977_s12  ;;  %v3223_v6 = vld [vmem:[%s4062_s8 + $0x90] sm:$0xff]  }
  0x70   : > { %v4412_v28 = vunpack.c.l.bf16 %v3223_v6  ;;  %v4414_v0 = vunpack.c.h.bf16 %v3223_v6  ;;  %v985_v37 = vsel %vm721_vm0, %v982_v50, %v984_v3  ;;  %v4456_v50 = vsel %vm802_vm1, %v859_v20, %v861_v25  ;;  %v654_v20 = vld [vmem:[%s4040_s28 + $0x118] sm:$0x3]  ;;  %v4492_v25 = vld [vmem:[%s4040_s28 + $0x128] sm:$0xff] }
  0x72   : > { %3719 = vrot.lane.b32.xlu1 %v3718_v15, %s3975_s10  ;;  %v1064_v15 = vrot.slane %v651_v43, 2  ;;  %5585 = vst [vmem:[#allocation18_spill] sm:$0xff] %v4412_v28  ;;  %5586 = vst [vmem:[#allocation19_spill] sm:$0xff] %v4414_v0  ;;  %v4447_v43 = vsel %vm721_vm0, %v777_v13, %v778_v14  ;;  %v782_v52 = vrot.slane %v4412_v28, 1  ;;  %v783_v53 = vrot.slane %v4414_v0, 1 }
  0x73   : > { %3714 = vrot.lane.b32.xlu0 %v3713_v16, %s3978_s17  ;;  %v780_v16 = vrot.slane %v594_v51, 1  ;;  %v4461_v51 = vld [vmem:[%s5540_s4 + $0x18] sm:$0xff]   ;;  %v863_v6 = vrot.slane %v4412_v28, 2  ;;  %v864_v7 = vrot.slane %v4414_v0, 2  ;;  %v1886_v13 = vsel %vm1884_vm2, %v3946_v34, 0 }
  0x74   : > { %v4438_v33 = vsel %vm802_vm1, %v1062_v55, %v1064_v15  ;;  %v3753_v55 = vpack.i.bf16 %v985_v37, %v4421_v2  ;;  %3282 = vmatpush3.bf16.msra.mxu1 %v1886_v13  ;;  %v786_v2 = vsel %vm721_vm0, %v783_v53, %v785_v54  ;;  %v4502_v37 = vld [vmem:[%s4040_s28 + $0x120] sm:$0xff]  ;;  %v1072_v54 = vrot.slane %v4492_v25, 2  ;;  %v3224_v15 = vld [vmem:[%s4062_s8 + $0xa8] sm:$0xff]  }
  0x75   : > { %v3763_v3 = vpack.i.bf16 %v4438_v33, %v4435_v38  ;;  %v1066_v38 = vrot.slane %v4441_v1, 2  ;;  %v4508_v33 = vsel %vm721_vm0, %v986_v57, %v987_v56  ;;  %3387 = vmatprep.subr.bf16.mxu1 %v4187_v61  ;;  %v4520_v34 = vsel %vm802_vm1, %v864_v7, %v866_v19 }
  0x76   : > { %3729 = vrot.lane.b32.xlu1 %v3728_v35, %s3976_s11  ;;  %v3758_v35 = vpack.i.bf16 %v4404_v8, %v4399_v63  ;;  %v550_v63 = vld [vmem:[%s4062_s8 + $0x9c] sm:$0xff]   ;;  %v552_v8 = vld [vmem:[%s4062_s8 + $0xa4] sm:$0x1]  ;;  %v991_v57 = vrot.slane %v4502_v37, 1  ;;  %v1069_v61 = vrot.slane %v654_v20, 2  ;;  %v4534_v44 = vunpack.c.l.bf16 %v3224_v15 }
  0x77   : > { %3724 = vrot.lane.b32.xlu0 %v3723_v48, %s3975_s10  ;;  %v4450_v48 = vsel %vm721_vm0, %v778_v14, %v780_v16  ;;  %v1067_v16 = vrot.slane %v4444_v5, 2  ;;  %v4504_v9 = vunpack.c.l.bf16 %v550_v63  ;;  %v4536_v36 = vunpack.c.h.bf16 %v3224_v15 }
  0x78   : > { %v3768_v14 = vpack.i.bf16 %v4450_v48, %v4447_v43  ;;  %v600_v43 = vunpack.c.l.bf16 %v552_v8  ;;  %v4515_v48 = vsel %vm802_vm1, %v863_v6, %v864_v7  ;;  %v4526_v8 = vld [vmem:[%s4062_s8 + $0xb0] sm:$0x1]  ;;  %5590 = vst [vmem:[#allocation23_spill] sm:$0xff] %v4534_v44 }
  0x79   : > { %5588 = vst [vmem:[#allocation21_spill] sm:$0xff] %v4504_v9  ;;  %v787_v28 = vrot.slane %v4504_v9, 1  ;;  %5591 = vst [vmem:[#allocation24_spill] sm:$0xff] %v4536_v36  ;;  %v4555_v15 = vsel %vm802_vm1, %v1067_v16, %v1069_v61 }
  0x7a   : > { %3739 = vrot.lane.b32.xlu1 %v3738_v39, %s3974_s9  ;;  %v4475_v39 = vsel %vm1884_vm2, %v4426_v30, 0  ;;  %v790_v19 = vrot.slane %v600_v43, 1  ;;  %v871_v45 = vrot.slane %v600_v43, 2 }
  0x7b   : > { %3734 = vrot.lane.b32.xlu0 %v3733_v26, %s3976_s11  ;;  %5587 = vst [vmem:[#allocation20_spill] sm:$0xff] %v4475_v39  ;;  %3318 = vmatpush3.bf16.msra.mxu0 %v4475_v39  ;;  %v784_v26 = vsel %vm721_vm0, %v782_v52, %v783_v53  ;;  %v989_v52 = vrot.slane %v654_v20, 1  ;;  %v992_v53 = vrot.slane %v4492_v25, 1 }
  0x7c   : > { %3351 = vmatprep.subr.bf16.mxu0 %v4461_v51  ;;  %v3773_v13 = vpack.i.bf16 %v786_v2, %v784_v26  ;;  %v868_v2 = vrot.slane %v4504_v9, 2 }
  0x7d   : > { %v4542_v20 = vsel %vm721_vm0, %v987_v56, %v989_v52  ;;  %v4548_v9 = vsel %vm721_vm0, %v991_v57, %v992_v53 }
  0x7e   : > { %3749 = vrot.lane.b32.xlu1 %v3748_v29, %s3977_s12  ;;  %v657_v29 = vld [vmem:[%s4040_s28 + $0x130] sm:$0x3] }
  0x7f   : > { %3744 = vrot.lane.b32.xlu0 %v3743_v4, %s3974_s9  ;;  %v4511_v4 = vunpack.c.h.bf16 %v550_v63  ;;  %v1071_v63 = vrot.slane %v4502_v37, 2  ;;  %v994_v6 = vrot.slane %v657_v29, 1  ;;  %v1074_v26 = vrot.slane %v657_v29, 2 }
  0x80   : > { %v4545_v29 = vsel %vm802_vm1, %v1066_v38, %v1067_v16  ;;  %v4579_v16 = vld [vmem:[%s4040_s28 + $0x140] sm:$0xff] }
  0x81   : > { %5589 = vst [vmem:[#allocation22_spill] sm:$0xff] %v4511_v4  ;;  %v788_v7 = vrot.slane %v4511_v4, 1  ;;  %v869_v0 = vrot.slane %v4511_v4, 2  ;;  %v4561_v56 = vsel %vm802_vm1, %v1071_v63, %v1072_v54  ;;  %v3793_v63 = vpack.i.bf16 %v4492_v25, %v4502_v37  ;;  %v4636_v4 = vld [vmem:[%s4040_s28 + $0x150] sm:$0xff] }
  0x82   : > { %3759 = vrot.lane.b32.xlu1 %v3758_v35, %s3978_s17  ;;  %v603_v35 = vunpack.c.l.bf16 %v4526_v8  ;;  %v5592_v8 = vpack.i.bf16 %v4456_v50, %v4453_v49  ;;  %v556_v50 = vld [vmem:[%s4062_s8 + $0xb4] sm:$0xff]  }
  0x83   : > { %3754 = vrot.lane.b32.xlu0 %v3753_v55, %s3977_s12  ;;  %v3783_v55 = vpack.i.bf16 %v4520_v34, %v4515_v48  ;;  %v4558_v34 = vsel %vm721_vm0, %v992_v53, %v994_v6  ;;  %v4564_v38 = vsel %vm721_vm0, %v787_v28, %v788_v7  ;;  %v4567_v43 = vsel %vm721_vm0, %v788_v7, %v790_v19 }
  0x84   : > { %v4570_v48 = vsel %vm802_vm1, %v1072_v54, %v1074_v26  ;;  %v4582_v52 = vsel %vm802_vm1, %v869_v0, %v871_v45  ;;  %v792_v53 = vrot.slane %v4534_v44, 1  ;;  %v793_v28 = vrot.slane %v4536_v36, 1  ;;  %v660_v45 = vld [vmem:[%s4040_s28 + $0x148] sm:$0x3] }
  0x85   : > { %v795_v57 = vrot.slane %v603_v35, 1  ;;  %v3798_v54 = vpack.i.bf16 %v4542_v20, %v4508_v33  ;;  %v997_v6 = vrot.slane %v4579_v16, 1  ;;  %v1077_v7 = vrot.slane %v4579_v16, 2  ;;  %v3215_v20 = vld [vmem:[%s4589_s14] sm:$0xff]  }
  0x86   : > { %3769 = vrot.lane.b32.xlu1 %v3768_v14, %s3975_s10  ;;  %v4576_v14 = vld [vmem:[%s4040_s28 + $0x138] sm:$0xff]  ;;  %v4627_v37 = vsel %vm721_vm0, %v792_v53, %v793_v28  ;;  %v874_v26 = vrot.slane %v4536_v36, 2  ;;  %v876_v19 = vrot.slane %v603_v35, 2  ;;  %v4642_v22 = vunpack.c.l.bf16 %v556_v50 }
  0x87   : > { %3764 = vrot.lane.b32.xlu0 %v3763_v3, %s3978_s17  ;;  %v4573_v3 = vsel %vm802_vm1, %v868_v2, %v869_v0  ;;  %v996_v49 = vrot.slane %v4576_v14, 1  ;;  %v1076_v2 = vrot.slane %v4576_v14, 2  ;;  %v4630_v25 = vsel %vm721_vm0, %v793_v28, %v795_v57 }
  0x88   : > { %v873_v0 = vrot.slane %v4534_v44, 2  ;;  %5593 = vst [vmem:[#allocation25_spill] sm:$0xff] %v4642_v22  ;;  %v4644_v27 = vunpack.c.h.bf16 %v556_v50  ;;  %v5594_v28 = vpack.i.bf16 %v4444_v5, %v4441_v1  ;;  %v4654_v44 = vunpack.c.l.bf16 %v3215_v20 }
  0x89   : > { %v4604_v61 = vpop.permute.xlu1 %3499  ;;  %v4652_v57 = vsel %vm721_vm0, %v996_v49, %v997_v6  ;;  %v4656_v36 = vunpack.c.h.bf16 %v3215_v20  ;;  %v999_v10 = vrot.slane %v660_v45, 1  ;;  %v1002_v50 = vrot.slane %v4639_v40, 1 }
  0x8a   : > { %3779 = vrot.lane.b32.xlu1 %v5592_v8, %s3976_s11  ;;  %v4606_v33 = vpop.permute.xlu0 %3494  ;;  %v4624_v8 = vld [vmem:[%s4589_s14 + $0x8] sm:$0x1]  ;;  %5595 = vst [vmem:[#allocation26_spill] sm:$0xff] %v4654_v44  ;;  %v1079_v58 = vrot.slane %v660_v45, 2  ;;  %v1082_v5 = vrot.slane %v4639_v40, 2  ;;  %v1004_v49 = vrot.slane %v663_v21, 1  ;;  %v4668_v20 = vsel %vm802_vm1, %v873_v0, %v874_v26 }
  0x8b   : > { %3774 = vrot.lane.b32.xlu0 %v3773_v13, %s3975_s10  ;;  %v558_v13 = vld [vmem:[%s4062_s8 + $0xbc] sm:$0x1]  ;;  %v615_v35 = vunpack.c.l.bf16 %v4624_v8  ;;  %v797_v8 = vrot.slane %v4642_v22, 1  ;;  %v798_v60 = vrot.slane %v4644_v27, 1  ;;  %v4675_v45 = vsel %vm802_vm1, %v874_v26, %v876_v19  ;;  %s3148_s8 = sadd.s32 384, %s3461_s25 }
  0x8c   : > { %v606_v53 = vunpack.c.l.bf16 %v558_v13  ;;  %v1001_v13 = vrot.slane %v4636_v4, 1  ;;  %v1758_v41 = vrot.slane %v4654_v44, 1  ;;  %v4680_v0 = vsel %vm721_vm0, %v997_v6, %v999_v10  ;;  %s4736_s16 = scalar_lea.vmem %s5539_s3, %s3148_s8 }
  0x8d   : > { %v1761_v42 = vrot.slane %v615_v35, 1  ;;  %v4683_v46 = vsel %vm802_vm1, %v1076_v2, %v1077_v7  ;;  %v4686_v47 = vsel %vm802_vm1, %v1077_v7, %v1079_v58  ;;  %v4698_v10 = vsel %vm721_vm0, %v1002_v50, %v1004_v49 }
  0x8e   : > { %3789 = vrot.lane.b32.xlu1 %v5594_v28, %s3974_s9  ;;  %v1084_v28 = vrot.slane %v663_v21, 2  ;;  %v800_v62 = vrot.slane %v606_v53, 1  ;;  %v1759_v21 = vrot.slane %v4656_v36, 1  ;;  %v878_v7 = vrot.slane %v4642_v22, 2 }
  0x8f   : > { %3784 = vrot.lane.b32.xlu0 %v3783_v55, %s3976_s11  ;;  %v1081_v55 = vrot.slane %v4636_v4, 2  ;;  %v4708_v19 = vsel %vm721_vm0, %v797_v8, %v798_v60  ;;  %v881_v39 = vrot.slane %v606_v53, 2  ;;  %v4731_v53 = vld [vmem:[%s4040_s28 + $0x170] sm:$0xff]  ;;  %v4768_v8 = vld [vmem:[%s4736_s16 + $0x8] sm:$0xff] }
  0x90   : > { %v4661_v59 = vpop.permute.xlu1 %3514  ;;  %v4704_v58 = vsel %vm802_vm1, %v1082_v5, %v1084_v28  ;;  %v4711_v2 = vsel %vm721_vm0, %v798_v60, %v800_v62  ;;  %v4726_v49 = vsel %vm721_vm0, %v1759_v21, %v1761_v42  ;;  %v1763_v60 = vrot.slane %v4654_v44, 2 }
  0x91   : > { %v4663_v1 = vpop.permute.xlu0 %3504  ;;  %v4701_v6 = vsel %vm802_vm1, %v1081_v55, %v1082_v5  ;;  %v5597_v5 = vpack.i.bf16 %v4558_v34, %v4548_v9  ;;  %v4723_v55 = vsel %vm721_vm0, %v1758_v41, %v1759_v21  ;;  %v5566_v62 = vrot.slane %v4656_v36, 2 }
  0x92   : > { %3799 = vrot.lane.b32.xlu1 %v3798_v54, %s3977_s12  ;;  %v4689_v54 = vsel %vm721_vm0, %v1001_v13, %v1002_v50  ;;  %v879_v13 = vrot.slane %v4644_v27, 2  ;;  %v5596_v50 = vpack.i.bf16 %v4555_v15, %v4545_v29  ;;  %v3823_v41 = vpack.i.bf16 %v4630_v25, %v4627_v37 }
  0x93   : > { %3794 = vrot.lane.b32.xlu0 %v3793_v63, %s3974_s9  ;;  %v3833_v42 = vpack.i.bf16 %v4675_v45, %v4668_v20  ;;  %v4761_v21 = vrot.slane %v615_v35, 2  ;;  %v3507_v25 = vunpack.i.h.bf16 %v4663_v1  ;;  %v3506_v28 = vunpack.i.l.bf16 %v4663_v1  ;;  %v4792_v1 = vld [vmem:[%s4040_s28 + $0x178] sm:$0x3] }
  0x94   : > { %v4693_v63 = vpop.permute.xlu1 %3519  ;;  %v4759_v45 = vsel %vm802_vm1, %v878_v7, %v879_v13  ;;  %v5598_v37 = vpack.i.bf16 %v4567_v43, %v4564_v38  ;;  %v5599_v35 = vpack.i.bf16 %v4570_v48, %v4561_v56  ;;  %v4781_v7 = vsel %vm802_vm1, %v879_v13, %v881_v39 }
  0x95   : > { %v4695_v26 = vpop.permute.xlu0 %3509  ;;  %v4786_v20 = vsel %vm802_vm1, %v1763_v60, %v5566_v62  ;;  %v3522_v38 = vunpack.i.h.bf16 %v4693_v63  ;;  %v3521_v43 = vunpack.i.l.bf16 %v4693_v63  ;;  %v3517_v29 = vunpack.i.h.bf16 %v4661_v59 }
  0x96   : > { %3809 = vrot.lane.b32.xlu1 %v5596_v50, %s3978_s17  ;;  %v4764_v50 = vld [vmem:[%s4040_s28 + $0x168] sm:$0xff]  ;;  %v3511_v56 = vunpack.i.l.bf16 %v4695_v26  ;;  %v3516_v9 = vunpack.i.l.bf16 %v4661_v59  ;;  %v1573_v22 = vsel %vm1571_vm3, %v4082_v18, %v3507_v25  ;;  %v1572_v60 = vsel %vm1571_vm3, %v4080_v17, %v3506_v28 }
  0x97   : > { %3804 = vrot.lane.b32.xlu0 %v5597_v5, %s3977_s12  ;;  %v4789_v5 = vld [vmem:[%s4736_s16] sm:$0xff]  ;;  %v5600_v62 = vpack.i.bf16 %v4582_v52, %v4573_v3  ;;  %v1605_v59 = vsel %vm1604_vm4, %v1572_v60, %v3521_v43  ;;  %v1606_v63 = vsel %vm1604_vm4, %v1573_v22, %v3522_v38  ;;  %v1577_v22 = vsel %vm1571_vm3, %v4074_v12, %v3517_v29 }
  0x98   : > { %v4746_v15 = vpop.permute.xlu1 %3534  ;;  %v1574_v18 = vsel %vm1571_vm3, %v4087_v23, %v3511_v56  ;;  %v5601_v43 = vpack.i.bf16 %v4579_v16, %v4576_v14 }
  0x99   : > { %v3525_v34 = vpop.permute.xlu0 %3524  ;;  %v3536_v12 = vunpack.i.l.bf16 %v4746_v15 }
  0x9a   : > { %3819 = vrot.lane.b32.xlu1 %v5598_v37, %s3975_s10  ;;  %v3512_v37 = vunpack.i.h.bf16 %v4695_v26  ;;  %v3527_v48 = vunpack.i.h.bf16 %v3525_v34  ;;  %v3526_v39 = vunpack.i.l.bf16 %v3525_v34  ;;  %v3497_v26 = vunpack.i.h.bf16 %v4606_v33 }
  0x9b   : > { %3814 = vrot.lane.b32.xlu0 %v5599_v35, %s3978_s17  ;;  %v3496_v34 = vunpack.i.l.bf16 %v4606_v33 }
  0x9c   : > { %v3540_v13 = vpop.permute.xlu1 %3539  ;;  %v1575_v33 = vsel %vm1571_vm3, %v4089_v24, %v3512_v37  ;;  %v1607_v25 = vsel %vm1604_vm4, %v1574_v18, %v3526_v39  ;;  %v1576_v24 = vsel %vm1571_vm3, %v4072_v11, %v3516_v9  ;;  %v1639_v56 = vsel %vm1637_vm5, %v1606_v63, %v3497_v26 }
  0x9d   : > { %v4798_v35 = vpop.permute.xlu0 %3529  ;;  %v1608_v17 = vsel %vm1604_vm4, %v1575_v33, %v3527_v48  ;;  %v3542_v28 = vunpack.i.h.bf16 %v3540_v13  ;;  %v3541_v44 = vunpack.i.l.bf16 %v3540_v13  ;;  %v1638_v37 = vsel %vm1637_vm5, %v1605_v59, %v3496_v34 }
  0x9e   : > { %3829 = vrot.lane.b32.xlu1 %v5600_v62, %s3976_s11  ;;  %v3502_v62 = vunpack.i.h.bf16 %v4604_v61  ;;  %v3532_v9 = vunpack.i.h.bf16 %v4798_v35  ;;  %v3531_v48 = vunpack.i.l.bf16 %v4798_v35  ;;  %v5602_v59 = vpack.i.bf16 %v4680_v0, %v4652_v57 }
  0x9f   : > { %3824 = vrot.lane.b32.xlu0 %v3823_v41, %s3975_s10  ;;  %v3501_v41 = vunpack.i.l.bf16 %v4604_v61  ;;  %v3537_v61 = vunpack.i.h.bf16 %v4746_v15  ;;  %v1672_v39 = vsel %vm1670_vm6, %v1639_v56, %v3542_v28  ;;  %v5603_v35 = vpack.i.bf16 %v4639_v40, %v4636_v4 }
  0xa0   : > { %v3550_v3 = vpop.permute.xlu1 %3549  ;;  %v1641_v11 = vsel %vm1637_vm5, %v1608_v17, %v3502_v62  ;;  %v1609_v0 = vsel %vm1604_vm4, %v1576_v24, %v3536_v12  ;;  %v5605_v24 = vpack.i.bf16 %v4698_v10, %v4689_v54  ;;  %v610_v54 = vld [vmem:[%s4589_s14 + $0xc] sm:$0xff]  }
  0xa1   : > { %v3545_v52 = vpop.permute.xlu0 %3544  ;;  %v1640_v29 = vsel %vm1637_vm5, %v1607_v25, %v3501_v41  ;;  %v3552_v15 = vunpack.i.h.bf16 %v3550_v3  ;;  %v3551_v34 = vunpack.i.l.bf16 %v3550_v3  ;;  %v4861_v3 = vld [vmem:[%s4736_s16 + $0x10] sm:$0x3]  ;;  %v1610_v57 = vsel %vm1604_vm4, %v1577_v22, %v3537_v61 }
  0xa2   : > { %v3547_v23 = vunpack.i.h.bf16 %v3545_v52  ;;  %v3546_v38 = vunpack.i.l.bf16 %v3545_v52  ;;  %3839 = vrot.lane.b32.xlu1 %v5601_v43, %s3974_s9  ;;  %v1643_v41 = vsel %vm1637_vm5, %v1610_v57, %v3532_v9  ;;  %v5604_v22 = vpack.i.bf16 %v4686_v47, %v4683_v46 }
  0xa3   : > { %3834 = vrot.lane.b32.xlu0 %v3833_v42, %s3976_s11  ;;  %v1671_v42 = vsel %vm1670_vm6, %v1638_v37, %v3541_v44  ;;  %v1676_v56 = vsel %vm1670_vm6, %v1643_v41, %v3552_v15  ;;  %v5606_v61 = vrot.slane %v4656_v36, 2  ;;  %v1087_v46 = vrot.slane %v4731_v53, 2 }
  0xa4   : > { %v3560_v14 = vpop.permute.xlu1 %3559  ;;  %v1673_v44 = vsel %vm1670_vm6, %v1640_v29, %v3546_v38  ;;  %v1674_v33 = vsel %vm1670_vm6, %v1641_v11, %v3547_v23  ;;  %v1642_v23 = vsel %vm1637_vm5, %v1609_v0, %v3531_v48  ;;  %v1774_v29 = vrot.slane %v4861_v3, 1 }
  0xa5   : > { %v3555_v16 = vpop.permute.xlu0 %3554  ;;  %v3562_v13 = vunpack.i.h.bf16 %v3560_v14  ;;  %v3561_v60 = vunpack.i.l.bf16 %v3560_v14  ;;  %v1675_v37 = vsel %vm1670_vm6, %v1642_v23, %v3551_v34  ;;  %v4883_v12 = vsel %vm802_vm1, %v5606_v61, %v4761_v21 }
  0xa6   : > { %v3557_v63 = vunpack.i.h.bf16 %v3555_v16  ;;  %v3556_v26 = vunpack.i.l.bf16 %v3555_v16  ;;  %3849 = vrot.lane.b32.xlu1 %v5602_v59, %s3977_s12  ;;  %v1086_v47 = vrot.slane %v4764_v50, 2  ;;  %v5607_v14 = vrot.slane %v4731_v53, 1 }
  0xa7   : > { %3844 = vrot.lane.b32.xlu0 %v5603_v35, %s3974_s9  ;;  %v1706_v18 = vsel %vm1703_vm7, %v1673_v44, %v3561_v60  ;;  %v1707_v25 = vsel %vm1703_vm7, %v1674_v33, %v3562_v13  ;;  %v5608_v16 = vrot.slane %v4764_v50, 1  ;;  %v1777_v15 = vrot.slane %v4768_v8, 2 }
  0xa8   : > { %v1704_v17 = vsel %vm1703_vm7, %v1671_v42, %v3556_v26  ;;  %v1705_v28 = vsel %vm1703_vm7, %v1672_v39, %v3557_v63  ;;  %v4865_v40 = vpop.permute.xlu1 %3569  ;;  %v1737_v52 = vpack.c.bf16 %v1707_v25, %v1706_v18  ;;  %v5609_v39 = vrot.slane %v4792_v1, 1 }
  0xa9   : > { %v3565_v4 = vpop.permute.xlu0 %3564  ;;  %v1736_v62 = vpack.c.bf16 %v1705_v28, %v1704_v17  ;;  %v4904_v42 = vsel %vm721_vm0, %v5608_v16, %v5607_v14  ;;  %v5610_v13 = vmov %v5607_v14  ;;  %v1089_v63 = vrot.slane %v4792_v1, 2  ;;  %v3948_v1 = vld [vmem:[%s5540_s4 + $0x20] ss:$0 sps:$4 sm:$0xff]   ;;  %v612_v17 = vld [vmem:[%s4589_s14 + $0x14] sm:$0x1] }
  0xaa   : > { %v3567_v38 = vunpack.i.h.bf16 %v3565_v4  ;;  %v3566_v43 = vunpack.i.l.bf16 %v3565_v4  ;;  %3859 = vrot.lane.b32.xlu1 %v5604_v22, %s3978_s17  ;;  %3283 = vmatprep.mubr.msk.bf16.mxu1 %vm1835_vm8, %v1737_v52  ;;  %v4911_v60 = vsel %vm721_vm0, %v5610_v13, %v5609_v39  ;;  %v3873_v26 = vpack.i.bf16 %v4781_v7, %v4759_v45  ;;  %v5617_v39 = vld [vmem:[#allocation20_spill] sm:$0xff] }
  0xab   : > { %3854 = vrot.lane.b32.xlu0 %v5605_v24, %s3977_s12  ;;  %3319 = vmatprep.mubr.msk.bf16.mxu0 %vm1835_vm8, %v1736_v62  ;;  %v1776_v34 = vrot.slane %v4789_v5, 2  ;;  %v5611_v59 = vrot.slane %v4768_v8, 1  ;;  %v5612_v35 = vrot.slane %v4789_v5, 1  ;;  %v5613_v45 = vpack.i.bf16 %v4711_v2, %v4708_v19 }
  0xac   : > { %v1708_v11 = vsel %vm1703_vm7, %v1675_v37, %v3566_v43  ;;  %v1709_v9 = vsel %vm1703_vm7, %v1676_v56, %v3567_v38  ;;  %v4895_v21 = vpop.permute.xlu1 %3579  ;;  %3320 = vmatmul.mubr.msk.bf16.vlgmr.msra.gmra.mrb[0].mxu0 %vm1835_vm8, %v1737_v52  ;;  %v5614_v7 = vpack.i.bf16 %v4704_v58, %v4701_v6  ;;  %v1779_v25 = vrot.slane %v4861_v3, 2  ;;  %v4959_v3 = vld [vmem:[%s4736_s16 + $0x20] sm:$0xff] }
  0xad   : > { %v4892_v10 = vpack.c.bf16 %v1709_v9, %v1708_v11  ;;  %v4897_v48 = vpop.permute.xlu0 %3574  ;;  %v4924_v44 = vsel %vm721_vm0, %v5612_v35, %v5611_v59  ;;  %v5615_v33 = vmov %v5611_v59  ;;  %v4944_v28 = vunpack.c.l.bf16 %v610_v54  ;;  %3352 = vmatpush3.bf16.msra.mxu0 %v4461_v51  ;;  %v3949_v38 = vld [vmem:[%s5540_s4] sm:$0xff]  }
  0xae   : > { %3869 = vrot.lane.b32.xlu1 %v5613_v45, %s3975_s10  ;;  %v4940_v18 = vsel %vm721_vm0, %v5615_v33, %v1774_v29  ;;  %v4946_v57 = vunpack.c.h.bf16 %v610_v54  ;;  %v3888_v19 = vpack.i.bf16 %v4883_v12, %v4786_v20  ;;  %v3883_v6 = vpack.i.bf16 %v4731_v53, %v4764_v50  ;;  %3458 = vmatprep.subr.msk.bf16.mxu0 %vm1884_vm2, %v3948_v1 }
  0xaf   : > { %3864 = vrot.lane.b32.xlu0 %v5614_v7, %s3978_s17  ;;  %3284 = vmatmul.mubr.msk.bf16.vlgmr.msra.gmra.mrb[0].mxu1 %vm1835_vm8, %v4892_v10  ;;  %v3898_v58 = vpack.i.bf16 %v4768_v8, %v4789_v5  ;;  %v3893_v2 = vpack.i.bf16 %v4911_v60, %v4904_v42  ;;  %v3572_v0 = vunpack.i.h.bf16 %v4865_v40  ;;  %v3571_v4 = vunpack.i.l.bf16 %v4865_v40 }
  0xb0   : > { %3323 = vmatprep.mubr.msk.bf16.mxu0 %vm1835_vm8, %v4892_v10  ;;  %v3590_v52 = vpop.permute.xlu1 %3589  ;;  %v4968_v53 = vsel %vm802_vm1, %v1086_v47, %v1087_v46  ;;  %v4971_v50 = vsel %vm802_vm1, %v1087_v46, %v1089_v63  ;;  %v3908_v62 = vpack.i.bf16 %v4940_v18, %v4924_v44  ;;  %v4977_v41 = vsel %vm802_vm1, %v1776_v34, %v1777_v15 }
  0xb1   : > { %v4965_v20 = vpop.permute.xlu0 %3584  ;;  %v618_v40 = vunpack.c.l.bf16 %v612_v17  ;;  %v2309_v23 = vsel %vm1884_vm2, %v3948_v1, 0  ;;  %3389 = vmatpush3.bf16.msra.mxu1 %v3949_v38  ;;  %v5616_v51 = vpack.i.bf16 %v4726_v49, %v4723_v55  ;;  %v4990_v43 = vsel %vm802_vm1, %v1777_v15, %v1779_v25 }
  0xb2   : > { %v2228_v37 = vrot.slane %v4944_v28, 1  ;;  %v2229_v56 = vrot.slane %v4946_v57, 1  ;;  %v2242_v22 = vrot.slane %v4959_v3, 1  ;;  %v3582_v24 = vunpack.i.h.bf16 %v4895_v21  ;;  %3457 = vmatprep.subr.msk.bf16.mxu1 %vm1884_vm2, %v4426_v30  ;;  %3354 = vmatpush3.bf16.msra.mxu0 %v2309_v23 }
  0xb3   : > { %3879 = vrot.lane.b32.xlu1 %v5616_v51, %s3975_s10  ;;  %3874 = vrot.lane.b32.xlu0 %v3873_v26, %s3976_s11  ;;  %v3581_v61 = vunpack.i.l.bf16 %v4895_v21  ;;  %v3903_v12 = vpack.i.bf16 %v4971_v50, %v4968_v53  ;;  %v2233_v55 = vrot.slane %v4944_v28, 2  ;;  %v1579_v49 = vsel %vm1571_vm3, %v4156_v32, %v3572_v0  ;;  %v5619_v50 = vld [vmem:[#allocation2_spill] sm:$0xff]  ;;  %v670_v51 = vld [vmem:[%s4736_s16 + $0x18] sm:$0xff] }
  0xb4   : > { %v1578_v29 = vsel %vm1571_vm3, %v4154_v31, %v3571_v4  ;;  %v3592_v11 = vunpack.i.h.bf16 %v3590_v52  ;;  %v3591_v9 = vunpack.i.l.bf16 %v3590_v52  ;;  %v3600_v46 = vpop.permute.xlu1 %3599  ;;  %v3913_v54 = vpack.i.bf16 %v4990_v43, %v4977_v41 }
  0xb5   : > { %v3595_v47 = vpop.permute.xlu0 %3594  ;;  %v2231_v21 = vrot.slane %v618_v40, 1  ;;  %v2234_v14 = vrot.slane %v4946_v57, 2  ;;  %v2236_v16 = vrot.slane %v618_v40, 2  ;;  %3390 = vmatpush3.bf16.msra.mxu1 %v5617_v39  ;;  %v3602_v30 = vunpack.i.h.bf16 %v3600_v46 }
  0xb6   : > { %v3601_v13 = vunpack.i.l.bf16 %v3600_v46  ;;  %v5013_v31 = vsel %vm721_vm0, %v2228_v37, %v2229_v56  ;;  %v2247_v32 = vrot.slane %v4959_v3, 2  ;;  %v1611_v63 = vsel %vm1604_vm4, %v1578_v29, %v3581_v61 }
  0xb7   : > { %3889 = vrot.lane.b32.xlu1 %v3888_v19, %s3976_s11  ;;  %3884 = vrot.lane.b32.xlu0 %v3883_v6, %s3974_s9  ;;  %v1612_v26 = vsel %vm1604_vm4, %v1579_v49, %v3582_v24  ;;  %v3577_v15 = vunpack.i.h.bf16 %v4897_v48  ;;  %v3576_v34 = vunpack.i.l.bf16 %v4897_v48  ;;  %v1644_v59 = vsel %vm1637_vm5, %v1611_v63, %v3591_v9 }
  0xb8   : > { %v1645_v35 = vsel %vm1637_vm5, %v1612_v26, %v3592_v11  ;;  %v3587_v1 = vunpack.i.h.bf16 %v4965_v20  ;;  %v3586_v45 = vunpack.i.l.bf16 %v4965_v20  ;;  %v3610_v7 = vpop.permute.xlu1 %3609  ;;  %v3597_v25 = vunpack.i.h.bf16 %v3595_v47  ;;  %v5618_v20 = vld [vmem:[#allocation3_spill] sm:$0xff] }
  0xb9   : > { %v3605_v33 = vpop.permute.xlu0 %3604  ;;  %v3596_v17 = vunpack.i.l.bf16 %v3595_v47  ;;  %v3612_v19 = vunpack.i.h.bf16 %v3610_v7  ;;  %v3611_v6 = vunpack.i.l.bf16 %v3610_v7  ;;  %v1677_v0 = vsel %vm1670_vm6, %v1644_v59, %v3601_v13 }
  0xba   : > { %v1678_v4 = vsel %vm1670_vm6, %v1645_v35, %v3602_v30  ;;  %v3607_v48 = vunpack.i.h.bf16 %v3605_v33  ;;  %v3606_v52 = vunpack.i.l.bf16 %v3605_v33  ;;  %v1581_v53 = vsel %vm1571_vm3, %v5618_v20, %v3577_v15  ;;  %v5621_v33 = vld [vmem:[#allocation4_spill] sm:$0xff] }
  0xbb   : > { %3899 = vrot.lane.b32.xlu1 %v3898_v58, %s3974_s9  ;;  %3894 = vrot.lane.b32.xlu0 %v3893_v2, %s3977_s12  ;;  %v1580_v40 = vsel %vm1571_vm3, %v5619_v50, %v3576_v34  ;;  %v1710_v23 = vsel %vm1703_vm7, %v1677_v0, %v3611_v6  ;;  %v1711_v38 = vsel %vm1703_vm7, %v1678_v4, %v3612_v19  ;;  %v672_v2 = vld [vmem:[%s4736_s16 + $0x28] sm:$0x3]  ;;  %v2241_v46 = vrot.slane %v670_v51, 1 }
  0xbc   : > { %v1613_v37 = vsel %vm1604_vm4, %v1580_v40, %v3586_v45  ;;  %v1614_v8 = vsel %vm1604_vm4, %v1581_v53, %v3587_v1  ;;  %v5043_v5 = vpack.c.bf16 %v1711_v38, %v1710_v23  ;;  %v3620_v58 = vpop.permute.xlu1 %3619  ;;  %v2232_v60 = vsel %vm721_vm0, %v2229_v56, %v2231_v21  ;;  %v5620_v45 = vld [vmem:[#allocation5_spill] sm:$0xff] }
  0xbd   : > { %v3615_v42 = vpop.permute.xlu0 %3614  ;;  %v1646_v24 = vsel %vm1637_vm5, %v1613_v37, %v3596_v17  ;;  %v1647_v61 = vsel %vm1637_vm5, %v1614_v8, %v3597_v25  ;;  %v2235_v56 = vsel %vm802_vm1, %v2233_v55, %v2234_v14  ;;  %v2237_v39 = vsel %vm802_vm1, %v2234_v14, %v2236_v16 }
  0xbe   : > { %v3617_v49 = vunpack.i.h.bf16 %v3615_v42  ;;  %v3616_v29 = vunpack.i.l.bf16 %v3615_v42  ;;  %v1679_v11 = vsel %vm1670_vm6, %v1646_v24, %v3606_v52  ;;  %v1680_v9 = vsel %vm1670_vm6, %v1647_v61, %v3607_v48  ;;  %3287 = vmatprep.mubr.msk.bf16.mxu1 %vm1835_vm8, %v5043_v5  ;;  %3324 = vmatmul.mubr.msk.bf16.gmra.mrb[4].mxu0 %vm1835_vm8, %v5043_v5 }
  0xbf   : > { %3909 = vrot.lane.b32.xlu1 %v3908_v62, %s3977_s12  ;;  %3904 = vrot.lane.b32.xlu0 %v3903_v12, %s3978_s17  ;;  %v2244_v30 = vrot.slane %v672_v2, 1  ;;  %v3918_v62 = vpack.i.bf16 %v2232_v60, %v5013_v31  ;;  %v2246_v12 = vrot.slane %v670_v51, 2  ;;  %v2249_v55 = vrot.slane %v672_v2, 2 }
  0xc0   : > { %v1712_v47 = vsel %vm1703_vm7, %v1679_v11, %v3616_v29  ;;  %v1713_v21 = vsel %vm1703_vm7, %v1680_v9, %v3617_v49  ;;  %v3630_v44 = vpop.permute.xlu1 %3629  ;;  %v3923_v14 = vpack.i.bf16 %v2237_v39, %v2235_v56  ;;  %v3928_v16 = vpack.i.bf16 %v4959_v3, %v670_v51  ;;  %v5622_v49 = vld [vmem:[#allocation7_spill] sm:$0xff]  ;;  %v5623_v11 = vld [vmem:[#allocation6_spill] sm:$0xff] }
  0xc1   : > { %v5062_v13 = vpack.c.bf16 %v1713_v21, %v1712_v47  ;;  %v3625_v18 = vpop.permute.xlu0 %3624  ;;  %v2243_v31 = vsel %vm721_vm0, %v2241_v46, %v2242_v22  ;;  %v2245_v63 = vsel %vm721_vm0, %v2242_v22, %v2244_v30  ;;  %v3622_v26 = vunpack.i.h.bf16 %v3620_v58 }
  0xc2   : > { %v3621_v41 = vunpack.i.l.bf16 %v3620_v58  ;;  %v2248_v15 = vsel %vm802_vm1, %v2246_v12, %v2247_v32  ;;  %v2250_v34 = vsel %vm802_vm1, %v2247_v32, %v2249_v55  ;;  %v3933_v59 = vpack.i.bf16 %v2245_v63, %v2243_v31 }
  0xc3   : > { %3914 = vrot.lane.b32.xlu0 %v3913_v54, %s3978_s17  ;;  %3288 = vmatmul.mubr.msk.bf16.gmra.mrb[4].mxu1 %vm1835_vm8, %v5062_v13  ;;  %v3632_v35 = vunpack.i.h.bf16 %v3630_v44  ;;  %v3631_v1 = vunpack.i.l.bf16 %v3630_v44  ;;  %v3938_v22 = vpack.i.bf16 %v2250_v34, %v2248_v15  ;;  %v1583_v7 = vsel %vm1571_vm3, %v5620_v45, %v3622_v26 }
  0xc4   : > { %3327 = vmatprep.mubr.msk.bf16.mxu0 %vm1835_vm8, %v5062_v13  ;;  %v3640_v43 = vpop.permute.xlu1 %3639  ;;  %3919 = vrot.lane.b32.xlu1 %v3918_v62, %s3975_s10  ;;  %v1582_v25 = vsel %vm1571_vm3, %v5621_v33, %v3621_v41  ;;  %v3627_v52 = vunpack.i.h.bf16 %v3625_v18  ;;  %v3626_v20 = vunpack.i.l.bf16 %v3625_v18 }
  0xc5   : > { %v3635_v54 = vpop.permute.xlu0 %3634  ;;  %v3642_v17 = vunpack.i.h.bf16 %v3640_v43  ;;  %v3641_v19 = vunpack.i.l.bf16 %v3640_v43  ;;  %v1615_v4 = vsel %vm1604_vm4, %v1582_v25, %v3631_v1  ;;  %v1616_v48 = vsel %vm1604_vm4, %v1583_v7, %v3632_v35  ;;  %v5625_v7 = vld [vmem:[#allocation8_spill] sm:$0xff] }
  0xc6   : > { %v3637_v40 = vunpack.i.h.bf16 %v3635_v54  ;;  %v3636_v23 = vunpack.i.l.bf16 %v3635_v54  ;;  %v1585_v29 = vsel %vm1571_vm3, %v5622_v49, %v3627_v52  ;;  %v1584_v9 = vsel %vm1571_vm3, %v5623_v11, %v3626_v20 }
  0xc7   : > { %3924 = vrot.lane.b32.xlu0 %v3923_v14, %s3976_s11  ;;  %v1648_v53 = vsel %vm1637_vm5, %v1615_v4, %v3641_v19  ;;  %v1649_v50 = vsel %vm1637_vm5, %v1616_v48, %v3642_v17 }
  0xc8   : > { %v3650_v6 = vpop.permute.xlu1 %3649  ;;  %3929 = vrot.lane.b32.xlu1 %v3928_v16, %s3974_s9  ;;  %v1617_v47 = vsel %vm1604_vm4, %v1584_v9, %v3636_v23  ;;  %v1618_v21 = vsel %vm1604_vm4, %v1585_v29, %v3637_v40  ;;  %v5627_v29 = vld [vmem:[#allocation10_spill] sm:$0xff]  ;;  %s3149_s9 = sshll.u32 %s5647_s21, 7 }
  0xc9   : > { %v3645_v0 = vpop.permute.xlu0 %3644  ;;  %v3652_v3 = vunpack.i.h.bf16 %v3650_v6  ;;  %v3651_v32 = vunpack.i.l.bf16 %v3650_v6 }
  0xca   : > { %v3647_v37 = vunpack.i.h.bf16 %v3645_v0  ;;  %v3646_v8 = vunpack.i.l.bf16 %v3645_v0 }
  0xcb   : > { %3934 = vrot.lane.b32.xlu0 %v3933_v59, %s3977_s12  ;;  %v1681_v60 = vsel %vm1670_vm6, %v1648_v53, %v3651_v32  ;;  %v1682_v2 = vsel %vm1670_vm6, %v1649_v50, %v3652_v3  ;;  %s5361_s12 = scalar_lea.vmem %s5541_s5, %s3149_s9 }
  0xcc   : > { %v3660_v38 = vpop.permute.xlu1 %3659  ;;  %3939 = vrot.lane.b32.xlu1 %v3938_v22, %s3978_s17  ;;  %v1650_v18 = vsel %vm1637_vm5, %v1617_v47, %v3646_v8  ;;  %v1651_v62 = vsel %vm1637_vm5, %v1618_v21, %v3647_v37  ;;  %v5624_v22 = vld [vmem:[#allocation9_spill] sm:$0xff]  ;;  %s3050_s17 = sshll.u32 %s5647_s21, 1 }
  0xcd   : > { %v3655_v51 = vpop.permute.xlu0 %3654  ;;  %v3662_v58 = vunpack.i.h.bf16 %v3660_v38  ;;  %v3661_v42 = vunpack.i.l.bf16 %v3660_v38  ;;  %s509_s30 = scalar_lea.vmem %s5542_s6, %s3050_s17 }
  0xce   : > { %v3657_v24 = vunpack.i.h.bf16 %v3655_v51  ;;  %v3656_v61 = vunpack.i.l.bf16 %v3655_v51 }
  0xcf   : > { %v1714_v56 = vsel %vm1703_vm7, %v1681_v60, %v3661_v42  ;;  %v1715_v46 = vsel %vm1703_vm7, %v1682_v2, %v3662_v58 }
  0xd0   : > { %v5111_v39 = vpack.c.bf16 %v1715_v46, %v1714_v56  ;;  %v3670_v30 = vpop.permute.xlu1 %3669  ;;  %v1683_v14 = vsel %vm1670_vm6, %v1650_v18, %v3656_v61  ;;  %v1684_v16 = vsel %vm1670_vm6, %v1651_v62, %v3657_v24  ;;  %v5626_v61 = vld [vmem:[#allocation11_spill] sm:$0xff] }
  0xd1   : > { %v3665_v44 = vpop.permute.xlu0 %3664  ;;  %v3672_v54 = vunpack.i.h.bf16 %v3670_v30  ;;  %v3671_v15 = vunpack.i.l.bf16 %v3670_v30 }
  0xd2   : > { %v3667_v12 = vunpack.i.h.bf16 %v3665_v44  ;;  %v3666_v55 = vunpack.i.l.bf16 %v3665_v44  ;;  %3291 = vmatprep.mubr.msk.bf16.mxu1 %vm1835_vm8, %v5111_v39  ;;  %3328 = vmatmul.mubr.msk.bf16.gmra.mrb[8].mxu0 %vm1835_vm8, %v5111_v39 }
  0xd3   : > { %v1587_v45 = vsel %vm1571_vm3, %v5624_v22, %v3672_v54  ;;  %v1586_v33 = vsel %vm1571_vm3, %v5625_v7, %v3671_v15  ;;  %v5629_v7 = vld [vmem:[#allocation12_spill] sm:$0xff] }
  0xd4   : > { %v1716_v31 = vsel %vm1703_vm7, %v1683_v14, %v3666_v55  ;;  %v1717_v63 = vsel %vm1703_vm7, %v1684_v16, %v3667_v12  ;;  %v3680_v41 = vpop.permute.xlu1 %3679 }
  0xd5   : > { %v5123_v26 = vpack.c.bf16 %v1717_v63, %v1716_v31  ;;  %v3675_v43 = vpop.permute.xlu0 %3674  ;;  %v3682_v35 = vunpack.i.h.bf16 %v3680_v41  ;;  %v3681_v1 = vunpack.i.l.bf16 %v3680_v41 }
  0xd6   : > { %v3677_v48 = vunpack.i.h.bf16 %v3675_v43  ;;  %v3676_v52 = vunpack.i.l.bf16 %v3675_v43 }
  0xd7   : > { %3292 = vmatmul.mubr.msk.bf16.gmra.mrb[8].mxu1 %vm1835_vm8, %v5123_v26  ;;  %3331 = vmatprep.mubr.msk.bf16.mxu0 %vm1835_vm8, %v5123_v26  ;;  %v1619_v32 = vsel %vm1604_vm4, %v1586_v33, %v3681_v1  ;;  %v1620_v4 = vsel %vm1604_vm4, %v1587_v45, %v3682_v35 }
  0xd8   : > { %v3690_v34 = vpop.permute.xlu1 %3689  ;;  %v1589_v49 = vsel %vm1571_vm3, %v5626_v61, %v3677_v48  ;;  %v1588_v11 = vsel %vm1571_vm3, %v5627_v29, %v3676_v52  ;;  %v5631_v61 = vld [vmem:[#allocation14_spill] sm:$0xff] }
  0xd9   : > { %v3685_v59 = vpop.permute.xlu0 %3684  ;;  %v3692_v25 = vunpack.i.h.bf16 %v3690_v34  ;;  %v3691_v17 = vunpack.i.l.bf16 %v3690_v34 }
  0xda   : > { %v3687_v50 = vunpack.i.h.bf16 %v3685_v59  ;;  %v3686_v40 = vunpack.i.l.bf16 %v3685_v59 }
  0xdb   : > { %v1652_v20 = vsel %vm1637_vm5, %v1619_v32, %v3691_v17  ;;  %v1653_v53 = vsel %vm1637_vm5, %v1620_v4, %v3692_v25 }
  0xdc   : > { %v3700_v19 = vpop.permute.xlu1 %3699  ;;  %v1621_v46 = vsel %vm1604_vm4, %v1588_v11, %v3686_v40  ;;  %v1622_v47 = vsel %vm1604_vm4, %v1589_v49, %v3687_v50 }
  0xdd   : > { %v3695_v6 = vpop.permute.xlu0 %3694  ;;  %v3702_v0 = vunpack.i.h.bf16 %v3700_v19  ;;  %v3701_v3 = vunpack.i.l.bf16 %v3700_v19 }
  0xde   : > { %v3697_v51 = vunpack.i.h.bf16 %v3695_v6  ;;  %v3696_v37 = vunpack.i.l.bf16 %v3695_v6 }
  0xdf   : > { %v1685_v42 = vsel %vm1670_vm6, %v1652_v20, %v3701_v3  ;;  %v1686_v60 = vsel %vm1670_vm6, %v1653_v53, %v3702_v0 }
  0xe0   : > { %v3710_v23 = vpop.permute.xlu1 %3709  ;;  %v1654_v18 = vsel %vm1637_vm5, %v1621_v46, %v3696_v37  ;;  %v1655_v62 = vsel %vm1637_vm5, %v1622_v47, %v3697_v51 }
  0xe1   : > { %v3705_v38 = vpop.permute.xlu0 %3704  ;;  %v3712_v8 = vunpack.i.h.bf16 %v3710_v23  ;;  %v3711_v58 = vunpack.i.l.bf16 %v3710_v23 }
  0xe2   : > { %v3707_v2 = vunpack.i.h.bf16 %v3705_v38  ;;  %v3706_v24 = vunpack.i.l.bf16 %v3705_v38 }
  0xe3   : > { %v1718_v9 = vsel %vm1703_vm7, %v1685_v42, %v3711_v58  ;;  %v1719_v56 = vsel %vm1703_vm7, %v1686_v60, %v3712_v8 }
  0xe4   : > { %v5147_v21 = vpack.c.bf16 %v1719_v56, %v1718_v9  ;;  %v3720_v30 = vpop.permute.xlu1 %3719  ;;  %v1687_v14 = vsel %vm1670_vm6, %v1654_v18, %v3706_v24  ;;  %v1688_v16 = vsel %vm1670_vm6, %v1655_v62, %v3707_v2  ;;  %v5630_v2 = vld [vmem:[#allocation15_spill] sm:$0xff] }
  0xe5   : > { %v3715_v44 = vpop.permute.xlu0 %3714  ;;  %v3722_v15 = vunpack.i.h.bf16 %v3720_v30  ;;  %v3721_v34 = vunpack.i.l.bf16 %v3720_v30 }
  0xe6   : > { %v3717_v12 = vunpack.i.h.bf16 %v3715_v44  ;;  %v3716_v55 = vunpack.i.l.bf16 %v3715_v44  ;;  %3295 = vmatprep.mubr.msk.bf16.mxu1 %vm1835_vm8, %v5147_v21  ;;  %3332 = vmatmul.mubr.msk.bf16.gmra.mrb[12].mxu0 %vm1835_vm8, %v5147_v21 }
  0xe7   : > { %3355 = vmatprep.mubr.msk.bf16.mxu0 %vm1835_vm8, %v4892_v10  ;;  %v5628_v10 = vld [vmem:[#allocation13_spill] sm:$0xff]  ;;  %v1590_v33 = vsel %vm1571_vm3, %v5629_v7, %v3721_v34 }
  0xe8   : > { %v1720_v31 = vsel %vm1703_vm7, %v1687_v14, %v3716_v55  ;;  %v1721_v63 = vsel %vm1703_vm7, %v1688_v16, %v3717_v12  ;;  %v3730_v43 = vpop.permute.xlu1 %3729  ;;  %v1591_v45 = vsel %vm1571_vm3, %v5628_v10, %v3722_v15  ;;  %v5633_v10 = vld [vmem:[#allocation16_spill] sm:$0xff] }
  0xe9   : > { %v5161_v41 = vpack.c.bf16 %v1721_v63, %v1720_v31  ;;  %v3725_v54 = vpop.permute.xlu0 %3724  ;;  %v3732_v1 = vunpack.i.h.bf16 %v3730_v43  ;;  %v3731_v22 = vunpack.i.l.bf16 %v3730_v43 }
  0xea   : > { %v3727_v4 = vunpack.i.h.bf16 %v3725_v54  ;;  %v3726_v48 = vunpack.i.l.bf16 %v3725_v54 }
  0xeb   : > { %3296 = vmatmul.mubr.msk.bf16.gmra.mrb[12].mxu1 %vm1835_vm8, %v5161_v41  ;;  %v1623_v32 = vsel %vm1604_vm4, %v1590_v33, %v3731_v22 }
  0xec   : > { %v3740_v59 = vpop.permute.xlu1 %3739  ;;  %v1593_v24 = vsel %vm1571_vm3, %v5630_v2, %v3727_v4  ;;  %v1592_v49 = vsel %vm1571_vm3, %v5631_v61, %v3726_v48 }
  0xed   : > { %v3735_v35 = vpop.permute.xlu0 %3734  ;;  %v3742_v25 = vunpack.i.h.bf16 %v3740_v59  ;;  %v3741_v17 = vunpack.i.l.bf16 %v3740_v59 }
  0xee   : > { %3356 = vmatmul.mubr.msk.bf16.vlgmr.msra.gmra.mrb[0].mxu0 %vm1835_vm8, %v5043_v5  ;;  %v1624_v5 = vsel %vm1604_vm4, %v1591_v45, %v3732_v1  ;;  %v3737_v20 = vunpack.i.h.bf16 %v3735_v35  ;;  %v3736_v53 = vunpack.i.l.bf16 %v3735_v35  ;;  %v5632_v1 = vld [vmem:[#allocation17_spill] sm:$0xff] }
  0xef   : > { %3359 = vmatprep.mubr.msk.bf16.mxu0 %vm1835_vm8, %v5062_v13  ;;  %v1656_v13 = vsel %vm1637_vm5, %v1623_v32, %v3741_v17  ;;  %v1657_v52 = vsel %vm1637_vm5, %v1624_v5, %v3742_v25 }
  0xf0   : > { %v3750_v19 = vpop.permute.xlu1 %3749  ;;  %v1625_v9 = vsel %vm1604_vm4, %v1592_v49, %v3736_v53  ;;  %v1626_v56 = vsel %vm1604_vm4, %v1593_v24, %v3737_v20 }
  0xf1   : > { %v3745_v6 = vpop.permute.xlu0 %3744  ;;  %v3752_v0 = vunpack.i.h.bf16 %v3750_v19  ;;  %v3751_v3 = vunpack.i.l.bf16 %v3750_v19 }
  0xf2   : > { %v3747_v23 = vunpack.i.h.bf16 %v3745_v6  ;;  %v3746_v38 = vunpack.i.l.bf16 %v3745_v6 }
  0xf3   : > { %v1689_v8 = vsel %vm1670_vm6, %v1656_v13, %v3751_v3  ;;  %v1690_v58 = vsel %vm1670_vm6, %v1657_v52, %v3752_v0 }
  0xf4   : > { %v3760_v50 = vpop.permute.xlu1 %3759  ;;  %v1658_v30 = vsel %vm1637_vm5, %v1625_v9, %v3746_v38  ;;  %v1659_v44 = vsel %vm1637_vm5, %v1626_v56, %v3747_v23 }
  0xf5   : > { %v3755_v40 = vpop.permute.xlu0 %3754  ;;  %v3762_v51 = vunpack.i.h.bf16 %v3760_v50  ;;  %v3761_v37 = vunpack.i.l.bf16 %v3760_v50 }
  0xf6   : > { %v3757_v42 = vunpack.i.h.bf16 %v3755_v40  ;;  %v3756_v60 = vunpack.i.l.bf16 %v3755_v40  ;;  %3360 = vmatmul.mubr.msk.bf16.gmra.mrb[4].mxu0 %vm1835_vm8, %v5111_v39 }
  0xf7   : > { %v1722_v29 = vsel %vm1703_vm7, %v1689_v8, %v3761_v37  ;;  %v1723_v11 = vsel %vm1703_vm7, %v1690_v58, %v3762_v51  ;;  %3363 = vmatprep.mubr.msk.bf16.mxu0 %vm1835_vm8, %v5123_v26  ;;  %v5634_v58 = vld [vmem:[#allocation19_spill] sm:$0xff] }
  0xf8   : > { %v5191_v46 = vpack.c.bf16 %v1723_v11, %v1722_v29  ;;  %v3770_v39 = vpop.permute.xlu1 %3769  ;;  %v1691_v12 = vsel %vm1670_vm6, %v1658_v30, %v3756_v60  ;;  %v1692_v55 = vsel %vm1670_vm6, %v1659_v44, %v3757_v42  ;;  %v5635_v60 = vld [vmem:[#allocation18_spill] sm:$0xff] }
  0xf9   : > { %v3765_v47 = vpop.permute.xlu0 %3764  ;;  %v3772_v43 = vunpack.i.h.bf16 %v3770_v39  ;;  %v3771_v54 = vunpack.i.l.bf16 %v3770_v39 }
  0xfa   : > { %v3767_v18 = vunpack.i.h.bf16 %v3765_v47  ;;  %v3766_v62 = vunpack.i.l.bf16 %v3765_v47  ;;  %3299 = vmatprep.mubr.msk.bf16.mxu1 %vm1835_vm8, %v5191_v46 }
  0xfb   : > { %v1595_v22 = vsel %vm1571_vm3, %v5632_v1, %v3772_v43  ;;  %v1594_v45 = vsel %vm1571_vm3, %v5633_v10, %v3771_v54 }
  0xfc   : > { %v1724_v26 = vsel %vm1703_vm7, %v1691_v12, %v3766_v62  ;;  %v1725_v14 = vsel %vm1703_vm7, %v1692_v55, %v3767_v18  ;;  %v3780_v31 = vpop.permute.xlu1 %3779 }
  0xfd   : > { %v5201_v16 = vpack.c.bf16 %v1725_v14, %v1724_v26  ;;  %v3775_v63 = vpop.permute.xlu0 %3774  ;;  %v3782_v59 = vunpack.i.h.bf16 %v3780_v31  ;;  %v3781_v35 = vunpack.i.l.bf16 %v3780_v31 }
  0xfe   : > { %3364 = vmatmul.mubr.msk.bf16.gmra.mrb[8].mxu0 %vm1835_vm8, %v5147_v21  ;;  %v3777_v3 = vunpack.i.h.bf16 %v3775_v63  ;;  %v3776_v32 = vunpack.i.l.bf16 %v3775_v63 }
  0xff   : > { %3300 = vmatmul.mubr.msk.bf16.gmra.mrb[16].mxu1 %vm1835_vm8, %v5201_v16  ;;  %3367 = vmatprep.mubr.msk.bf16.mxu0 %vm1835_vm8, %v5161_v41  ;;  %v1627_v6 = vsel %vm1604_vm4, %v1594_v45, %v3781_v35  ;;  %v1628_v0 = vsel %vm1604_vm4, %v1595_v22, %v3782_v59  ;;  %v5636_v35 = vld [vmem:[#allocation22_spill] sm:$0xff]  ;;  %v5637_v22 = vld [vmem:[#allocation21_spill] sm:$0xff] }
 0x100   : > { %v3790_v15 = vpop.permute.xlu1 %3789  ;;  %v1597_v42 = vsel %vm1571_vm3, %v5634_v58, %v3777_v3  ;;  %v1596_v2 = vsel %vm1571_vm3, %v5635_v60, %v3776_v32 }
 0x101   : > { %v3785_v34 = vpop.permute.xlu0 %3784  ;;  %v3792_v7 = vunpack.i.h.bf16 %v3790_v15  ;;  %v3791_v33 = vunpack.i.l.bf16 %v3790_v15 }
 0x102   : > { %v3787_v48 = vunpack.i.h.bf16 %v3785_v34  ;;  %v3786_v13 = vunpack.i.l.bf16 %v3785_v34 }
 0x103   : > { %v1660_v5 = vsel %vm1637_vm5, %v1627_v6, %v3791_v33  ;;  %v1661_v4 = vsel %vm1637_vm5, %v1628_v0, %v3792_v7 }
 0x104   : > { %v3800_v25 = vpop.permute.xlu1 %3799  ;;  %v1629_v49 = vsel %vm1604_vm4, %v1596_v2, %v3786_v13  ;;  %v1630_v29 = vsel %vm1604_vm4, %v1597_v42, %v3787_v48  ;;  %v5639_v42 = vld [vmem:[#allocation23_spill] sm:$0xff] }
 0x105   : > { %v3795_v17 = vpop.permute.xlu0 %3794  ;;  %v3802_v21 = vunpack.i.h.bf16 %v3800_v25  ;;  %v3801_v19 = vunpack.i.l.bf16 %v3800_v25 }
 0x106   : > { %3368 = vmatmul.mubr.msk.bf16.gmra.mrb[12].mxu0 %vm1835_vm8, %v5191_v46  ;;  %v3797_v53 = vunpack.i.h.bf16 %v3795_v17  ;;  %v3796_v50 = vunpack.i.l.bf16 %v3795_v17 }
 0x107   : > { %3371 = vmatprep.mubr.msk.bf16.mxu0 %vm1835_vm8, %v5201_v16  ;;  %v1693_v38 = vsel %vm1670_vm6, %v1660_v5, %v3801_v19  ;;  %v1694_v51 = vsel %vm1670_vm6, %v1661_v4, %v3802_v21 }
 0x108   : > { %v3810_v52 = vpop.permute.xlu1 %3809  ;;  %v1662_v39 = vsel %vm1637_vm5, %v1629_v49, %v3796_v50  ;;  %v1663_v47 = vsel %vm1637_vm5, %v1630_v29, %v3797_v53 }
 0x109   : > { %v3805_v20 = vpop.permute.xlu0 %3804  ;;  %v3812_v40 = vunpack.i.h.bf16 %v3810_v52  ;;  %v3811_v23 = vunpack.i.l.bf16 %v3810_v52 }
 0x10a   : > { %v3807_v37 = vunpack.i.h.bf16 %v3805_v20  ;;  %v3806_v8 = vunpack.i.l.bf16 %v3805_v20 }
 0x10b   : > { %v1726_v24 = vsel %vm1703_vm7, %v1693_v38, %v3811_v23  ;;  %v1727_v61 = vsel %vm1703_vm7, %v1694_v51, %v3812_v40 }
 0x10c   : > { %v5231_v11 = vpack.c.bf16 %v1727_v61, %v1726_v24  ;;  %v3820_v9 = vpop.permute.xlu1 %3819  ;;  %v1695_v18 = vsel %vm1670_vm6, %v1662_v39, %v3806_v8  ;;  %v1696_v62 = vsel %vm1670_vm6, %v1663_v47, %v3807_v37  ;;  %v5638_v8 = vld [vmem:[#allocation24_spill] sm:$0xff] }
 0x10d   : > { %v3815_v56 = vpop.permute.xlu0 %3814  ;;  %v3822_v63 = vunpack.i.h.bf16 %v3820_v9  ;;  %v3821_v43 = vunpack.i.l.bf16 %v3820_v9 }
 0x10e   : > { %v3817_v30 = vunpack.i.h.bf16 %v3815_v56  ;;  %v3816_v44 = vunpack.i.l.bf16 %v3815_v56  ;;  %3303 = vmatprep.mubr.msk.bf16.mxu1 %vm1835_vm8, %v5231_v11  ;;  %3372 = vmatmul.mubr.msk.bf16.gmra.mrb[16].mxu0 %vm1835_vm8, %v5231_v11 }
 0x10f   : > { %v1599_v1 = vsel %vm1571_vm3, %v5636_v35, %v3822_v63  ;;  %v1598_v10 = vsel %vm1571_vm3, %v5637_v22, %v3821_v43 }
 0x110   : > { %v1728_v12 = vsel %vm1703_vm7, %v1695_v18, %v3816_v44  ;;  %v1729_v55 = vsel %vm1703_vm7, %v1696_v62, %v3817_v30  ;;  %v3830_v14 = vpop.permute.xlu1 %3829 }
 0x111   : > { %v5243_v26 = vpack.c.bf16 %v1729_v55, %v1728_v12  ;;  %v3825_v31 = vpop.permute.xlu0 %3824  ;;  %v3832_v34 = vunpack.i.h.bf16 %v3830_v14  ;;  %v3831_v59 = vunpack.i.l.bf16 %v3830_v14 }
 0x112   : > { %v3827_v0 = vunpack.i.h.bf16 %v3825_v31  ;;  %v3826_v3 = vunpack.i.l.bf16 %v3825_v31 }
 0x113   : > { %3304 = vmatmul.mubr.msk.bf16.gmra.mrb[20].mxu1 %vm1835_vm8, %v5243_v26  ;;  %3375 = vmatprep.mubr.msk.bf16.mxu0 %vm1835_vm8, %v5243_v26  ;;  %v1631_v19 = vsel %vm1604_vm4, %v1598_v10, %v3831_v59  ;;  %v1632_v6 = vsel %vm1604_vm4, %v1599_v1, %v3832_v34 }
 0x114   : > { %v3840_v54 = vpop.permute.xlu1 %3839  ;;  %v1601_v58 = vsel %vm1571_vm3, %v5638_v8, %v3827_v0  ;;  %v1600_v60 = vsel %vm1571_vm3, %v5639_v42, %v3826_v3  ;;  %v5641_v3 = vld [vmem:[#allocation26_spill] sm:$0xff] }
 0x115   : > { %v3835_v15 = vpop.permute.xlu0 %3834  ;;  %v3842_v45 = vunpack.i.h.bf16 %v3840_v54  ;;  %v3841_v7 = vunpack.i.l.bf16 %v3840_v54 }
 0x116   : > { %v3837_v4 = vunpack.i.h.bf16 %v3835_v15  ;;  %v3836_v48 = vunpack.i.l.bf16 %v3835_v15 }
 0x117   : > { %v1664_v32 = vsel %vm1637_vm5, %v1631_v19, %v3841_v7  ;;  %v1665_v5 = vsel %vm1637_vm5, %v1632_v6, %v3842_v45  ;;  %v5640_v45 = vld [vmem:[#allocation25_spill] sm:$0xff] }
 0x118   : > { %v3850_v33 = vpop.permute.xlu1 %3849  ;;  %v1633_v61 = vsel %vm1604_vm4, %v1600_v60, %v3836_v48  ;;  %v1634_v49 = vsel %vm1604_vm4, %v1601_v58, %v3837_v4 }
 0x119   : > { %v3845_v25 = vpop.permute.xlu0 %3844  ;;  %v3852_v17 = vunpack.i.h.bf16 %v3850_v33  ;;  %v3851_v21 = vunpack.i.l.bf16 %v3850_v33 }
 0x11a   : > { %v3847_v20 = vunpack.i.h.bf16 %v3845_v25  ;;  %v3846_v53 = vunpack.i.l.bf16 %v3845_v25 }
 0x11b   : > { %v1697_v23 = vsel %vm1670_vm6, %v1664_v32, %v3851_v21  ;;  %v1698_v38 = vsel %vm1670_vm6, %v1665_v5, %v3852_v17 }
 0x11c   : > { %v3860_v13 = vpop.permute.xlu1 %3859  ;;  %v1666_v39 = vsel %vm1637_vm5, %v1633_v61, %v3846_v53  ;;  %v1667_v47 = vsel %vm1637_vm5, %v1634_v49, %v3847_v20 }
 0x11d   : > { %v3855_v52 = vpop.permute.xlu0 %3854  ;;  %v3862_v50 = vunpack.i.h.bf16 %v3860_v13  ;;  %v3861_v40 = vunpack.i.l.bf16 %v3860_v13 }
 0x11e   : > { %v3857_v51 = vunpack.i.h.bf16 %v3855_v52  ;;  %v3856_v37 = vunpack.i.l.bf16 %v3855_v52 }
 0x11f   : > { %v1730_v2 = vsel %vm1703_vm7, %v1697_v23, %v3861_v40  ;;  %v1731_v24 = vsel %vm1703_vm7, %v1698_v38, %v3862_v50 }
 0x120   : > { %v5267_v29 = vpack.c.bf16 %v1731_v24, %v1730_v2  ;;  %v3870_v9 = vpop.permute.xlu1 %3869  ;;  %v1699_v18 = vsel %vm1670_vm6, %v1666_v39, %v3856_v37  ;;  %v1700_v62 = vsel %vm1670_vm6, %v1667_v47, %v3857_v51 }
 0x121   : > { %v3865_v56 = vpop.permute.xlu0 %3864  ;;  %v3872_v43 = vunpack.i.h.bf16 %v3870_v9  ;;  %v3871_v54 = vunpack.i.l.bf16 %v3870_v9 }
 0x122   : > { %v3867_v30 = vunpack.i.h.bf16 %v3865_v56  ;;  %v3866_v44 = vunpack.i.l.bf16 %v3865_v56  ;;  %3307 = vmatprep.mubr.msk.bf16.mxu1 %vm1835_vm8, %v5267_v29  ;;  %3376 = vmatmul.mubr.msk.bf16.gmra.mrb[20].mxu0 %vm1835_vm8, %v5267_v29 }
 0x123   : > { %v1603_v10 = vsel %vm1571_vm3, %v4644_v27, %v3872_v43  ;;  %v1602_v7 = vsel %vm1571_vm3, %v5640_v45, %v3871_v54 }
 0x124   : > { %v1732_v12 = vsel %vm1703_vm7, %v1699_v18, %v3866_v44  ;;  %v1733_v55 = vsel %vm1703_vm7, %v1700_v62, %v3867_v30 }
 0x125   : > { %v5279_v14 = vpack.c.bf16 %v1733_v55, %v1732_v12  ;;  %v3880_v31 = vpop.permute.xlu1 %3879  ;;  %v3875_v63 = vpop.permute.xlu0 %3874 }
 0x126   : > { %v3882_v59 = vunpack.i.h.bf16 %v3880_v31  ;;  %v3881_v35 = vunpack.i.l.bf16 %v3880_v31  ;;  %v3877_v1 = vunpack.i.h.bf16 %v3875_v63  ;;  %v3876_v22 = vunpack.i.l.bf16 %v3875_v63 }
 0x127   : > { %3308 = vmatmul.mubr.msk.bf16.gmra.mrb[24].mxu1 %vm1835_vm8, %v5279_v14  ;;  %3379 = vmatprep.mubr.msk.bf16.mxu0 %vm1835_vm8, %v5279_v14 }
 0x128   : > { %v1812_v0 = vsel %vm1571_vm3, %v4656_v36, %v3882_v59  ;;  %v1811_v32 = vsel %vm1571_vm3, %v5641_v3, %v3881_v35  ;;  %v1636_v5 = vsel %vm1604_vm4, %v1603_v10, %v3877_v1  ;;  %v1635_v4 = vsel %vm1604_vm4, %v1602_v7, %v3876_v22 }
 0x129   : > { %v3890_v15 = vpop.permute.xlu1 %3889  ;;  %v3885_v34 = vpop.permute.xlu0 %3884 }
 0x12a   : > { %v3887_v33 = vunpack.i.h.bf16 %v3885_v34  ;;  %v3886_v25 = vunpack.i.l.bf16 %v3885_v34  ;;  %v3892_v27 = vunpack.i.h.bf16 %v3890_v15  ;;  %v3891_v48 = vunpack.i.l.bf16 %v3890_v15 }
 0x12c   : > { %v1668_v13 = vsel %vm1637_vm5, %v1635_v4, %v3886_v25  ;;  %v1669_v52 = vsel %vm1637_vm5, %v1636_v5, %v3887_v33  ;;  %v1813_v60 = vsel %vm1604_vm4, %v1811_v32, %v3891_v48  ;;  %v1814_v2 = vsel %vm1604_vm4, %v1812_v0, %v3892_v27 }
 0x12d   : > { %v3900_v17 = vpop.permute.xlu1 %3899  ;;  %v3895_v21 = vpop.permute.xlu0 %3894 }
 0x12e   : > { %v3897_v19 = vunpack.i.h.bf16 %v3895_v21  ;;  %v3896_v6 = vunpack.i.l.bf16 %v3895_v21  ;;  %v3902_v50 = vunpack.i.h.bf16 %v3900_v17  ;;  %v3901_v40 = vunpack.i.l.bf16 %v3900_v17 }
 0x130   : > { %v1701_v36 = vsel %vm1670_vm6, %v1668_v13, %v3896_v6  ;;  %v1702_v51 = vsel %vm1670_vm6, %v1669_v52, %v3897_v19  ;;  %v1815_v49 = vsel %vm1637_vm5, %v1813_v60, %v3901_v40  ;;  %v1816_v9 = vsel %vm1637_vm5, %v1814_v2, %v3902_v50 }
 0x131   : > { %v3910_v20 = vpop.permute.xlu1 %3909  ;;  %v3905_v53 = vpop.permute.xlu0 %3904 }
 0x132   : > { %v3907_v23 = vunpack.i.h.bf16 %v3905_v53  ;;  %v3906_v38 = vunpack.i.l.bf16 %v3905_v53  ;;  %v3912_v37 = vunpack.i.h.bf16 %v3910_v20  ;;  %v3911_v8 = vunpack.i.l.bf16 %v3910_v20 }
 0x134   : > { %v1734_v58 = vsel %vm1703_vm7, %v1701_v36, %v3906_v38  ;;  %v1735_v42 = vsel %vm1703_vm7, %v1702_v51, %v3907_v23  ;;  %v1817_v47 = vsel %vm1670_vm6, %v1815_v49, %v3911_v8  ;;  %v1818_v30 = vsel %vm1670_vm6, %v1816_v9, %v3912_v37 }
 0x135   : > { %v1751_v24 = vpack.c.bf16 %v1735_v42, %v1734_v58  ;;  %v3915_v61 = vpop.permute.xlu0 %3914 }
 0x136   : > { %v3917_v56 = vunpack.i.h.bf16 %v3915_v61  ;;  %v3916_v39 = vunpack.i.l.bf16 %v3915_v61  ;;  %v3920_v44 = vpop.permute.xlu1 %3919 }
 0x137   : > { %3311 = vmatprep.mubr.msk.bf16.mxu1 %vm1835_vm8, %v1751_v24  ;;  %3380 = vmatmul.mubr.msk.bf16.gmra.mrb[24].mxu0 %vm1835_vm8, %v1751_v24  ;;  %v3922_v12 = vunpack.i.h.bf16 %v3920_v44  ;;  %v3921_v55 = vunpack.i.l.bf16 %v3920_v44 }
 0x138   : > { %v1820_v18 = vsel %vm1703_vm7, %v1818_v30, %v3917_v56  ;;  %v1819_v62 = vsel %vm1703_vm7, %v1817_v47, %v3916_v39 }
 0x139   : > { %v1821_v31 = vpack.c.bf16 %v1820_v18, %v1819_v62  ;;  %v3925_v63 = vpop.permute.xlu0 %3924  ;;  %v2282_v43 = vsel %vm1571_vm3, %v4946_v57, %v3922_v12  ;;  %v2281_v54 = vsel %vm1571_vm3, %v4944_v28, %v3921_v55 }
 0x13a   : > { %v3927_v15 = vunpack.i.h.bf16 %v3925_v63  ;;  %v3926_v34 = vunpack.i.l.bf16 %v3925_v63  ;;  %v3930_v59 = vpop.permute.xlu1 %3929 }
 0x13b   : > { %3312 = vmatmul.mubr.msk.bf16.gmra.mrb[28].mxu1 %vm1835_vm8, %v1821_v31  ;;  %3383 = vmatprep.mubr.msk.bf16.mxu0 %vm1835_vm8, %v1821_v31  ;;  %v3932_v22 = vunpack.i.h.bf16 %v3930_v59  ;;  %v3931_v10 = vunpack.i.l.bf16 %v3930_v59 }
 0x13c   : > { %3335 = vmatprep.mubr.msk.bf16.mxu1 %vm1835_vm8, %v5161_v41  ;;  %v2284_v35 = vsel %vm1604_vm4, %v2282_v43, %v3927_v15  ;;  %v2283_v1 = vsel %vm1604_vm4, %v2281_v54, %v3926_v34 }
 0x13d   : > { %v3935_v57 = vpop.permute.xlu0 %3934  ;;  %v2285_v45 = vsel %vm1637_vm5, %v2283_v1, %v3931_v10  ;;  %v2286_v28 = vsel %vm1637_vm5, %v2284_v35, %v3932_v22 }
 0x13e   : > { %v3937_v7 = vunpack.i.h.bf16 %v3935_v57  ;;  %v3936_v33 = vunpack.i.l.bf16 %v3935_v57  ;;  %v3940_v25 = vpop.permute.xlu1 %3939 }
 0x13f   : > { %v3942_v19 = vunpack.i.h.bf16 %v3940_v25  ;;  %v3941_v41 = vunpack.i.l.bf16 %v3940_v25 }
 0x140   : > { %v2287_v17 = vsel %vm1670_vm6, %v2285_v45, %v3936_v33  ;;  %v2288_v21 = vsel %vm1670_vm6, %v2286_v28, %v3937_v7 }
 0x141   : > { %v2289_v6 = vsel %vm1703_vm7, %v2287_v17, %v3941_v41  ;;  %v2290_v0 = vsel %vm1703_vm7, %v2288_v21, %v3942_v19 }
 0x142   : > { %v2291_v3 = vpack.c.bf16 %v2290_v0, %v2289_v6 }
 0x143   : > { %3336 = vmatmul.mubr.msk.bf16.vlgmr.msra.gmra.mrb[16].mxu1 %vm1835_vm8, %v5191_v46 }
 0x144   : > { %3339 = vmatprep.mubr.msk.bf16.mxu1 %vm1835_vm8, %v5201_v16  ;;  %3384 = vmatmul.mubr.msk.bf16.gmra.mrb[28].mxu0 %vm1835_vm8, %v2291_v3 }
 0x14b   : > { %3340 = vmatmul.mubr.msk.bf16.gmra.mrb[20].mxu1 %vm1835_vm8, %v5231_v11 }
 0x14c   : > { %3343 = vmatprep.mubr.msk.bf16.mxu1 %vm1835_vm8, %v5243_v26 }
 0x153   : > { %3344 = vmatmul.mubr.msk.bf16.gmra.mrb[24].mxu1 %vm1835_vm8, %v5267_v29 }
 0x154   : > { %3347 = vmatprep.mubr.msk.bf16.mxu1 %vm1835_vm8, %v5279_v14 }
 0x15b   : > { %3348 = vmatmul.mubr.msk.bf16.gmra.mrb[28].mxu1 %vm1835_vm8, %v1751_v24 }
 0x182   : > { %v3285_v46 = vpop.f32.mrb[0].mxu1 }
 0x183   : > { %v1922_v32 = vpop.f32.mrb[1].mxu1 }
 0x184   : > { %v3286_v16 = vpop.f32.mrb[2].mxu1 }
 0x185   : > { %v1925_v5 = vpop.f32.mrb[3].mxu1 }
 0x196   : > { %v3289_v4 = vpop.f32.mrb[4].mxu1 }
 0x197   : > { %v1938_v27 = vpop.f32.mrb[5].mxu1 }
 0x198   : > { %v3290_v48 = vpop.f32.mrb[6].mxu1 }
 0x199   : > { %v1941_v11 = vpop.f32.mrb[7].mxu1 }
 0x1aa   : > { %v5341_v13 = vpop.f32.mrb[8].mxu1 }
 0x1ab   : > { %v5343_v26 = vpop.f32.mrb[9].mxu1 }
 0x1ac   : > { %v5345_v52 = vpop.f32.mrb[10].mxu1 }
 0x1ad   : > { %v5347_v29 = vpop.f32.mrb[11].mxu1 }
 0x1be   : > { %v5349_v14 = vpop.f32.mrb[12].mxu1 }
 0x1bf   : > { %v5351_v20 = vpop.f32.mrb[13].mxu1 }
 0x1c0   : > { %v5353_v53 = vpop.f32.mrb[14].mxu1 }
 0x1c1   : > { %v5355_v50 = vpop.f32.mrb[15].mxu1  ;;  %v3357_v40 = vpop.f32.mrb[0].mxu0 }
 0x1c2   : > { %v3391_v23 = vadd.f32 %v3357_v40, %v3285_v46  ;;  %v2345_v38 = vpop.f32.mrb[1].mxu0 }
 0x1c3   : > { %v3392_v36 = vadd.f32 %v2345_v38, %v1922_v32  ;;  %v3358_v51 = vpop.f32.mrb[2].mxu0 }
 0x1c4   : > { %v3152_v37 = vpack.c.bf16 %v3391_v23, %v3391_v23  ;;  %v3393_v8 = vadd.f32 %v3358_v51, %v3286_v16  ;;  %v2348_v58 = vpop.f32.mrb[3].mxu0  ;;  %v2575_v24 = vmul.f32 %v3391_v23, %v3391_v23  ;;  %v2507_v44 = vsel %vm1571_vm3, %v3391_v23, 0.0 }
 0x1c5   : > { %v2573_v42 = vmul.f32 %v3392_v36, %v3392_v36  ;;  %v3150_v60 = vpack.c.bf16 %v3392_v36, %v3392_v36  ;;  %v3394_v2 = vadd.f32 %v2348_v58, %v1925_v5  ;;  %v2504_v49 = vsel %vm1571_vm3, %v3392_v36, 0.0 }
 0x1c6   : > { %2809 = vst.msk [vmem:[%s5361_s12 + $0x8] sm:$0xf] %vm2806_vm9, %v3152_v37  ;;  %v3153_v61 = vpack.c.bf16 %v3393_v8, %v3393_v8  ;;  %v2576_v47 = vmul.f32 %v3393_v8, %v3393_v8  ;;  %v2608_v54 = vsel %vm1571_vm3, %v2575_v24, 0.0  ;;  %v2509_v59 = vsel %vm1571_vm3, %v3393_v8, 0.0 }
 0x1c7   : > { %2807 = vst.msk [vmem:[%s5361_s12] sm:$0xf] %vm2806_vm9, %v3150_v60  ;;  %v2505_v9 = vsel %vm1571_vm3, %v3394_v2, 0.0  ;;  %v2574_v56 = vmul.f32 %v3394_v2, %v3394_v2  ;;  %v3151_v39 = vpack.c.bf16 %v3394_v2, %v3394_v2  ;;  %v2605_v18 = vsel %vm1571_vm3, %v2573_v42, 0.0 }
 0x1c8   : > { %2810 = vst.msk [vmem:[%s5361_s12 + $0xc] sm:$0xf] %vm2806_vm9, %v3153_v61  ;;  %v2506_v30 = vadd.f32 %v2505_v9, %v2504_v49  ;;  %v2610_v35 = vsel %vm1571_vm3, %v2576_v47, 0.0 }
 0x1c9   : > { %v2606_v62 = vsel %vm1571_vm3, %v2574_v56, 0.0  ;;  %2808 = vst.msk [vmem:[%s5361_s12 + $0x4] sm:$0xf] %vm2806_vm9, %v3151_v39  ;;  %v3361_v12 = vpop.f32.mrb[4].mxu0 }
 0x1ca   : > { %v2508_v55 = vadd.f32 %v2507_v44, %v2506_v30  ;;  %v2607_v31 = vadd.f32 %v2606_v62, %v2605_v18  ;;  %v3395_v63 = vadd.f32 %v3361_v12, %v3289_v4  ;;  %v2361_v43 = vpop.f32.mrb[5].mxu0 }
 0x1cb   : > { %v3396_v15 = vadd.f32 %v2361_v43, %v1938_v27  ;;  %v3362_v34 = vpop.f32.mrb[6].mxu0 }
 0x1cc   : > { %v2609_v1 = vadd.f32 %v2608_v54, %v2607_v31  ;;  %v3156_v22 = vpack.c.bf16 %v3395_v63, %v3395_v63  ;;  %v2364_v10 = vpop.f32.mrb[7].mxu0  ;;  %v2510_v57 = vadd.f32 %v2509_v59, %v2508_v55  ;;  %v3397_v25 = vadd.f32 %v3362_v34, %v3290_v48 }
 0x1cd   : > { %v2511_v45 = vsel %vm1571_vm3, %v3396_v15, 0.0  ;;  %v2577_v28 = vmul.f32 %v3396_v15, %v3396_v15  ;;  %v3154_v7 = vpack.c.bf16 %v3396_v15, %v3396_v15  ;;  %v3398_v17 = vadd.f32 %v2364_v10, %v1941_v11 }
 0x1ce   : > { %2813 = vst.msk [vmem:[%s5361_s12 + $0x18] sm:$0xf] %vm2806_vm9, %v3156_v22  ;;  %v2611_v33 = vadd.f32 %v2610_v35, %v2609_v1  ;;  %v2512_v21 = vadd.f32 %v2511_v45, %v2510_v57  ;;  %v2579_v41 = vmul.f32 %v3395_v63, %v3395_v63  ;;  %v3157_v0 = vpack.c.bf16 %v3397_v25, %v3397_v25 }
 0x1cf   : > { %v2612_v19 = vsel %vm1571_vm3, %v2577_v28, 0.0  ;;  %2811 = vst.msk [vmem:[%s5361_s12 + $0x10] sm:$0xf] %vm2806_vm9, %v3154_v7  ;;  %v2513_v3 = vsel %vm1571_vm3, %v3398_v17, 0.0  ;;  %v2578_v46 = vmul.f32 %v3398_v17, %v3398_v17  ;;  %v3155_v32 = vpack.c.bf16 %v3398_v17, %v3398_v17 }
 0x1d0   : > { %v2613_v6 = vadd.f32 %v2612_v19, %v2611_v33  ;;  %2814 = vst.msk [vmem:[%s5361_s12 + $0x1c] sm:$0xf] %vm2806_vm9, %v3157_v0  ;;  %v2514_v5 = vadd.f32 %v2513_v3, %v2512_v21  ;;  %v2515_v48 = vsel %vm1571_vm3, %v3395_v63, 0.0  ;;  %v2580_v11 = vmul.f32 %v3397_v25, %v3397_v25 }
 0x1d1   : > { %v3365_v16 = vpop.f32.mrb[8].mxu0  ;;  %v2614_v40 = vsel %vm1571_vm3, %v2578_v46, 0.0  ;;  %2812 = vst.msk [vmem:[%s5361_s12 + $0x14] sm:$0xf] %vm2806_vm9, %v3155_v32  ;;  %v2616_v36 = vsel %vm1571_vm3, %v2579_v41, 0.0  ;;  %v2517_v51 = vsel %vm1571_vm3, %v3397_v25, 0.0 }
 0x1d2   : > { %v3399_v4 = vadd.f32 %v3365_v16, %v5341_v13  ;;  %v2377_v27 = vpop.f32.mrb[9].mxu0  ;;  %v2516_v37 = vadd.f32 %v2515_v48, %v2514_v5  ;;  %v2615_v8 = vadd.f32 %v2614_v40, %v2613_v6 }
 0x1d3   : > { %v3400_v23 = vadd.f32 %v2377_v27, %v5343_v26  ;;  %v3366_v38 = vpop.f32.mrb[10].mxu0  ;;  %v2618_v26 = vsel %vm1571_vm3, %v2580_v11, 0.0 }
 0x1d4   : > { %v2380_v13 = vpop.f32.mrb[11].mxu0  ;;  %v3160_v58 = vpack.c.bf16 %v3399_v4, %v3399_v4  ;;  %v2617_v24 = vadd.f32 %v2616_v36, %v2615_v8  ;;  %v2518_v61 = vadd.f32 %v2517_v51, %v2516_v37  ;;  %v3401_v49 = vadd.f32 %v3366_v38, %v5345_v52 }
 0x1d5   : > { %v2519_v42 = vsel %vm1571_vm3, %v3400_v23, 0.0  ;;  %v2581_v60 = vmul.f32 %v3400_v23, %v3400_v23  ;;  %v3158_v2 = vpack.c.bf16 %v3400_v23, %v3400_v23  ;;  %v3402_v56 = vadd.f32 %v2380_v13, %v5347_v29 }
 0x1d6   : > { %2817 = vst.msk [vmem:[%s5361_s12 + $0x28] sm:$0xf] %vm2806_vm9, %v3160_v58  ;;  %v2583_v39 = vmul.f32 %v3399_v4, %v3399_v4  ;;  %v2520_v47 = vadd.f32 %v2519_v42, %v2518_v61  ;;  %v2619_v30 = vadd.f32 %v2618_v26, %v2617_v24  ;;  %v3161_v44 = vpack.c.bf16 %v3401_v49, %v3401_v49 }
 0x1d7   : > { %v2620_v9 = vsel %vm1571_vm3, %v2581_v60, 0.0  ;;  %2815 = vst.msk [vmem:[%s5361_s12 + $0x20] sm:$0xf] %vm2806_vm9, %v3158_v2  ;;  %v2521_v18 = vsel %vm1571_vm3, %v3402_v56, 0.0  ;;  %v2582_v62 = vmul.f32 %v3402_v56, %v3402_v56  ;;  %v3159_v52 = vpack.c.bf16 %v3402_v56, %v3402_v56 }
 0x1d8   : > { %v2621_v55 = vadd.f32 %v2620_v9, %v2619_v30  ;;  %v2522_v31 = vadd.f32 %v2521_v18, %v2520_v47  ;;  %v2523_v54 = vsel %vm1571_vm3, %v3399_v4, 0.0  ;;  %v2584_v15 = vmul.f32 %v3401_v49, %v3401_v49  ;;  %2818 = vst.msk [vmem:[%s5361_s12 + $0x2c] sm:$0xf] %vm2806_vm9, %v3161_v44 }
 0x1d9   : > { %v3369_v12 = vpop.f32.mrb[12].mxu0  ;;  %v2622_v29 = vsel %vm1571_vm3, %v2582_v62, 0.0  ;;  %2816 = vst.msk [vmem:[%s5361_s12 + $0x24] sm:$0xf] %vm2806_vm9, %v3159_v52  ;;  %v2624_v35 = vsel %vm1571_vm3, %v2583_v39, 0.0  ;;  %v2525_v1 = vsel %vm1571_vm3, %v3401_v49, 0.0 }
 0x1da   : > { %v3403_v63 = vadd.f32 %v3369_v12, %v5349_v14  ;;  %v2393_v43 = vpop.f32.mrb[13].mxu0  ;;  %v2524_v14 = vadd.f32 %v2523_v54, %v2522_v31  ;;  %v2623_v22 = vadd.f32 %v2622_v29, %v2621_v55 }
 0x1db   : > { %v3404_v34 = vadd.f32 %v2393_v43, %v5351_v20  ;;  %v3370_v59 = vpop.f32.mrb[14].mxu0  ;;  %v2626_v20 = vsel %vm1571_vm3, %v2584_v15, 0.0 }
 0x1dc   : > { %v2396_v10 = vpop.f32.mrb[15].mxu0  ;;  %v3164_v57 = vpack.c.bf16 %v3403_v63, %v3403_v63  ;;  %v2625_v33 = vadd.f32 %v2624_v35, %v2623_v22  ;;  %v2526_v25 = vadd.f32 %v2525_v1, %v2524_v14  ;;  %v3405_v17 = vadd.f32 %v3370_v59, %v5353_v53 }
 0x1dd   : > { %v2527_v45 = vsel %vm1571_vm3, %v3404_v34, 0.0  ;;  %v2585_v28 = vmul.f32 %v3404_v34, %v3404_v34  ;;  %v3162_v7 = vpack.c.bf16 %v3404_v34, %v3404_v34  ;;  %v3406_v19 = vadd.f32 %v2396_v10, %v5355_v50 }
 0x1de   : > { %2821 = vst.msk [vmem:[%s5361_s12 + $0x38] sm:$0xf] %vm2806_vm9, %v3164_v57  ;;  %v2587_v41 = vmul.f32 %v3403_v63, %v3403_v63  ;;  %v2528_v6 = vadd.f32 %v2527_v45, %v2526_v25  ;;  %v2627_v0 = vadd.f32 %v2626_v20, %v2625_v33  ;;  %v3165_v3 = vpack.c.bf16 %v3405_v17, %v3405_v17 }
 0x1df   : > { %v2628_v21 = vsel %vm1571_vm3, %v2585_v28, 0.0  ;;  %2819 = vst.msk [vmem:[%s5361_s12 + $0x30] sm:$0xf] %vm2806_vm9, %v3162_v7  ;;  %v2529_v46 = vsel %vm1571_vm3, %v3406_v19, 0.0  ;;  %v2586_v32 = vmul.f32 %v3406_v19, %v3406_v19  ;;  %v3163_v53 = vpack.c.bf16 %v3406_v19, %v3406_v19 }
 0x1e0   : > { %v2629_v5 = vadd.f32 %v2628_v21, %v2627_v0  ;;  %v2530_v4 = vadd.f32 %v2529_v46, %v2528_v6  ;;  %v2531_v48 = vsel %vm1571_vm3, %v3403_v63, 0.0  ;;  %v2588_v11 = vmul.f32 %v3405_v17, %v3405_v17  ;;  %2822 = vst.msk [vmem:[%s5361_s12 + $0x3c] sm:$0xf] %vm2806_vm9, %v3165_v3 }
 0x1e1   : > { %v3373_v16 = vpop.f32.mrb[16].mxu0  ;;  %v2630_v50 = vsel %vm1571_vm3, %v2586_v32, 0.0  ;;  %2820 = vst.msk [vmem:[%s5361_s12 + $0x34] sm:$0xf] %vm2806_vm9, %v3163_v53  ;;  %v2632_v51 = vsel %vm1571_vm3, %v2587_v41, 0.0  ;;  %v2533_v37 = vsel %vm1571_vm3, %v3405_v17, 0.0 }
 0x1e2   : > { %v2409_v27 = vpop.f32.mrb[17].mxu0  ;;  %v2532_v23 = vadd.f32 %v2531_v48, %v2530_v4  ;;  %v2631_v38 = vadd.f32 %v2630_v50, %v2629_v5  ;;  %v2634_v58 = vsel %vm1571_vm3, %v2588_v11, 0.0 }
 0x1e3   : > { %v3374_v40 = vpop.f32.mrb[18].mxu0 }
 0x1e4   : > { %v2412_v36 = vpop.f32.mrb[19].mxu0  ;;  %v2633_v8 = vadd.f32 %v2632_v51, %v2631_v38  ;;  %v2534_v13 = vadd.f32 %v2533_v37, %v2532_v23 }
 0x1e6   : > { %v2635_v42 = vadd.f32 %v2634_v58, %v2633_v8 }
 0x1f5   : > { %v3377_v60 = vpop.f32.mrb[20].mxu0 }
 0x1f6   : > { %v2425_v2 = vpop.f32.mrb[21].mxu0 }
 0x1f7   : > { %v3378_v24 = vpop.f32.mrb[22].mxu0 }
 0x1f8   : > { %v2428_v61 = vpop.f32.mrb[23].mxu0 }
 0x20a   : > { %v5435_v49 = vpop.f32.mrb[24].mxu0 }
 0x20b   : > { %v5437_v26 = vpop.f32.mrb[25].mxu0 }
 0x20c   : > { %v5439_v9 = vpop.f32.mrb[26].mxu0 }
 0x20d   : > { %v5441_v56 = vpop.f32.mrb[27].mxu0 }
 0x216   : > { %v3337_v39 = vpop.f32.mrb[16].mxu1 }
 0x217   : > { %v3407_v47 = vadd.f32 %v3373_v16, %v3337_v39  ;;  %v2162_v30 = vpop.f32.mrb[17].mxu1  ;;  %v5443_v62 = vpop.f32.mrb[28].mxu0 }
 0x218   : > { %v3408_v44 = vadd.f32 %v2409_v27, %v2162_v30  ;;  %v3338_v18 = vpop.f32.mrb[18].mxu1  ;;  %v5445_v31 = vpop.f32.mrb[29].mxu0 }
 0x219   : > { %v3168_v52 = vpack.c.bf16 %v3407_v47, %v3407_v47  ;;  %v3409_v12 = vadd.f32 %v3374_v40, %v3338_v18  ;;  %v2165_v55 = vpop.f32.mrb[19].mxu1  ;;  %v5448_v29 = vpop.f32.mrb[30].mxu0  ;;  %v2591_v34 = vmul.f32 %v3407_v47, %v3407_v47  ;;  %v2539_v33 = vsel %vm1571_vm3, %v3407_v47, 0.0 }
 0x21a   : > { %v2535_v63 = vsel %vm1571_vm3, %v3408_v44, 0.0  ;;  %v2589_v43 = vmul.f32 %v3408_v44, %v3408_v44  ;;  %v3166_v54 = vpack.c.bf16 %v3408_v44, %v3408_v44  ;;  %v3410_v15 = vadd.f32 %v2412_v36, %v2165_v55  ;;  %v5452_v35 = vpop.f32.mrb[31].mxu0 }
 0x21b   : > { %2825 = vst.msk [vmem:[%s5361_s12 + $0x48] sm:$0xf] %vm2806_vm9, %v3168_v52  ;;  %v2536_v59 = vadd.f32 %v2535_v63, %v2534_v13  ;;  %v3169_v14 = vpack.c.bf16 %v3409_v12, %v3409_v12  ;;  %v2592_v45 = vmul.f32 %v3409_v12, %v3409_v12  ;;  %v2640_v6 = vsel %vm1571_vm3, %v2591_v34, 0.0 }
 0x21c   : > { %v2636_v1 = vsel %vm1571_vm3, %v2589_v43, 0.0  ;;  %2823 = vst.msk [vmem:[%s5361_s12 + $0x40] sm:$0xf] %vm2806_vm9, %v3166_v54  ;;  %v2537_v22 = vsel %vm1571_vm3, %v3410_v15, 0.0  ;;  %v2590_v10 = vmul.f32 %v3410_v15, %v3410_v15  ;;  %v3167_v7 = vpack.c.bf16 %v3410_v15, %v3410_v15 }
 0x21d   : > { %v2637_v57 = vadd.f32 %v2636_v1, %v2635_v42  ;;  %v2538_v28 = vadd.f32 %v2537_v22, %v2536_v59  ;;  %2826 = vst.msk [vmem:[%s5361_s12 + $0x4c] sm:$0xf] %vm2806_vm9, %v3169_v14  ;;  %v2541_v46 = vsel %vm1571_vm3, %v3409_v12, 0.0  ;;  %v2642_v32 = vsel %vm1571_vm3, %v2592_v45, 0.0 }
 0x21e   : > { %v2638_v25 = vsel %vm1571_vm3, %v2590_v10, 0.0  ;;  %v3341_v17 = vpop.f32.mrb[20].mxu1  ;;  %2824 = vst.msk [vmem:[%s5361_s12 + $0x44] sm:$0xf] %vm2806_vm9, %v3167_v7 }
 0x21f   : > { %v2540_v20 = vadd.f32 %v2539_v33, %v2538_v28  ;;  %v2639_v21 = vadd.f32 %v2638_v25, %v2637_v57  ;;  %v3411_v19 = vadd.f32 %v3377_v60, %v3341_v17  ;;  %v2178_v41 = vpop.f32.mrb[21].mxu1 }
 0x220   : > { %v3412_v0 = vadd.f32 %v2425_v2, %v2178_v41  ;;  %v3342_v3 = vpop.f32.mrb[22].mxu1 }
 0x221   : > { %v2641_v53 = vadd.f32 %v2640_v6, %v2639_v21  ;;  %v3172_v16 = vpack.c.bf16 %v3411_v19, %v3411_v19  ;;  %v2181_v5 = vpop.f32.mrb[23].mxu1  ;;  %v2542_v4 = vadd.f32 %v2541_v46, %v2540_v20  ;;  %v3413_v40 = vadd.f32 %v3378_v24, %v3342_v3 }
 0x222   : > { %v2543_v27 = vsel %vm1571_vm3, %v3412_v0, 0.0  ;;  %v2593_v48 = vmul.f32 %v3412_v0, %v3412_v0  ;;  %v3170_v11 = vpack.c.bf16 %v3412_v0, %v3412_v0  ;;  %v3414_v23 = vadd.f32 %v2428_v61, %v2181_v5 }
 0x223   : > { %2829 = vst.msk [vmem:[%s5361_s12 + $0x58] sm:$0xf] %vm2806_vm9, %v3172_v16  ;;  %v2643_v50 = vadd.f32 %v2642_v32, %v2641_v53  ;;  %v2544_v38 = vadd.f32 %v2543_v27, %v2542_v4  ;;  %v2595_v51 = vmul.f32 %v3411_v19, %v3411_v19  ;;  %v3173_v8 = vpack.c.bf16 %v3413_v40, %v3413_v40 }
 0x224   : > { %v2644_v36 = vsel %vm1571_vm3, %v2593_v48, 0.0  ;;  %2827 = vst.msk [vmem:[%s5361_s12 + $0x50] sm:$0xf] %vm2806_vm9, %v3170_v11  ;;  %v2545_v13 = vsel %vm1571_vm3, %v3414_v23, 0.0  ;;  %v2594_v58 = vmul.f32 %v3414_v23, %v3414_v23  ;;  %v3171_v42 = vpack.c.bf16 %v3414_v23, %v3414_v23 }
 0x225   : > { %v2645_v37 = vadd.f32 %v2644_v36, %v2643_v50  ;;  %2830 = vst.msk [vmem:[%s5361_s12 + $0x5c] sm:$0xf] %vm2806_vm9, %v3173_v8  ;;  %v2546_v2 = vadd.f32 %v2545_v13, %v2544_v38  ;;  %v2547_v39 = vsel %vm1571_vm3, %v3411_v19, 0.0  ;;  %v2596_v47 = vmul.f32 %v3413_v40, %v3413_v40 }
 0x226   : > { %v3345_v60 = vpop.f32.mrb[24].mxu1  ;;  %v2646_v30 = vsel %vm1571_vm3, %v2594_v58, 0.0  ;;  %2828 = vst.msk [vmem:[%s5361_s12 + $0x54] sm:$0xf] %vm2806_vm9, %v3171_v42  ;;  %v2648_v52 = vsel %vm1571_vm3, %v2595_v51, 0.0  ;;  %v2549_v12 = vsel %vm1571_vm3, %v3413_v40, 0.0 }
 0x227   : > { %v3415_v24 = vadd.f32 %v5435_v49, %v3345_v60  ;;  %v2194_v61 = vpop.f32.mrb[25].mxu1  ;;  %v2548_v55 = vadd.f32 %v2547_v39, %v2546_v2  ;;  %v2647_v63 = vadd.f32 %v2646_v30, %v2645_v37 }
 0x228   : > { %v3416_v44 = vadd.f32 %v5437_v26, %v2194_v61  ;;  %v3346_v18 = vpop.f32.mrb[26].mxu1  ;;  %v2650_v26 = vsel %vm1571_vm3, %v2596_v47, 0.0 }
 0x229   : > { %v2197_v49 = vpop.f32.mrb[27].mxu1  ;;  %v3176_v43 = vpack.c.bf16 %v3415_v24, %v3415_v24  ;;  %v2649_v59 = vadd.f32 %v2648_v52, %v2647_v63  ;;  %v2550_v1 = vadd.f32 %v2549_v12, %v2548_v55  ;;  %v3417_v14 = vadd.f32 %v5439_v9, %v3346_v18 }
 0x22a   : > { %v2551_v54 = vsel %vm1571_vm3, %v3416_v44, 0.0  ;;  %v2597_v15 = vmul.f32 %v3416_v44, %v3416_v44  ;;  %v3174_v34 = vpack.c.bf16 %v3416_v44, %v3416_v44  ;;  %v3418_v10 = vadd.f32 %v5441_v56, %v2197_v49 }
 0x22b   : > { %2833 = vst.msk [vmem:[%s5361_s12 + $0x68] sm:$0xf] %vm2806_vm9, %v3176_v43  ;;  %v2599_v57 = vmul.f32 %v3415_v24, %v3415_v24  ;;  %v2552_v45 = vadd.f32 %v2551_v54, %v2550_v1  ;;  %v2651_v28 = vadd.f32 %v2650_v26, %v2649_v59  ;;  %v3177_v7 = vpack.c.bf16 %v3417_v14, %v3417_v14 }
 0x22c   : > { %v2652_v22 = vsel %vm1571_vm3, %v2597_v15, 0.0  ;;  %2831 = vst.msk [vmem:[%s5361_s12 + $0x60] sm:$0xf] %vm2806_vm9, %v3174_v34  ;;  %v2553_v33 = vsel %vm1571_vm3, %v3418_v10, 0.0  ;;  %v2598_v25 = vmul.f32 %v3418_v10, %v3418_v10  ;;  %v3175_v9 = vpack.c.bf16 %v3418_v10, %v3418_v10 }
 0x22d   : > { %v2653_v20 = vadd.f32 %v2652_v22, %v2651_v28  ;;  %v2554_v21 = vadd.f32 %v2553_v33, %v2552_v45  ;;  %v2555_v6 = vsel %vm1571_vm3, %v3415_v24, 0.0  ;;  %v2600_v0 = vmul.f32 %v3417_v14, %v3417_v14  ;;  %2834 = vst.msk [vmem:[%s5361_s12 + $0x6c] sm:$0xf] %vm2806_vm9, %v3177_v7 }
 0x22e   : > { %v3349_v17 = vpop.f32.mrb[28].mxu1  ;;  %v2654_v56 = vsel %vm1571_vm3, %v2598_v25, 0.0  ;;  %2832 = vst.msk [vmem:[%s5361_s12 + $0x64] sm:$0xf] %vm2806_vm9, %v3175_v9  ;;  %v2656_v32 = vsel %vm1571_vm3, %v2599_v57, 0.0  ;;  %v2557_v53 = vsel %vm1571_vm3, %v3417_v14, 0.0 }
 0x22f   : > { %v3419_v19 = vadd.f32 %v5443_v62, %v3349_v17  ;;  %v2210_v41 = vpop.f32.mrb[29].mxu1  ;;  %v2556_v62 = vadd.f32 %v2555_v6, %v2554_v21  ;;  %v2655_v16 = vadd.f32 %v2654_v56, %v2653_v20 }
 0x230   : > { %v3420_v3 = vadd.f32 %v5445_v31, %v2210_v41  ;;  %v3350_v46 = vpop.f32.mrb[30].mxu1  ;;  %v2658_v31 = vsel %vm1571_vm3, %v2600_v0, 0.0 }
 0x231   : > { %v2213_v5 = vpop.f32.mrb[31].mxu1  ;;  %v3180_v4 = vpack.c.bf16 %v3419_v19, %v3419_v19  ;;  %v2657_v50 = vadd.f32 %v2656_v32, %v2655_v16  ;;  %v2558_v40 = vadd.f32 %v2557_v53, %v2556_v62  ;;  %v3421_v23 = vadd.f32 %v5448_v29, %v3350_v46 }
 0x232   : > { %v2559_v27 = vsel %vm1571_vm3, %v3420_v3, 0.0  ;;  %v2601_v48 = vmul.f32 %v3420_v3, %v3420_v3  ;;  %v3178_v11 = vpack.c.bf16 %v3420_v3, %v3420_v3  ;;  %v3422_v36 = vadd.f32 %v5452_v35, %v2213_v5 }
 0x233   : > { %2837 = vst.msk [vmem:[%s5361_s12 + $0x78] sm:$0xf] %vm2806_vm9, %v3180_v4  ;;  %v2603_v51 = vmul.f32 %v3419_v19, %v3419_v19  ;;  %v2560_v37 = vadd.f32 %v2559_v27, %v2558_v40  ;;  %v2659_v8 = vadd.f32 %v2658_v31, %v2657_v50  ;;  %v3181_v13 = vpack.c.bf16 %v3421_v23, %v3421_v23 }
 0x234   : > { %v2660_v38 = vsel %vm1571_vm3, %v2601_v48, 0.0  ;;  %2835 = vst.msk [vmem:[%s5361_s12 + $0x70] sm:$0xf] %vm2806_vm9, %v3178_v11  ;;  %v2561_v58 = vsel %vm1571_vm3, %v3422_v36, 0.0  ;;  %v2602_v42 = vmul.f32 %v3422_v36, %v3422_v36  ;;  %v3179_v29 = vpack.c.bf16 %v3422_v36, %v3422_v36 }
 0x235   : > { %v2661_v60 = vadd.f32 %v2660_v38, %v2659_v8  ;;  %v2562_v2 = vadd.f32 %v2561_v58, %v2560_v37  ;;  %v2563_v24 = vsel %vm1571_vm3, %v3419_v19, 0.0  ;;  %v2604_v61 = vmul.f32 %v3421_v23, %v3421_v23  ;;  %2838 = vst.msk [vmem:[%s5361_s12 + $0x7c] sm:$0xf] %vm2806_vm9, %v3181_v13 }
 0x236   : > { %v2662_v39 = vsel %vm1571_vm3, %v2602_v42, 0.0  ;;  %2836 = vst.msk [vmem:[%s5361_s12 + $0x74] sm:$0xf] %vm2806_vm9, %v3179_v29  ;;  %v2664_v30 = vsel %vm1571_vm3, %v2603_v51, 0.0  ;;  %v2565_v44 = vsel %vm1571_vm3, %v3421_v23, 0.0 }
 0x237   : > { %v2564_v35 = vadd.f32 %v2563_v24, %v2562_v2  ;;  %v2663_v47 = vadd.f32 %v2662_v39, %v2661_v60  ;;  %v2666_v12 = vsel %vm1571_vm3, %v2604_v61, 0.0 }
 0x239   : > { %v2566_v18 = vadd.f32 %v2565_v44, %v2564_v35  ;;  %v2665_v52 = vadd.f32 %v2664_v30, %v2663_v47 }
 0x23b   : > { %v2567_v55 = vrot.slane %v2566_v18, 4  ;;  %v2667_v63 = vadd.f32 %v2666_v12, %v2665_v52 }
 0x23d   : > { %v2568_v49 = vadd.f32 %v2567_v55, %v2566_v18  ;;  %v2668_v43 = vrot.slane %v2667_v63, 4 }
 0x23f   : > { %v2569_v54 = vrot.slane %v2568_v49, 2  ;;  %v2669_v15 = vadd.f32 %v2668_v43, %v2667_v63 }
 0x241   : > { %v2570_v34 = vadd.f32 %v2569_v54, %v2568_v49  ;;  %v2670_v59 = vrot.slane %v2669_v15, 2 }
 0x243   : > { %v2571_v1 = vrot.slane %v2570_v34, 1  ;;  %v2671_v14 = vadd.f32 %v2670_v59, %v2669_v15 }
 0x245   : > { %v2672_v26 = vrot.slane %v2671_v14, 1  ;;  %v2572_v22 = vadd.f32 %v2571_v1, %v2570_v34 }
 0x247   : > { %v2673_v10 = vadd.f32 %v2672_v26, %v2671_v14 }
 0x249   : > { %v2675_v57 = vsel %vm2674_vm10, %v2572_v22, %v2673_v10 }
 0x24a   : > { %2677 = vst.msk [vmem:[%s509_s30] sm:$0x3] %vm2676_vm11, %v2675_v57 }
 0x24b PF: > { %s17_s23 = sadd.s32 1, %s3972_s23   ;;  %s5642_s21 = smov %s3968_s22 }
 0x24c   : > { %p14_p5 = scmp.ge.s32.totalorder %s17_s23, 4   ;;  %s5643_s22 = smov %s5645_s24 }
 0x24e   :  { %16 = sbr.rel (!%p14_p5) target bundleno = 2 (0x2), region = 93 }

</bundles_post_ra>
